<compile_context>
chip_gen: v6e
topology: v6e:2x2x1
jax: 0.10.0
libtpu: 0.0.40
codegen_flags: <defaults>
</compile_context>

<pallas_src>
import jax
import jax.numpy as jnp
from jax.experimental import pallas as pl
from jax.experimental.pallas import tpu as pltpu

NUM_GROUPS = 32
GN_EPS = 1e-5
KT, KH, KW = 3, 3, 3


# ---------------------------------------------------------------------------
# Wrapper-side constant builders (built once, outside the kernels).
# ---------------------------------------------------------------------------
def _group_stats_factors(C, W, num_groups, M):
    """Factored group-averaging matrices for the lane-dense [..., W*C] layout.

    per-lane sums (.., W*C) @ Sa (W*C, G) -> group mean (.., G)
                                @ Sb (G, W*C) -> mean replicated to every lane.
    O(W*C*G) storage instead of the dense O((W*C)^2) matrix."""
    Cg = C // num_groups
    gid = jnp.tile(jnp.arange(C, dtype=jnp.int32) // Cg, W)               # (W*C,)
    onehot = (gid[:, None] == jnp.arange(num_groups, dtype=jnp.int32)[None, :])
    onehot = onehot.astype(jnp.float32)                                   # (W*C, G)
    sa = onehot / float(Cg * M)
    sb = onehot.T                                                         # (G, W*C)
    return sa, sb


def _banded_conv_weights(w, W):
    """(KT,KH,KW,Cin,Cout) DHWIO -> (KT*KH*W*Cin, W*Cout) bf16 banded matrix.

    The kw taps + the W axis are folded into the matmul; the (1,1) width padding
    becomes dropped (zero) bands, so the kernel needs no W padding.  Row block
    `tap = kt*KH + kh` is consumed by one accumulating MXU dot."""
    KT_, KH_, KW_, Cin, Cout = w.shape
    mat = jnp.zeros((KT_, KH_, W * Cin, W * Cout), jnp.float32)
    for kw in range(KW_):
        for ow in range(W):
            iw = ow + kw - (KW_ // 2)
            if 0 <= iw < W:
                mat = mat.at[:, :, iw * Cin:(iw + 1) * Cin,
                             ow * Cout:(ow + 1) * Cout].set(
                                 w[:, :, kw].astype(jnp.float32))
    return mat.reshape(KT_ * KH_ * W * Cin, W * Cout).astype(jnp.bfloat16)


def _blockdiag_weights(w3, W):
    """1x1x1 conv (Cin,Cout) -> block-diagonal (W*Cin, W*Cout) bf16, so the fused
    shortcut is just one more accumulating dot in the same lane-dense layout."""
    Cin, Cout = w3.shape[-2], w3.shape[-1]
    w3 = w3.reshape(Cin, Cout).astype(jnp.float32)
    eye = jnp.eye(W, dtype=jnp.float32)
    return jnp.einsum("vu,io->viuo", eye, w3).reshape(W * Cin, W * Cout).astype(jnp.bfloat16)


def _const_block_spec(block_shape, index_map):
    """Grid-invariant operand: single-buffer it (halves constant VMEM; key on
    v7x's 64 MiB).  Falls back to the default spec on JAX without pipeline_mode."""
    try:
        return pl.BlockSpec(block_shape, index_map, pipeline_mode=pl.Buffered(1))
    except TypeError:
        return pl.BlockSpec(block_shape, index_map)


def _compiler_params():
    """Per-generation VMEM limit (do not hard-code 48 MiB; v7x only has 64 MiB)."""
    try:
        cap = pltpu.get_tpu_info().vmem_capacity_bytes
        vmem_limit = int(cap * 3 // 4)     # leave headroom for the compiler
    except Exception:
        vmem_limit = None                  # fall back to compiler default
    return pltpu.CompilerParams(
        dimension_semantics=("parallel",),
        vmem_limit_bytes=vmem_limit,
    )


# ---------------------------------------------------------------------------
# Fused GroupNorm + SiLU + causal 3x3x3 conv (+ optional fused 1x1x1 shortcut).
# ---------------------------------------------------------------------------
def _make_kernel(Nb, D, H, W, Cin, Cout, eps, with_res, Cres):
    M = Nb * D * H                      # matmul M rows per grid step
    WCin, WCout = W * Cin, W * Cout

    def kernel(*refs):
        if with_res:
            (x_ref, g_ref, b_ref, sa_ref, sb_ref, w_ref,
             r_ref, wr_ref, o_ref, pad_ref) = refs
        else:
            x_ref, g_ref, b_ref, sa_ref, sb_ref, w_ref, o_ref, pad_ref = refs

        # ---- zero only the halo (the interior is fully overwritten below).
        #      Done every step so it stays correct if the parallel axis is
        #      split across TensorCores (scratch is per-core). ----
        pad_ref[:, :KT - 1, :, :] = jnp.zeros(
            (Nb, KT - 1, H + KH - 1, WCin), jnp.bfloat16)
        hzero = jnp.zeros((Nb, D, 1, WCin), jnp.bfloat16)
        pad_ref[:, KT - 1:, 0:1, :] = hzero
        pad_ref[:, KT - 1:, H + 1:H + 2, :] = hzero

        # ---- GroupNorm + SiLU, per-batch stats, all in the lane-dense layout ----
        xf = x_ref[...].astype(jnp.float32)                     # (Nb, D, H, W*Cin)
        ssum = jnp.sum(xf, axis=(1, 2))                         # (Nb, W*Cin)
        ssq = jnp.sum(xf * xf, axis=(1, 2))
        stats = jnp.concatenate([ssum, ssq], axis=0)            # (2*Nb, W*Cin)
        grp = jnp.dot(
            jnp.dot(stats, sa_ref[...], preferred_element_type=jnp.float32),
            sb_ref[...], preferred_element_type=jnp.float32)    # (2*Nb, W*Cin)
        mean, msq = grp[:Nb], grp[Nb:]
        var = msq - mean * mean       # f32 E[x^2]-E[x]^2: fine for O(1) VAE activations
        scale = jax.lax.rsqrt(var + eps) * g_ref[...]           # (Nb, W*Cin)
        shift = b_ref[...] - mean * scale
        y = xf * scale[:, None, None, :] + shift[:, None, None, :]
        y = (y * jax.nn.sigmoid(y)).astype(jnp.bfloat16)        # SiLU, bf16 for the MXU
        pad_ref[:, KT - 1:KT - 1 + D, 1:1 + H, :] = y

        # ---- causal 3x3x3 conv: 9 accumulating MXU dots (one per (kt,kh) tap).
        #      kw + the W axis live inside the banded weight; M = Nb*D*H. ----
        acc = None
        for kt in range(KT):
            for kh in range(KH):
                tap = kt * KH + kh
                win = pad_ref[:, kt:kt + D, kh:kh + H, :].reshape(M, WCin)
                part = jnp.dot(win, w_ref[tap * WCin:(tap + 1) * WCin, :],
                               preferred_element_type=jnp.float32)
                acc = part if acc is None else acc + part

        if with_res:
            # fused 1x1x1 shortcut + residual add: the 10th accumulating dot.
            r = r_ref[...].reshape(M, W * Cres)                 # already bf16
            acc = acc + jnp.dot(r, wr_ref[...],
                                preferred_element_type=jnp.float32)

        o_ref[...] = acc.reshape(Nb, D, H, WCout).astype(o_ref.dtype)

    return kernel


def _pick_batch_tile(N, D, H, target_m=256):
    """Largest divisor of N reaching M = Nb*D*H >= target_m (MXU row utilization)."""
    nb = 1
    for cand in range(1, N + 1):
        if N % cand == 0:
            nb = cand
            if cand * D * H >= target_m:
                break
    return nb


def fused_gn_silu_causal_conv3d(x4, gamma_t, beta_t, sa, sb, w_banded, W, cout, *,
                                res4=None, w_res=None, out_dtype, batch_tile=None):
    """x4: [N, D, H, W*Cin] lane-dense activations. Returns [N, D, H, W*cout]."""
    N, D, H, WCin = x4.shape
    cin = WCin // W
    with_res = res4 is not None
    cres = None if res4 is None else res4.shape[-1] // W
    nb = batch_tile if batch_tile is not None else _pick_batch_tile(N, D, H)
    assert N % nb == 0
    kernel = _make_kernel(nb, D, H, W, cin, cout, GN_EPS, with_res, cres)

    in_specs = [
        pl.BlockSpec((nb, D, H, W * cin), lambda n: (n, 0, 0, 0)),
        _const_block_spec(gamma_t.shape, lambda n: (0, 0)),
        _const_block_spec(beta_t.shape, lambda n: (0, 0)),
        _const_block_spec(sa.shape, lambda n: (0, 0)),
        _const_block_spec(sb.shape, lambda n: (0, 0)),
        _const_block_spec(w_banded.shape, lambda n: (0, 0)),
    ]
    args = [x4, gamma_t, beta_t, sa, sb, w_banded]
    if with_res:
        in_specs += [
            pl.BlockSpec((nb, D, H, W * cres), lambda n: (n, 0, 0, 0)),
            _const_block_spec(w_res.shape, lambda n: (0, 0)),
        ]
        args += [res4, w_res]

    return pl.pallas_call(
        kernel,
        out_shape=jax.ShapeDtypeStruct((N, D, H, W * cout), out_dtype),
        grid=(N // nb,),
        in_specs=in_specs,
        out_specs=pl.BlockSpec((nb, D, H, W * cout), lambda n: (n, 0, 0, 0)),
        scratch_shapes=[pltpu.VMEM((nb, D + KT - 1, H + KH - 1, W * cin),
                                   jnp.bfloat16)],
        compiler_params=_compiler_params(),
    )(*args)


# ---------------------------------------------------------------------------
# ResBlock forward (layout plumbing + constant building in JAX, hot path in Pallas).
# ---------------------------------------------------------------------------
def resblock_forward(x_ncdhw, params, num_groups=NUM_GROUPS):
    """x_ncdhw: [N, Cin, D, H, W] (PyTorch NCDHW layout)."""
    N, Cin, D, H, W = x_ncdhw.shape
    Cf = params["w1"].shape[-1]
    M = D * H * W

    # NCDHW -> lane-dense channels-last [N, D, H, W*C].
    # TODO(synk): when stacking ResBlocks keep activations in this layout and do
    # the NCDHW<->lane-dense transposes once at the network boundary.
    x4 = jnp.transpose(x_ncdhw, (0, 2, 3, 4, 1)).reshape(N, D, H, W * Cin)
    x4_bf = x4.astype(jnp.bfloat16)   # residual operand for kernel 2 (MXU is bf16 anyway)

    # Constants hoisted out of the kernels (built once; jit-compatible).
    sa1, sb1 = _group_stats_factors(Cin, W, num_groups, M)
    sa2, sb2 = _group_stats_factors(Cf, W, num_groups, M)
    g1 = jnp.tile(params["g1"].astype(jnp.float32), W).reshape(1, W * Cin)
    b1 = jnp.tile(params["b1"].astype(jnp.float32), W).reshape(1, W * Cin)
    g2 = jnp.tile(params["g2"].astype(jnp.float32), W).reshape(1, W * Cf)
    b2 = jnp.tile(params["b2"].astype(jnp.float32), W).reshape(1, W * Cf)
    w1b = _banded_conv_weights(params["w1"], W)       # (9*W*Cin, W*Cf) bf16
    w2b = _banded_conv_weights(params["w2"], W)       # (9*W*Cf,  W*Cf) bf16
    if Cin != Cf:
        w3 = params["w3"]                             # 1x1x1 shortcut conv
    else:
        w3 = jnp.eye(Cin, dtype=jnp.float32)[None, None, None]  # plain residual
    # TODO(synk): use_conv_shortcut=True (3x3x3 shortcut conv) is not wired up.
    w3b = _blockdiag_weights(w3, W)                   # (W*Cin,   W*Cf) bf16

    # norm1 + SiLU + conv1 (one kernel); `h` stays bf16 in HBM.
    h = fused_gn_silu_causal_conv3d(x4, g1, b1, sa1, sb1, w1b, W, Cf,
                                    out_dtype=jnp.bfloat16)
    # norm2 + SiLU + conv2 + 1x1x1 shortcut + residual add (one kernel).
    out = fused_gn_silu_causal_conv3d(h, g2, b2, sa2, sb2, w2b, W, Cf,
                                      res4=x4_bf, w_res=w3b,
                                      out_dtype=x_ncdhw.dtype)

    return jnp.transpose(out.reshape(N, D, H, W, Cf), (0, 4, 1, 2, 3))


# ---------------------------------------------------------------------------
# Pure-JAX f32 reference for verification.
# ---------------------------------------------------------------------------
def _ref_forward(x_ncdhw, p, num_groups=NUM_GROUPS):
    x = jnp.transpose(x_ncdhw, (0, 2, 3, 4, 1))

    def gn_silu(x, g, b):
        N, D, H, W, C = x.shape
        xr = x.reshape(N, -1, num_groups, C // num_groups)
        m = xr.mean(axis=(1, 3), keepdims=True)
        v = ((xr - m) ** 2).mean(axis=(1, 3), keepdims=True)
        y = (xr - m) / jnp.sqrt(v + GN_EPS)
        y = y.reshape(N, D, H, W, C) * g + b
        return y * jax.nn.sigmoid(y)

    def conv(x, w, pad):
        xp = jnp.pad(x, ((0, 0),) + pad + ((0, 0),))
        return jax.lax.conv_general_dilated(
            xp, w, (1, 1, 1), "VALID",
            dimension_numbers=("NDHWC", "DHWIO", "NDHWC"))

    res = conv(x, p["w3"], ((0, 0), (0, 0), (0, 0)))
    h = gn_silu(x, p["g1"], p["b1"])
    h = conv(h, p["w1"], ((2, 0), (1, 1), (1, 1)))
    h = gn_silu(h, p["g2"], p["b2"])
    h = conv(h, p["w2"], ((2, 0), (1, 1), (1, 1)))
    return jnp.transpose(h + res, (0, 4, 1, 2, 3))


if __name__ == "__main__":
    key = jax.random.PRNGKey(0)
    N, Cin, Cf = 2, 32, 64          # in_channels=32, filters=64 (-> 1x1x1 shortcut path)
    D, H, W = 4, 8, 8               # (T, H, W)

    ks = jax.random.split(key, 8)
    x = jax.random.normal(ks[0], (N, Cin, D, H, W), jnp.float32)  # torch NCDHW layout

    params = {
        "g1": 1.0 + 0.1 * jax.random.normal(ks[1], (Cin,), jnp.float32),
        "b1": 0.1 * jax.random.normal(ks[2], (Cin,), jnp.float32),
        "w1": 0.05 * jax.random.normal(ks[3], (3, 3, 3, Cin, Cf), jnp.float32),
        "g2": 1.0 + 0.1 * jax.random.normal(ks[4], (Cf,), jnp.float32),
        "b2": 0.1 * jax.random.normal(ks[5], (Cf,), jnp.float32),
        "w2": 0.05 * jax.random.normal(ks[6], (3, 3, 3, Cf, Cf), jnp.float32),
        "w3": 0.05 * jax.random.normal(ks[7], (1, 1, 1, Cin, Cf), jnp.float32),
    }

    out = jax.block_until_ready(resblock_forward(x, params))
    assert out.shape == (N, Cf, D, H, W), out.shape

    ref = jax.block_until_ready(_ref_forward(x, params))
    max_err = float(jnp.max(jnp.abs(out - ref)))
    # bf16 MXU operands + bf16 intermediate `h` vs a pure-f32 reference.
    assert jnp.allclose(out, ref, atol=5e-2, rtol=5e-2), max_err

    print("KERNEL_OK")
</pallas_src>

<mosaic_0001>
module attributes {stable_mosaic.version = 11 : i64} {
  func.func @kernel(%arg0: i32, %arg1: memref<2x4x8x256xf32, #tpu.memory_space<vmem>>, %arg2: memref<1x256xf32, #tpu.memory_space<vmem>>, %arg3: memref<1x256xf32, #tpu.memory_space<vmem>>, %arg4: memref<256x32xf32, #tpu.memory_space<vmem>>, %arg5: memref<32x256xf32, #tpu.memory_space<vmem>>, %arg6: memref<2304x512xbf16, #tpu.memory_space<vmem>>, %arg7: memref<2x4x8x512xbf16, #tpu.memory_space<vmem>>, %arg8: memref<2x6x10x256xbf16, #tpu.memory_space<vmem>>) attributes {dimension_semantics = [#tpu.dimension_semantics<parallel>], iteration_bounds = array<i64: 1>, scalar_prefetch = 0 : i64, scratch_operands = 1 : i64, tpu.core_type = #tpu.core_type<tc>, window_params = [{transform_indices = @transform_0, window_bounds = array<i64: 2, 4, 8, 256>}, {pipeline_mode = #tpu.pipeline_mode<synchronous>, transform_indices = @transform_1, window_bounds = array<i64: 1, 256>}, {pipeline_mode = #tpu.pipeline_mode<synchronous>, transform_indices = @transform_2, window_bounds = array<i64: 1, 256>}, {pipeline_mode = #tpu.pipeline_mode<synchronous>, transform_indices = @transform_3, window_bounds = array<i64: 256, 32>}, {pipeline_mode = #tpu.pipeline_mode<synchronous>, transform_indices = @transform_4, window_bounds = array<i64: 32, 256>}, {pipeline_mode = #tpu.pipeline_mode<synchronous>, transform_indices = @transform_5, window_bounds = array<i64: 2304, 512>}, {transform_indices = @transform_6, window_bounds = array<i64: 2, 4, 8, 512>}]} {
    %cst = arith.constant 0.000000e+00 : bf16
    %0 = vector.broadcast %cst : bf16 to vector<2x2x10x256xbf16>
    %c0 = arith.constant 0 : index
    %c0_0 = arith.constant 0 : index
    %c0_1 = arith.constant 0 : index
    %c0_2 = arith.constant 0 : index
    %1 = vector.load %arg8[%c0, %c0_0, %c0_1, %c0_2] : memref<2x6x10x256xbf16, #tpu.memory_space<vmem>>, vector<2x2x10x256xbf16>
    tpu.vector_store %arg8[%c0, %c0_0, %c0_1, %c0_2], %0 {strides = array<i32>} : memref<2x6x10x256xbf16, #tpu.memory_space<vmem>>, vector<2x2x10x256xbf16>,
    %cst_3 = arith.constant 0.000000e+00 : bf16
    %2 = vector.broadcast %cst_3 : bf16 to vector<2x4x1x256xbf16>
    %c0_4 = arith.constant 0 : index
    %c2 = arith.constant 2 : index
    %c0_5 = arith.constant 0 : index
    %c0_6 = arith.constant 0 : index
    %3 = vector.load %arg8[%c0_4, %c2, %c0_5, %c0_6] : memref<2x6x10x256xbf16, #tpu.memory_space<vmem>>, vector<2x4x1x256xbf16>
    tpu.vector_store %arg8[%c0_4, %c2, %c0_5, %c0_6], %2 {strides = array<i32>} : memref<2x6x10x256xbf16, #tpu.memory_space<vmem>>, vector<2x4x1x256xbf16>,
    %c0_7 = arith.constant 0 : index
    %c2_8 = arith.constant 2 : index
    %c9 = arith.constant 9 : index
    %c0_9 = arith.constant 0 : index
    %4 = vector.load %arg8[%c0_7, %c2_8, %c9, %c0_9] : memref<2x6x10x256xbf16, #tpu.memory_space<vmem>>, vector<2x4x1x256xbf16>
    tpu.vector_store %arg8[%c0_7, %c2_8, %c9, %c0_9], %2 {strides = array<i32>} : memref<2x6x10x256xbf16, #tpu.memory_space<vmem>>, vector<2x4x1x256xbf16>,
    %c0_10 = arith.constant 0 : index
    %c0_11 = arith.constant 0 : index
    %c0_12 = arith.constant 0 : index
    %c0_13 = arith.constant 0 : index
    %5 = vector.load %arg1[%c0_10, %c0_11, %c0_12, %c0_13] : memref<2x4x8x256xf32, #tpu.memory_space<vmem>>, vector<2x4x8x256xf32>
    %cst_14 = arith.constant dense<0.000000e+00> : vector<2x256xf32>
    %6 = vector.multi_reduction <add>, %5, %cst_14 [1, 2] : vector<2x4x8x256xf32> to vector<2x256xf32>
    %7 = arith.mulf %5, %5 : vector<2x4x8x256xf32>
    %cst_15 = arith.constant dense<0.000000e+00> : vector<2x256xf32>
    %8 = vector.multi_reduction <add>, %7, %cst_15 [1, 2] : vector<2x4x8x256xf32> to vector<2x256xf32>
    %9 = tpu.concatenate %6, %8 in 0 : vector<2x256xf32>, vector<2x256xf32> -> vector<4x256xf32>
    %c0_16 = arith.constant 0 : index
    %c0_17 = arith.constant 0 : index
    %10 = vector.load %arg4[%c0_16, %c0_17] : memref<256x32xf32, #tpu.memory_space<vmem>>, vector<256x32xf32>
    %cst_18 = arith.constant dense<0.000000e+00> : vector<4x32xf32>
    %11 = tpu.matmul %9, %10, %cst_18 {dimension_numbers = #tpu.dot_dimension_numbers<[1], [0], [0], [1], [0, 0, 1, 1], [], []>} : vector<4x256xf32>, vector<256x32xf32>, vector<4x32xf32> -> vector<4x32xf32>
    %c0_19 = arith.constant 0 : index
    %c0_20 = arith.constant 0 : index
    %12 = vector.load %arg5[%c0_19, %c0_20] : memref<32x256xf32, #tpu.memory_space<vmem>>, vector<32x256xf32>
    %cst_21 = arith.constant dense<0.000000e+00> : vector<4x256xf32>
    %13 = tpu.matmul %11, %12, %cst_21 {dimension_numbers = #tpu.dot_dimension_numbers<[1], [0], [0], [1], [0, 0, 1, 1], [], []>} : vector<4x32xf32>, vector<32x256xf32>, vector<4x256xf32> -> vector<4x256xf32>
    %14 = vector.extract_strided_slice %13 {offsets = [0, 0], sizes = [2, 256], strides = [1, 1]} : vector<4x256xf32> to vector<2x256xf32>
    %15 = vector.extract_strided_slice %13 {offsets = [2, 0], sizes = [2, 256], strides = [1, 1]} : vector<4x256xf32> to vector<2x256xf32>
    %16 = arith.mulf %14, %14 : vector<2x256xf32>
    %17 = arith.subf %15, %16 : vector<2x256xf32>
    %cst_22 = arith.constant 9.99999974E-6 : f32
    %18 = vector.broadcast %cst_22 : f32 to vector<2x256xf32>
    %19 = arith.addf %17, %18 : vector<2x256xf32>
    %20 = math.rsqrt %19 : vector<2x256xf32>
    %c0_23 = arith.constant 0 : index
    %c0_24 = arith.constant 0 : index
    %21 = vector.load %arg2[%c0_23, %c0_24] : memref<1x256xf32, #tpu.memory_space<vmem>>, vector<1x256xf32>
    %22 = vector.broadcast %21 : vector<1x256xf32> to vector<2x256xf32>
    %23 = arith.mulf %20, %22 : vector<2x256xf32>
    %c0_25 = arith.constant 0 : index
    %c0_26 = arith.constant 0 : index
    %24 = vector.load %arg3[%c0_25, %c0_26] : memref<1x256xf32, #tpu.memory_space<vmem>>, vector<1x256xf32>
    %25 = arith.mulf %14, %23 : vector<2x256xf32>
    %26 = vector.broadcast %24 : vector<1x256xf32> to vector<2x256xf32>
    %27 = arith.subf %26, %25 : vector<2x256xf32>
    %28 = vector.shape_cast %23 : vector<2x256xf32> to vector<2x1x1x256xf32>
    %29 = vector.broadcast %28 : vector<2x1x1x256xf32> to vector<2x4x8x256xf32>
    %30 = arith.mulf %5, %29 : vector<2x4x8x256xf32>
    %31 = vector.shape_cast %27 : vector<2x256xf32> to vector<2x1x1x256xf32>
    %32 = vector.broadcast %31 : vector<2x1x1x256xf32> to vector<2x4x8x256xf32>
    %33 = arith.addf %30, %32 : vector<2x4x8x256xf32>
    %34 = arith.negf %33 : vector<2x4x8x256xf32>
    %35 = math.exp %34 : vector<2x4x8x256xf32>
    %cst_27 = arith.constant 1.000000e+00 : f32
    %36 = vector.broadcast %cst_27 : f32 to vector<2x4x8x256xf32>
    %37 = arith.addf %36, %35 : vector<2x4x8x256xf32>
    %38 = arith.divf %36, %37 : vector<2x4x8x256xf32>
    %39 = arith.mulf %33, %38 : vector<2x4x8x256xf32>
    %40 = arith.truncf %39 : vector<2x4x8x256xf32> to vector<2x4x8x256xbf16>
    %c0_28 = arith.constant 0 : index
    %c2_29 = arith.constant 2 : index
    %c1 = arith.constant 1 : index
    %c0_30 = arith.constant 0 : index
    %41 = vector.load %arg8[%c0_28, %c2_29, %c1, %c0_30] : memref<2x6x10x256xbf16, #tpu.memory_space<vmem>>, vector<2x4x8x256xbf16>
    tpu.vector_store %arg8[%c0_28, %c2_29, %c1, %c0_30], %40 {strides = array<i32>} : memref<2x6x10x256xbf16, #tpu.memory_space<vmem>>, vector<2x4x8x256xbf16>,
    %c0_31 = arith.constant 0 : index
    %c0_32 = arith.constant 0 : index
    %c0_33 = arith.constant 0 : index
    %c0_34 = arith.constant 0 : index
    %42 = vector.load %arg8[%c0_31, %c0_32, %c0_33, %c0_34] : memref<2x6x10x256xbf16, #tpu.memory_space<vmem>>, vector<2x4x8x256xbf16>
    %43 = vector.shape_cast %42 : vector<2x4x8x256xbf16> to vector<64x256xbf16>
    %c0_35 = arith.constant 0 : index
    %c0_36 = arith.constant 0 : index
    %44 = vector.load %arg6[%c0_35, %c0_36] : memref<2304x512xbf16, #tpu.memory_space<vmem>>, vector<256x512xbf16>
    %cst_37 = arith.constant dense<0.000000e+00> : vector<64x512xf32>
    %45 = tpu.matmul %43, %44, %cst_37 {dimension_numbers = #tpu.dot_dimension_numbers<[1], [0], [0], [1], [0, 0, 1, 1], [], []>} : vector<64x256xbf16>, vector<256x512xbf16>, vector<64x512xf32> -> vector<64x512xf32>
    %c0_38 = arith.constant 0 : index
    %c0_39 = arith.constant 0 : index
    %c1_40 = arith.constant 1 : index
    %c0_41 = arith.constant 0 : index
    %46 = vector.load %arg8[%c0_38, %c0_39, %c1_40, %c0_41] : memref<2x6x10x256xbf16, #tpu.memory_space<vmem>>, vector<2x4x8x256xbf16>
    %47 = vector.shape_cast %46 : vector<2x4x8x256xbf16> to vector<64x256xbf16>
    %c256 = arith.constant 256 : index
    %c0_42 = arith.constant 0 : index
    %48 = vector.load %arg6[%c256, %c0_42] : memref<2304x512xbf16, #tpu.memory_space<vmem>>, vector<256x512xbf16>
    %cst_43 = arith.constant dense<0.000000e+00> : vector<64x512xf32>
    %49 = tpu.matmul %47, %48, %cst_43 {dimension_numbers = #tpu.dot_dimension_numbers<[1], [0], [0], [1], [0, 0, 1, 1], [], []>} : vector<64x256xbf16>, vector<256x512xbf16>, vector<64x512xf32> -> vector<64x512xf32>
    %50 = arith.addf %45, %49 : vector<64x512xf32>
    %c0_44 = arith.constant 0 : index
    %c0_45 = arith.constant 0 : index
    %c2_46 = arith.constant 2 : index
    %c0_47 = arith.constant 0 : index
    %51 = vector.load %arg8[%c0_44, %c0_45, %c2_46, %c0_47] : memref<2x6x10x256xbf16, #tpu.memory_space<vmem>>, vector<2x4x8x256xbf16>
    %52 = vector.shape_cast %51 : vector<2x4x8x256xbf16> to vector<64x256xbf16>
    %c512 = arith.constant 512 : index
    %c0_48 = arith.constant 0 : index
    %53 = vector.load %arg6[%c512, %c0_48] : memref<2304x512xbf16, #tpu.memory_space<vmem>>, vector<256x512xbf16>
    %cst_49 = arith.constant dense<0.000000e+00> : vector<64x512xf32>
    %54 = tpu.matmul %52, %53, %cst_49 {dimension_numbers = #tpu.dot_dimension_numbers<[1], [0], [0], [1], [0, 0, 1, 1], [], []>} : vector<64x256xbf16>, vector<256x512xbf16>, vector<64x512xf32> -> vector<64x512xf32>
    %55 = arith.addf %50, %54 : vector<64x512xf32>
    %c0_50 = arith.constant 0 : index
    %c1_51 = arith.constant 1 : index
    %c0_52 = arith.constant 0 : index
    %c0_53 = arith.constant 0 : index
    %56 = vector.load %arg8[%c0_50, %c1_51, %c0_52, %c0_53] : memref<2x6x10x256xbf16, #tpu.memory_space<vmem>>, vector<2x4x8x256xbf16>
    %57 = vector.shape_cast %56 : vector<2x4x8x256xbf16> to vector<64x256xbf16>
    %c768 = arith.constant 768 : index
    %c0_54 = arith.constant 0 : index
    %58 = vector.load %arg6[%c768, %c0_54] : memref<2304x512xbf16, #tpu.memory_space<vmem>>, vector<256x512xbf16>
    %cst_55 = arith.constant dense<0.000000e+00> : vector<64x512xf32>
    %59 = tpu.matmul %57, %58, %cst_55 {dimension_numbers = #tpu.dot_dimension_numbers<[1], [0], [0], [1], [0, 0, 1, 1], [], []>} : vector<64x256xbf16>, vector<256x512xbf16>, vector<64x512xf32> -> vector<64x512xf32>
    %60 = arith.addf %55, %59 : vector<64x512xf32>
    %c0_56 = arith.constant 0 : index
    %c1_57 = arith.constant 1 : index
    %c1_58 = arith.constant 1 : index
    %c0_59 = arith.constant 0 : index
    %61 = vector.load %arg8[%c0_56, %c1_57, %c1_58, %c0_59] : memref<2x6x10x256xbf16, #tpu.memory_space<vmem>>, vector<2x4x8x256xbf16>
    %62 = vector.shape_cast %61 : vector<2x4x8x256xbf16> to vector<64x256xbf16>
    %c1024 = arith.constant 1024 : index
    %c0_60 = arith.constant 0 : index
    %63 = vector.load %arg6[%c1024, %c0_60] : memref<2304x512xbf16, #tpu.memory_space<vmem>>, vector<256x512xbf16>
    %cst_61 = arith.constant dense<0.000000e+00> : vector<64x512xf32>
    %64 = tpu.matmul %62, %63, %cst_61 {dimension_numbers = #tpu.dot_dimension_numbers<[1], [0], [0], [1], [0, 0, 1, 1], [], []>} : vector<64x256xbf16>, vector<256x512xbf16>, vector<64x512xf32> -> vector<64x512xf32>
    %65 = arith.addf %60, %64 : vector<64x512xf32>
    %c0_62 = arith.constant 0 : index
    %c1_63 = arith.constant 1 : index
    %c2_64 = arith.constant 2 : index
    %c0_65 = arith.constant 0 : index
    %66 = vector.load %arg8[%c0_62, %c1_63, %c2_64, %c0_65] : memref<2x6x10x256xbf16, #tpu.memory_space<vmem>>, vector<2x4x8x256xbf16>
    %67 = vector.shape_cast %66 : vector<2x4x8x256xbf16> to vector<64x256xbf16>
    %c1280 = arith.constant 1280 : index
    %c0_66 = arith.constant 0 : index
    %68 = vector.load %arg6[%c1280, %c0_66] : memref<2304x512xbf16, #tpu.memory_space<vmem>>, vector<256x512xbf16>
    %cst_67 = arith.constant dense<0.000000e+00> : vector<64x512xf32>
    %69 = tpu.matmul %67, %68, %cst_67 {dimension_numbers = #tpu.dot_dimension_numbers<[1], [0], [0], [1], [0, 0, 1, 1], [], []>} : vector<64x256xbf16>, vector<256x512xbf16>, vector<64x512xf32> -> vector<64x512xf32>
    %70 = arith.addf %65, %69 : vector<64x512xf32>
    %c0_68 = arith.constant 0 : index
    %c2_69 = arith.constant 2 : index
    %c0_70 = arith.constant 0 : index
    %c0_71 = arith.constant 0 : index
    %71 = vector.load %arg8[%c0_68, %c2_69, %c0_70, %c0_71] : memref<2x6x10x256xbf16, #tpu.memory_space<vmem>>, vector<2x4x8x256xbf16>
    %72 = vector.shape_cast %71 : vector<2x4x8x256xbf16> to vector<64x256xbf16>
    %c1536 = arith.constant 1536 : index
    %c0_72 = arith.constant 0 : index
    %73 = vector.load %arg6[%c1536, %c0_72] : memref<2304x512xbf16, #tpu.memory_space<vmem>>, vector<256x512xbf16>
    %cst_73 = arith.constant dense<0.000000e+00> : vector<64x512xf32>
    %74 = tpu.matmul %72, %73, %cst_73 {dimension_numbers = #tpu.dot_dimension_numbers<[1], [0], [0], [1], [0, 0, 1, 1], [], []>} : vector<64x256xbf16>, vector<256x512xbf16>, vector<64x512xf32> -> vector<64x512xf32>
    %75 = arith.addf %70, %74 : vector<64x512xf32>
    %c0_74 = arith.constant 0 : index
    %c2_75 = arith.constant 2 : index
    %c1_76 = arith.constant 1 : index
    %c0_77 = arith.constant 0 : index
    %76 = vector.load %arg8[%c0_74, %c2_75, %c1_76, %c0_77] : memref<2x6x10x256xbf16, #tpu.memory_space<vmem>>, vector<2x4x8x256xbf16>
    %77 = vector.shape_cast %76 : vector<2x4x8x256xbf16> to vector<64x256xbf16>
    %c1792 = arith.constant 1792 : index
    %c0_78 = arith.constant 0 : index
    %78 = vector.load %arg6[%c1792, %c0_78] : memref<2304x512xbf16, #tpu.memory_space<vmem>>, vector<256x512xbf16>
    %cst_79 = arith.constant dense<0.000000e+00> : vector<64x512xf32>
    %79 = tpu.matmul %77, %78, %cst_79 {dimension_numbers = #tpu.dot_dimension_numbers<[1], [0], [0], [1], [0, 0, 1, 1], [], []>} : vector<64x256xbf16>, vector<256x512xbf16>, vector<64x512xf32> -> vector<64x512xf32>
    %80 = arith.addf %75, %79 : vector<64x512xf32>
    %c0_80 = arith.constant 0 : index
    %c2_81 = arith.constant 2 : index
    %c2_82 = arith.constant 2 : index
    %c0_83 = arith.constant 0 : index
    %81 = vector.load %arg8[%c0_80, %c2_81, %c2_82, %c0_83] : memref<2x6x10x256xbf16, #tpu.memory_space<vmem>>, vector<2x4x8x256xbf16>
    %82 = vector.shape_cast %81 : vector<2x4x8x256xbf16> to vector<64x256xbf16>
    %c2048 = arith.constant 2048 : index
    %c0_84 = arith.constant 0 : index
    %83 = vector.load %arg6[%c2048, %c0_84] : memref<2304x512xbf16, #tpu.memory_space<vmem>>, vector<256x512xbf16>
    %cst_85 = arith.constant dense<0.000000e+00> : vector<64x512xf32>
    %84 = tpu.matmul %82, %83, %cst_85 {dimension_numbers = #tpu.dot_dimension_numbers<[1], [0], [0], [1], [0, 0, 1, 1], [], []>} : vector<64x256xbf16>, vector<256x512xbf16>, vector<64x512xf32> -> vector<64x512xf32>
    %85 = arith.addf %80, %84 : vector<64x512xf32>
    %86 = vector.shape_cast %85 : vector<64x512xf32> to vector<2x4x8x512xf32>
    %87 = arith.truncf %86 : vector<2x4x8x512xf32> to vector<2x4x8x512xbf16>
    %c0_86 = arith.constant 0 : index
    %c0_87 = arith.constant 0 : index
    %c0_88 = arith.constant 0 : index
    %c0_89 = arith.constant 0 : index
    %88 = vector.load %arg7[%c0_86, %c0_87, %c0_88, %c0_89] : memref<2x4x8x512xbf16, #tpu.memory_space<vmem>>, vector<2x4x8x512xbf16>
    tpu.vector_store %arg7[%c0_86, %c0_87, %c0_88, %c0_89], %87 {strides = array<i32>} : memref<2x4x8x512xbf16, #tpu.memory_space<vmem>>, vector<2x4x8x512xbf16>,
    return
  }
  func.func @transform_0(%arg0: i32) -> (i32, i32, i32, i32) {
    %c0_i32 = arith.constant 0 : i32
    %c0_i32_0 = arith.constant 0 : i32
    %c0_i32_1 = arith.constant 0 : i32
    %c0_i32_2 = arith.constant 0 : i32
    return %arg0, %c0_i32, %c0_i32_0, %c0_i32_1 : i32, i32, i32, i32
  }
  func.func @transform_1(%arg0: i32) -> (i32, i32) {
    %c0_i32 = arith.constant 0 : i32
    %c0_i32_0 = arith.constant 0 : i32
    %c0_i32_1 = arith.constant 0 : i32
    return %c0_i32, %c0_i32_0 : i32, i32
  }
  func.func @transform_2(%arg0: i32) -> (i32, i32) {
    %c0_i32 = arith.constant 0 : i32
    %c0_i32_0 = arith.constant 0 : i32
    %c0_i32_1 = arith.constant 0 : i32
    return %c0_i32, %c0_i32_0 : i32, i32
  }
  func.func @transform_3(%arg0: i32) -> (i32, i32) {
    %c0_i32 = arith.constant 0 : i32
    %c0_i32_0 = arith.constant 0 : i32
    %c0_i32_1 = arith.constant 0 : i32
    return %c0_i32, %c0_i32_0 : i32, i32
  }
  func.func @transform_4(%arg0: i32) -> (i32, i32) {
    %c0_i32 = arith.constant 0 : i32
    %c0_i32_0 = arith.constant 0 : i32
    %c0_i32_1 = arith.constant 0 : i32
    return %c0_i32, %c0_i32_0 : i32, i32
  }
  func.func @transform_5(%arg0: i32) -> (i32, i32) {
    %c0_i32 = arith.constant 0 : i32
    %c0_i32_0 = arith.constant 0 : i32
    %c0_i32_1 = arith.constant 0 : i32
    return %c0_i32, %c0_i32_0 : i32, i32
  }
  func.func @transform_6(%arg0: i32) -> (i32, i32, i32, i32) {
    %c0_i32 = arith.constant 0 : i32
    %c0_i32_0 = arith.constant 0 : i32
    %c0_i32_1 = arith.constant 0 : i32
    %c0_i32_2 = arith.constant 0 : i32
    return %arg0, %c0_i32, %c0_i32_0, %c0_i32_1 : i32, i32, i32, i32
  }
}

</mosaic_0001>

<bundles_post_ra>
// kernel: tpu_custom_call.1
= control target key start
LH: loop header
LB: loop body
LE: loop exit
PB: predicated region body
PF: predicated region fallthrough
CT: control target
= control target key end

     0   :  { %11 = vsyncpa [#allocation4], 0  ;;  %s10364_s0 = inlined_call_operand.hbm [shape: f32[2,4,8,256], index: 0, kind: input, shape index: {}]   ;;  %s10365_s1 = inlined_call_operand.hbm [shape: f32[1,256], index: 1, kind: input, shape index: {}]   ;;  %s10366_s2 = inlined_call_operand.hbm [shape: f32[1,256], index: 2, kind: input, shape index: {}]   ;;  %s10367_s3 = inlined_call_operand.vmem [shape: f32[256,32], index: 3, kind: input, shape index: {}]   ;;  %s10368_s4 = inlined_call_operand.hbm [shape: f32[32,256], index: 4, kind: input, shape index: {}]   ;;  %s10369_s5 = inlined_call_operand.hbm [shape: bf16[2304,512], index: 5, kind: input, shape index: {}]   ;;  %s10370_s6 = inlined_call_operand.hbm [shape: bf16[2,4,8,512], index: 6, kind: output, shape index: {}]  }
   0x1   :  { %12 = vsyncpa [#allocation7], 0 }
   0x2   :  { %13 = vsyncpa [#allocation10], 0 }
   0x3   :  { %14 = vsyncpa [#allocation5], 0  ;;  %s8869_s21 = smov [#allocation6]  }
   0x4   :  { %s33_s22 = sshll.u32 %s8869_s21, 4  ;;  %s34_s22 = int_to_ptr.vmem [resolvable:$true] %s33_s22 }
   0x5   :  { %s8749_s23 = scalar_lea.vmem %s34_s22, 32  ;;  %p8754_p1 = scmp.lt.s32.totalorder %s34_s22, %s34_s22 }
   0x6   :  { %p8750_p0 = scmp.ne.s32.totalorder %s34_s22, %s8749_s23  ;;  %p8755_p2 = scmp.lt.s32.totalorder %s8749_s23, %s8749_s23 }
   0x8   :  { %p8756_p3 = por %p8755_p2, %p8754_p1 }
   0xa   :  { %p8757_p4 = pnand %p8756_p3, %p8750_p0 }
   0xc   :  { %8760 = shalt.err (!%p8757_p4)
}
   0xd   :  { %36 = dma.hbm_to_vmem [thread:$0]  %s10365_s1, 32, %s34_s22, [#allocation7]  }
   0xe   :  { %s8870_s26 = smov [#allocation9]   ;;  %s8871_s28 = smov [#allocation3]  }
   0xf   :  { %s54_s27 = sshll.u32 %s8870_s26, 4  ;;  %s20_s29 = sshll.u32 %s8871_s28, 4  ;;  %s55_s27 = int_to_ptr.vmem [resolvable:$true] %s54_s27  ;;  %s21_s29 = int_to_ptr.vmem [resolvable:$true] %s20_s29 }
  0x10   :  { %s8769_s30 = scalar_lea.vmem %s55_s27, 1024  ;;  %p8774_p6 = scmp.lt.s32.totalorder %s55_s27, %s55_s27 }
  0x11   :  { %p8770_p5 = scmp.ne.s32.totalorder %s55_s27, %s8769_s30  ;;  %p8775_p7 = scmp.lt.s32.totalorder %s8769_s30, %s8769_s30 }
  0x13   :  { %p8776_p8 = por %p8775_p7, %p8774_p6 }
  0x15   :  { %p8777_p9 = pnand %p8776_p8, %p8770_p5 }
  0x17   :  { %8780 = shalt.err (!%p8777_p9)
}
  0x18   :  { %s8872_s7 = smov 256   ;;  %s8873_s8 = smov 16  }
  0x19   :  { %60 = dma.hbm_to_vmem [thread:$0]  %s10368_s4, 1024, %s55_s27, [#allocation10], %s8872_s7, %s8872_s7, %s8873_s8  }
  0x1a   :  { %s8789_s1 = scalar_lea.vmem %s21_s29, 2048  ;;  %p8794_p11 = scmp.lt.s32.totalorder %s21_s29, %s21_s29 }
  0x1b   :  { %p8790_p10 = scmp.ne.s32.totalorder %s21_s29, %s8789_s1  ;;  %p8795_p12 = scmp.lt.s32.totalorder %s8789_s1, %s8789_s1 }
  0x1d   :  { %p8796_p13 = por %p8795_p12, %p8794_p11 }
  0x1f   :  { %p8797_p0 = pnand %p8796_p13, %p8790_p10 }
  0x21   :  { %8800 = shalt.err (!%p8797_p0)
}
  0x22   :  { %26 = dma.hbm_to_vmem [thread:$0]  %s10364_s0, 2048, %s21_s29, [#allocation4], %s8872_s7, %s8872_s7, %s8873_s8  }
  0x23   :  { %s8874_s13 = smov [#allocation8]   ;;  %s8875_s15 = smov [#allocation11]  }
  0x24   :  { %s43_s14 = sshll.u32 %s8874_s13, 4  ;;  %s66_s4 = sshll.u32 %s8875_s15, 4  ;;  %s44_s14 = int_to_ptr.vmem [resolvable:$true] %s43_s14  ;;  %s67_s4 = int_to_ptr.vmem [resolvable:$true] %s66_s4 }
  0x25   :  { %s8809_s16 = scalar_lea.vmem %s44_s14, 32  ;;  %p8814_p2 = scmp.lt.s32.totalorder %s44_s14, %s44_s14 }
  0x26   :  { %p8810_p1 = scmp.ne.s32.totalorder %s44_s14, %s8809_s16  ;;  %p8815_p3 = scmp.lt.s32.totalorder %s8809_s16, %s8809_s16 }
  0x28   :  { %p8816_p4 = por %p8815_p3, %p8814_p2 }
  0x2a   :  { %p8817_p5 = pnand %p8816_p4, %p8810_p1 }
  0x2c   :  { %8820 = shalt.err (!%p8817_p5)
}
  0x2d   :  { %46 = dma.hbm_to_vmem [thread:$0]  %s10366_s2, 32, %s44_s14, [#allocation7]  }
  0x2e   :  { %s8829_s19 = scalar_lea.vmem %s67_s4, 73728  ;;  %p8834_p7 = scmp.lt.s32.totalorder %s67_s4, %s67_s4 }
  0x2f   :  { %p8830_p6 = scmp.ne.s32.totalorder %s67_s4, %s8829_s19  ;;  %p8835_p8 = scmp.lt.s32.totalorder %s8829_s19, %s8829_s19 }
  0x31   :  { %p8836_p9 = por %p8835_p8, %p8834_p7 }
  0x33   :  { %p8837_p10 = pnand %p8836_p9, %p8830_p6 }
  0x35   :  { %8840 = shalt.err (!%p8837_p10)
}
  0x36   :  { %72 = dma.hbm_to_vmem [thread:$0]  %s10369_s5, 73728, %s67_s4, [#allocation10], %s8872_s7, %s8872_s7, %s8873_s8  }
  0x37   :  { %8861 = dma.done.wait [#allocation4], 2048  }
  0x38   :  { %8862 = vsyncadd [#allocation4], 4294965248 }
  0x39   :  { %8863 = dma.done.wait [#allocation7], 64  }
  0x3a   :  { %8864 = vsyncadd [#allocation7], 4294967232 }
  0x3b   :  { %8865 = dma.done.wait [#allocation10], 74752  }
  0x3c   :  { %8866 = vsyncadd [#allocation10], 4294892544  ;;  %v314_v0 = vld [vmem:[%s10367_s3 + $0xf8] sm:$0xff]  ;;  %v313_v2 = vld [vmem:[%s10367_s3 + $0xf0] sm:$0xff]  ;;  %vm266_vm0 = vcmask 1041409   ;;  %vm275_vm1 = vcmask 1043459  }
  0x3d   :  { %v298_v1 = vld [vmem:[%s10367_s3 + $0x78] sm:$0xff]  ;;  %7722 = vmatprep.subr.mxu0 %v314_v0  ;;  %v297_v3 = vld [vmem:[%s10367_s3 + $0x70] sm:$0xff]  ;;  %v312_v4 = vld [vmem:[%s10367_s3 + $0xe8] sm:$0xff]  ;;  %vm280_vm2 = vcmask 1041408   ;;  %vm393_vm3 = vcmask 261120   ;;  %vm98_vm4 = vcmask 1040384  }
  0x3e   :  { %7723 = vmatpush3.msra.mxu0 %v298_v1  ;;  %v296_v5 = vld [vmem:[%s10367_s3 + $0x68] sm:$0xff]  ;;  %v311_v6 = vld [vmem:[%s10367_s3 + $0xe0] sm:$0xff]  ;;  %v310_v8 = vld [vmem:[%s10367_s3 + $0xd8] sm:$0xff]  ;;  %vm99_vm5 = vsmask.f32 256  ;;  %vm101_vm6 = vcmask 1044484  }
  0x3f   :  { %7724 = vmatprep.subr.mxu0 %v313_v2  ;;  %v295_v7 = vld [vmem:[%s10367_s3 + $0x60] sm:$0xff]  ;;  %v294_v9 = vld [vmem:[%s10367_s3 + $0x58] sm:$0xff]  ;;  %v309_v10 = vld [vmem:[%s10367_s3 + $0xd0] sm:$0xff]  ;;  %vm102_vm7 = vsmask.f32 4352 }
  0x40   :  { %7725 = vmatpush3.msra.mxu0 %v297_v3  ;;  %v293_v11 = vld [vmem:[%s10367_s3 + $0x50] sm:$0xff]  ;;  %v308_v12 = vld [vmem:[%s10367_s3 + $0xc8] sm:$0xff]  ;;  %v307_v14 = vld [vmem:[%s10367_s3 + $0xc0] sm:$0xff]  ;;  %vm129_vm9 = vsmask.f32 7938 }
  0x41   :  { %7726 = vmatprep.subr.mxu0 %v312_v4  ;;  %v292_v13 = vld [vmem:[%s10367_s3 + $0x48] sm:$0xff]  ;;  %v291_v16 = vld [vmem:[%s10367_s3 + $0x40] sm:$0xff]  ;;  %v161_v17 = vld [vmem:[#allocation3 + $0x18] sm:$0xff]  ;;  %vm131_vm11 = vsmask.f32 7954 }
  0x42   :  { %7727 = vmatpush3.msra.mxu0 %v296_v5  ;;  %v159_v15 = vld [vmem:[#allocation3 + $0x8] sm:$0xff]  ;;  %v165_v19 = vld [vmem:[#allocation3 + $0x38] sm:$0xff]  ;;  %v213_v26 = vmul.f32 %v161_v17, %v161_v17  ;;  %v158_v35 = vld [vmem:[#allocation3] sm:$0xff] }
  0x43   :  { %7728 = vmatprep.subr.mxu0 %v311_v6  ;;  %v163_v18 = vld [vmem:[#allocation3 + $0x28] sm:$0xff]  ;;  %v211_v20 = vmul.f32 %v159_v15, %v159_v15  ;;  %v306_v21 = vld [vmem:[%s10367_s3 + $0xb8] sm:$0xff]  ;;  %v183_v25 = vadd.f32 %v161_v17, %v159_v15  ;;  %v217_v28 = vmul.f32 %v165_v19, %v165_v19  ;;  %v160_v36 = vld [vmem:[#allocation3 + $0x10] sm:$0xff]  ;;  %v210_v50 = vmul.f32 %v158_v35, %v158_v35 }
  0x44   :  { %7729 = vmatpush3.msra.mxu0 %v295_v7  ;;  %v167_v22 = vld [vmem:[#allocation3 + $0x48] sm:$0xff]  ;;  %v169_v23 = vld [vmem:[#allocation3 + $0x58] sm:$0xff]  ;;  %v215_v27 = vmul.f32 %v163_v18, %v163_v18  ;;  %v305_v37 = vld [vmem:[%s10367_s3 + $0xb0] sm:$0xff]  ;;  %v174_v43 = vadd.f32 %v160_v36, %v158_v35  ;;  %v212_v51 = vmul.f32 %v160_v36, %v160_v36 }
  0x45   :  { %7730 = vmatprep.subr.mxu0 %v310_v8  ;;  %v171_v24 = vld [vmem:[#allocation3 + $0x68] sm:$0xff]  ;;  %v290_v29 = vld [vmem:[%s10367_s3 + $0x38] sm:$0xff]  ;;  %v201_v31 = vadd.f32 %v169_v23, %v167_v22  ;;  %v219_v32 = vmul.f32 %v167_v22, %v167_v22  ;;  %v221_v33 = vmul.f32 %v169_v23, %v169_v23  ;;  %v184_v38 = vadd.f32 %v183_v25, %v163_v18  ;;  %v162_v41 = vld [vmem:[#allocation3 + $0x20] sm:$0xff] }
  0x46   :  { %7731 = vmatpush3.msra.mxu0 %v294_v9  ;;  %v173_v30 = vld [vmem:[#allocation3 + $0x78] sm:$0xff]  ;;  %v223_v34 = vmul.f32 %v171_v24, %v171_v24  ;;  %v235_v40 = vadd.f32 %v213_v26, %v211_v20  ;;  %v164_v42 = vld [vmem:[#allocation3 + $0x30] sm:$0xff]  ;;  %v166_v47 = vld [vmem:[#allocation3 + $0x40] sm:$0xff]  ;;  %v175_v56 = vadd.f32 %v174_v43, %v162_v41  ;;  %v214_v0 = vmul.f32 %v162_v41, %v162_v41 }
  0x47   :  { %7732 = vmatprep.subr.mxu0 %v309_v10  ;;  %v225_v39 = vmul.f32 %v173_v30, %v173_v30  ;;  %v289_v44 = vld [vmem:[%s10367_s3 + $0x30] sm:$0xff]  ;;  %v202_v45 = vadd.f32 %v201_v31, %v171_v24  ;;  %v253_v46 = vadd.f32 %v221_v33, %v219_v32  ;;  %v170_v49 = vld [vmem:[#allocation3 + $0x60] sm:$0xff]  ;;  %v304_v52 = vld [vmem:[%s10367_s3 + $0xa8] sm:$0xff]  ;;  %v185_v53 = vadd.f32 %v184_v38, %v165_v19 }
  0x48   :  { %7733 = vmatpush3.msra.mxu0 %v293_v11  ;;  %v168_v48 = vld [vmem:[#allocation3 + $0x50] sm:$0xff]  ;;  %v236_v54 = vadd.f32 %v235_v40, %v215_v27  ;;  %v392_v58 = vld [vmem:[#allocation9 + $0x38] sm:$0xff]  ;;  %v288_v61 = vld [vmem:[%s10367_s3 + $0x28] sm:$0xff]  ;;  %v9005_v1 = vmul.f32 %v164_v42, %v164_v42  ;;  %v176_v5 = vadd.f32 %v175_v56, %v164_v42  ;;  %v218_v10 = vmul.f32 %v166_v47, %v166_v47 }
  0x49   :  { %7734 = vmatprep.subr.mxu0 %v308_v12  ;;  %v172_v55 = vld [vmem:[#allocation3 + $0x70] sm:$0xff]  ;;  %v192_v57 = vadd.f32 %v168_v48, %v166_v47  ;;  %v203_v62 = vadd.f32 %v202_v45, %v173_v30  ;;  %v254_v63 = vadd.f32 %v253_v46, %v223_v34  ;;  %v303_v2 = vld [vmem:[%s10367_s3 + $0xa0] sm:$0xff]  ;;  %v186_v3 = vrot.slane %v185_v53, 4  ;;  %421 = vmatprep.subr.mxu1 %v392_v58  ;;  %v302_v12 = vld [vmem:[%s10367_s3 + $0x98] sm:$0xff] }
  0x4a   :  { %7735 = vmatpush3.msra.mxu0 %v292_v13  ;;  %v391_v59 = vld [vmem:[#allocation9 + $0x30] sm:$0xff]  ;;  %v390_v60 = vld [vmem:[#allocation9 + $0x28] sm:$0xff]  ;;  %v237_v4 = vadd.f32 %v236_v54, %v217_v28  ;;  %v287_v7 = vld [vmem:[%s10367_s3 + $0x20] sm:$0xff]  ;;  %v220_v11 = vmul.f32 %v168_v48, %v168_v48  ;;  %v177_v15 = vrot.slane %v176_v5, 4  ;;  %v222_v20 = vmul.f32 %v170_v49, %v170_v49 }
  0x4b   :  { %7736 = vmatprep.subr.mxu0 %v307_v14  ;;  %v193_v6 = vadd.f32 %v192_v57, %v170_v49  ;;  %v204_v8 = vrot.slane %v203_v62, 4  ;;  %v255_v9 = vadd.f32 %v254_v63, %v225_v39  ;;  %422 = vmatpush1.msra.mxu1 %v391_v59  ;;  %v187_v13 = vadd.f32 %v186_v3, %v185_v53  ;;  %v286_v17 = vld [vmem:[%s10367_s3 + $0x18] sm:$0xff]  ;;  %v301_v22 = vld [vmem:[%s10367_s3 + $0x90] sm:$0xff]  ;;  %v300_v32 = vld [vmem:[%s10367_s3 + $0x88] sm:$0xff] }
  0x4c   :  { %7737 = vmatpush3.msra.mxu0 %v291_v16  ;;  %v238_v14 = vrot.slane %v237_v4, 4  ;;  %423 = vmatprep.subr.mxu1 %v390_v60  ;;  %v178_v25 = vadd.f32 %v177_v15, %v176_v5  ;;  %v285_v27 = vld [vmem:[%s10367_s3 + $0x10] sm:$0xff]  ;;  %v226_v30 = vadd.f32 %v212_v51, %v210_v50  ;;  %v244_v31 = vadd.f32 %v220_v11, %v218_v10  ;;  %v299_v42 = vld [vmem:[%s10367_s3 + $0x80] sm:$0xff]  ;;  %vm100_vm8 = vmand %vm98_vm4, %vm99_vm5 }
  0x4d   :  { %7738 = vmatprep.subr.mxu0 %v306_v21  ;;  %v194_v16 = vadd.f32 %v193_v6, %v172_v55  ;;  %v205_v18 = vadd.f32 %v204_v8, %v203_v62  ;;  %v256_v19 = vrot.slane %v255_v9, 4  ;;  %v224_v21 = vmul.f32 %v172_v55, %v172_v55  ;;  %v283_v47 = vld [vmem:[%s10367_s3] sm:$0xff]  ;;  %vm103_vm10 = vmand %vm101_vm6, %vm102_vm7 }
  0x4e   :  { %7739 = vmatpush3.msra.mxu0 %v290_v29  ;;  %v188_v23 = vrot.slane %v187_v13, 2  ;;  %v239_v24 = vadd.f32 %v238_v14, %v237_v4  ;;  %v179_v35 = vrot.slane %v178_v25, 2  ;;  %v227_v40 = vadd.f32 %v226_v30, %v214_v0  ;;  %v7776_v30 = vld [vmem:[#allocation11 + $0x2c4] ss:$16 sps:$4 sm:$0xff]   ;;  %vm9046_vm12 = vmor %vm103_vm10, %vm100_vm8 }
  0x4f   :  { %7740 = vmatprep.subr.mxu0 %v305_v37  ;;  %v195_v26 = vrot.slane %v194_v16, 4  ;;  %v206_v28 = vrot.slane %v205_v18, 2  ;;  %v257_v29 = vadd.f32 %v256_v19, %v255_v9  ;;  %v284_v37 = vld [vmem:[%s10367_s3 + $0x8] sm:$0xff]  ;;  %v245_v41 = vadd.f32 %v244_v31, %v222_v20  ;;  %v387_v19 = vld [vmem:[#allocation9 + $0x10] sm:$0xff]  ;;  %v7779_v31 = vld [vmem:[#allocation11 + $0x2cc] ss:$16 sps:$4 sm:$0xff]  }
  0x50   :  { %7741 = vmatpush3.msra.mxu0 %v289_v44  ;;  %v189_v33 = vadd.f32 %v188_v23, %v187_v13  ;;  %v240_v34 = vrot.slane %v239_v24, 2  ;;  %v180_v45 = vadd.f32 %v179_v35, %v178_v25  ;;  %v228_v50 = vadd.f32 %v227_v40, %v9005_v1  ;;  %v386_v20 = vld [vmem:[#allocation9 + $0x8] sm:$0xff]  ;;  %v7770_v23 = vld [vmem:[#allocation11 + $0x2e4] ss:$16 sps:$4 sm:$0xff]   ;;  %v7786_v40 = vld [vmem:[#allocation11 + $0x280] ss:$16 sps:$4 sm:$0xff]  }
  0x51   :  { %7742 = vmatprep.subr.mxu0 %v304_v52  ;;  %v196_v36 = vadd.f32 %v195_v26, %v194_v16  ;;  %v207_v38 = vadd.f32 %v206_v28, %v205_v18  ;;  %v258_v39 = vrot.slane %v257_v29, 2  ;;  %v246_v51 = vadd.f32 %v245_v41, %v224_v21  ;;  %v388_v18 = vld [vmem:[#allocation9 + $0x18] sm:$0xff]  ;;  %v385_v21 = vld [vmem:[#allocation9] sm:$0xff]  ;;  %vm130_vm13 = vmand %vm98_vm4, %vm129_vm9  ;;  %s8879_s3 = smov [#allocation12]  }
  0x52   :  { %7743 = vmatpush3.msra.mxu0 %v288_v61  ;;  %v190_v43 = vrot.slane %v189_v33, 1  ;;  %v241_v44 = vadd.f32 %v240_v34, %v239_v24  ;;  %v229_v57 = vrot.slane %v228_v50, 4  ;;  %v181_v60 = vrot.slane %v180_v45, 1  ;;  %v7771_v24 = vld [vmem:[#allocation11 + $0x2e8] ss:$16 sps:$4 sm:$0xff]   ;;  %vm132_vm14 = vmand %vm101_vm6, %vm131_vm11  ;;  %s6971_s29 = sshll.u32 %s8879_s3, 4  ;;  %s6972_s29 = int_to_ptr.vmem [resolvable:$true] %s6971_s29 }
  0x53   :  { %7744 = vmatprep.subr.mxu0 %v303_v2  ;;  %v197_v46 = vrot.slane %v196_v36, 2  ;;  %v208_v48 = vrot.slane %v207_v38, 1  ;;  %v259_v49 = vadd.f32 %v258_v39, %v257_v29  ;;  %v247_v58 = vrot.slane %v246_v51, 4  ;;  %v7773_v25 = vld [vmem:[#allocation11 + $0x2ec] ss:$16 sps:$4 sm:$0xff]   ;;  %vm9070_vm15 = vmor %vm132_vm14, %vm130_vm13  ;;  %s8841_s30 = scalar_lea.vmem %s6972_s29, 2048  ;;  %p8846_p12 = scmp.lt.s32.totalorder %s6972_s29, %s6972_s29 }
  0x54   :  { %7745 = vmatpush3.msra.mxu0 %v287_v7  ;;  %v191_v52 = vadd.f32 %v190_v43, %v189_v33  ;;  %v242_v53 = vrot.slane %v241_v44, 1  ;;  %v230_v0 = vadd.f32 %v229_v57, %v228_v50  ;;  %v182_v6 = vadd.f32 %v181_v60, %v180_v45  ;;  %v7768_v28 = vld [vmem:[#allocation11 + $0x2e0] ss:$16 sps:$4 sm:$0xff]   ;;  %v7777_v33 = vld [vmem:[#allocation11 + $0x2c8] ss:$16 sps:$4 sm:$0xff]   ;;  %p8842_p11 = scmp.ne.s32.totalorder %s6972_s29, %s8841_s30  ;;  %p8847_p13 = scmp.lt.s32.totalorder %s8841_s30, %s8841_s30 }
  0x55   :  { %7746 = vmatprep.subr.mxu0 %v302_v12  ;;  %v198_v54 = vadd.f32 %v197_v46, %v196_v36  ;;  %v209_v55 = vadd.f32 %v208_v48, %v207_v38  ;;  %v260_v56 = vrot.slane %v259_v49, 1  ;;  %v248_v1 = vadd.f32 %v247_v58, %v246_v51  ;;  %v7782_v34 = vld [vmem:[#allocation11 + $0x2a4] ss:$16 sps:$4 sm:$0xff]   ;;  %v7785_v35 = vld [vmem:[#allocation11 + $0x2ac] ss:$16 sps:$4 sm:$0xff]  }
  0x56   :  { %7747 = vmatpush3.msra.mxu0 %v286_v17  ;;  %v243_v59 = vadd.f32 %v242_v53, %v241_v44  ;;  %v231_v3 = vrot.slane %v230_v0, 2  ;;  %v389_v17 = vld [vmem:[#allocation9 + $0x20] sm:$0xff]  ;;  %v7791_v39 = vld [vmem:[#allocation11 + $0x28c] ss:$16 sps:$4 sm:$0xff]   ;;  %v7789_v41 = vld [vmem:[#allocation11 + $0x288] ss:$16 sps:$4 sm:$0xff]   ;;  %p8848_p0 = por %p8847_p13, %p8846_p12 }
  0x57   :  { %7748 = vmatprep.subr.mxu0 %v301_v22  ;;  %v199_v61 = vrot.slane %v198_v54, 1  ;;  %v261_v62 = vadd.f32 %v260_v56, %v259_v49  ;;  %v268_v63 = vsel %vm266_vm0, %v209_v55, %v191_v52  ;;  %v249_v4 = vrot.slane %v248_v1, 2  ;;  %424 = vmatpush1.msra.mxu1 %v389_v17  ;;  %v7780_v36 = vld [vmem:[#allocation11 + $0x2a0] ss:$16 sps:$4 sm:$0xff]   ;;  %v7788_v38 = vld [vmem:[#allocation11 + $0x284] ss:$16 sps:$4 sm:$0xff]  }
  0x58   :  { %7749 = vmatpush3.msra.mxu0 %v285_v27  ;;  %v232_v8 = vadd.f32 %v231_v3, %v230_v0  ;;  %425 = vmatprep.subr.mxu1 %v388_v18  ;;  %v8876_v22 = vmov 0.0   ;;  %v7797_v43 = vld [vmem:[#allocation11 + $0x26c] ss:$16 sps:$4 sm:$0xff]   ;;  %v7792_v44 = vld [vmem:[#allocation11 + $0x260] ss:$16 sps:$4 sm:$0xff]   ;;  %vm890_vm4 = vcmask 1047556   ;;  %p8849_p1 = pnand %p8848_p0, %p8842_p11 }
  0x59   :  { %7750 = vmatprep.subr.mxu0 %v300_v32  ;;  %v277_v2 = vsel %vm275_vm1, %v261_v62, %v243_v59  ;;  %v200_v7 = vadd.f32 %v199_v61, %v198_v54  ;;  %v250_v9 = vadd.f32 %v249_v4, %v248_v1  ;;  %426 = vmatpush1.msra.mxu1 %v387_v19  ;;  %v7774_v32 = vld [vmem:[#allocation11 + $0x2c0] ss:$16 sps:$4 sm:$0xff]   ;;  %v7795_v45 = vld [vmem:[#allocation11 + $0x268] ss:$16 sps:$4 sm:$0xff]   ;;  %v7800_v17 = vld [vmem:[#allocation11 + $0x244] ss:$16 sps:$4 sm:$0xff]  }
  0x5a   :  { %7751 = vmatpush3.msra.mxu0 %v284_v37  ;;  %v282_v5 = vsel %vm280_vm2, %v268_v63, %v277_v2  ;;  %v233_v10 = vrot.slane %v232_v8, 1  ;;  %427 = vmatprep.subr.mxu1 %v386_v20  ;;  %v7783_v37 = vld [vmem:[#allocation11 + $0x2a8] ss:$16 sps:$4 sm:$0xff]   ;;  %v120_v52 = vld [vmem:[#allocation2 + $0x40] sm:$0x11]  ;;  %vm9205_vm6 = vmand %vm890_vm4, %vm131_vm11  ;;  %vm2228_vm8 = vcmask 1042432  }
  0x5b   :  { %7752 = vmatprep.subr.mxu0 %v299_v42  ;;  %379 = vmatprep.mubr.f32.mxu0 %v282_v5  ;;  %v251_v11 = vrot.slane %v250_v9, 1  ;;  %v267_v14 = vsel %vm266_vm0, %v200_v7, %v182_v6  ;;  %v7794_v42 = vld [vmem:[#allocation11 + $0x264] ss:$16 sps:$4 sm:$0xff]   ;;  %v123_v57 = vld [vmem:[#allocation2 + $0xa0] sm:$0x11]  ;;  %v121_v59 = vsel %vm9046_vm12, 0, %v120_v52 }
  0x5c   :  { %7753 = vmatpush3.msra.mxu0 %v283_v47  ;;  %v234_v12 = vadd.f32 %v233_v10, %v232_v8  ;;  %428 = vmatpush1.msra.mxu1 %v385_v21  ;;  %v105_v46 = vld [vmem:[#allocation2 + $0x38] sm:$0x11]  ;;  %v108_v47 = vld [vmem:[#allocation2 + $0x48] sm:$0x11]  ;;  %v124_v60 = vsel %vm9046_vm12, 0, %v123_v57 }
  0x5d   :  { %v252_v13 = vadd.f32 %v251_v11, %v250_v9  ;;  %461 = vmatprep.mubr.f32.mxu1 %v8876_v22  ;;  %1552 = vmatprep.subr.bf16.mxu1 %v7770_v23  ;;  %v111_v48 = vld [vmem:[#allocation2 + $0x18] sm:$0x11]  ;;  %v106_v53 = vsel %vm9046_vm12, 0, %v105_v46  ;;  %v109_v54 = vsel %vm9046_vm12, 0, %v108_v47  ;;  %v126_v61 = vld [vmem:[#allocation2 + $0x88] sm:$0x11] }
  0x5e   :  { %1625 = vmatprep.subr.bf16.mxu0 %v7773_v25  ;;  %v114_v49 = vld [vmem:[#allocation2 + $0x58] sm:$0x11]  ;;  %v112_v55 = vsel %vm9046_vm12, 0, %v111_v48  ;;  %107 = vst [vmem:[#allocation2 + $0x38] sm:$0x11] %v106_v53  ;;  %v127_v62 = vsel %vm9046_vm12, 0, %v126_v61 }
  0x5f   :  { %v276_v15 = vsel %vm275_vm1, %v252_v13, %v234_v12  ;;  %v117_v51 = vld [vmem:[#allocation2 + $0x78] sm:$0x11]  ;;  %v115_v56 = vsel %vm9046_vm12, 0, %v114_v49  ;;  %110 = vst [vmem:[#allocation2 + $0x48] sm:$0x11] %v109_v54 }
  0x60   :  { %v281_v16 = vsel %vm280_vm2, %v267_v14, %v276_v15  ;;  %113 = vst [vmem:[#allocation2 + $0x18] sm:$0x11] %v112_v55  ;;  %116 = vst [vmem:[#allocation2 + $0x58] sm:$0x11] %v115_v56  ;;  %v118_v58 = vsel %vm9046_vm12, 0, %v117_v51 }
  0x61   :  { %380 = vmatmul.mubr.f32.vlgmr.msra.gmra.mxu0 %v281_v16  ;;  %119 = vst [vmem:[#allocation2 + $0x78] sm:$0x11] %v118_v58  ;;  %122 = vst [vmem:[#allocation2 + $0x40] sm:$0x11] %v121_v59  ;;  %v134_v0 = vld [vmem:[#allocation2 + $0x98] sm:$0x11] }
  0x62   :  { %1626 = vmatpush1.bf16.msra.mxu0 %v7771_v24  ;;  %125 = vst [vmem:[#allocation2 + $0xa0] sm:$0x11] %v124_v60  ;;  %v137_v1 = vld [vmem:[#allocation2 + $0x90] sm:$0x11]  ;;  %128 = vst [vmem:[#allocation2 + $0x88] sm:$0x11] %v127_v62 }
  0x63   :  { %1627 = vmatprep.subr.bf16.mxu0 %v7779_v31  ;;  %v135_v2 = vsel %vm9070_vm15, 0, %v134_v0  ;;  %v138_v3 = vsel %vm9070_vm15, 0, %v137_v1  ;;  %v140_v4 = vld [vmem:[#allocation2 + $0x70] sm:$0x11]  ;;  %v146_v8 = vld [vmem:[#allocation2 + $0x28] sm:$0x11] }
  0x64   :  { %v143_v5 = vld [vmem:[#allocation2 + $0x50] sm:$0x11]  ;;  %136 = vst [vmem:[#allocation2 + $0x98] sm:$0x11] %v135_v2  ;;  %139 = vst [vmem:[#allocation2 + $0x90] sm:$0x11] %v138_v3 }
  0x65   :  { %v141_v6 = vsel %vm9070_vm15, 0, %v140_v4  ;;  %v144_v7 = vsel %vm9070_vm15, 0, %v143_v5  ;;  %v149_v9 = vld [vmem:[#allocation2 + $0xb8] sm:$0x11]  ;;  %v147_v10 = vsel %vm9070_vm15, 0, %v146_v8 }
  0x66   :  { %1628 = vmatpush1.bf16.msra.mxu0 %v7777_v33  ;;  %142 = vst [vmem:[#allocation2 + $0x70] sm:$0x11] %v141_v6  ;;  %145 = vst [vmem:[#allocation2 + $0x50] sm:$0x11] %v144_v7  ;;  %v150_v11 = vsel %vm9070_vm15, 0, %v149_v9 }
  0x67   :  { %1629 = vmatprep.subr.bf16.mxu0 %v7785_v35  ;;  %v152_v12 = vld [vmem:[#allocation2 + $0x60] sm:$0x11]  ;;  %v155_v13 = vld [vmem:[#allocation2 + $0x8] sm:$0x11]  ;;  %148 = vst [vmem:[#allocation2 + $0x28] sm:$0x11] %v147_v10 }
  0x68   :  { %151 = vst [vmem:[#allocation2 + $0xb8] sm:$0x11] %v150_v11  ;;  %v153_v14 = vsel %vm9070_vm15, 0, %v152_v12  ;;  %v156_v15 = vsel %vm9070_vm15, 0, %v155_v13  ;;  %v7798_v16 = vld [vmem:[#allocation11 + $0x240] ss:$16 sps:$4 sm:$0xff]  }
  0x69   :  { %154 = vst [vmem:[#allocation2 + $0x60] sm:$0x11] %v153_v14  ;;  %157 = vst [vmem:[#allocation2 + $0x8] sm:$0x11] %v156_v15  ;;  %v7801_v18 = vld [vmem:[#allocation11 + $0x248] ss:$16 sps:$4 sm:$0xff]  }
  0x6a   :  { %1630 = vmatpush1.bf16.msra.mxu0 %v7783_v37  ;;  %v7803_v19 = vld [vmem:[#allocation11 + $0x24c] ss:$16 sps:$4 sm:$0xff]   ;;  %v7806_v20 = vld [vmem:[#allocation11 + $0x224] ss:$16 sps:$4 sm:$0xff]   ;;  %v7804_v22 = vld [vmem:[#allocation11 + $0x220] ss:$16 sps:$4 sm:$0xff]  }
  0x6b   :  { %1631 = vmatprep.subr.bf16.mxu0 %v7791_v39  ;;  %v7809_v21 = vld [vmem:[#allocation11 + $0x22c] ss:$16 sps:$4 sm:$0xff]   ;;  %v7807_v23 = vld [vmem:[#allocation11 + $0x228] ss:$16 sps:$4 sm:$0xff]   ;;  %v7812_v24 = vld [vmem:[#allocation11 + $0x204] ss:$16 sps:$4 sm:$0xff]  }
  0x6c   :  { %v7815_v25 = vld [vmem:[#allocation11 + $0x20c] ss:$16 sps:$4 sm:$0xff]   ;;  %v7819_v31 = vld [vmem:[#allocation11 + $0x3e8] ss:$16 sps:$4 sm:$0xff]   ;;  %v7840_v49 = vld [vmem:[#allocation11 + $0x360] ss:$16 sps:$4 sm:$0xff]  }
  0x6d   :  { %v7827_v33 = vld [vmem:[#allocation11 + $0x3cc] ss:$16 sps:$4 sm:$0xff]   ;;  %v7825_v35 = vld [vmem:[#allocation11 + $0x3c8] ss:$16 sps:$4 sm:$0xff]   ;;  %v7848_v53 = vld [vmem:[#allocation11 + $0x344] ss:$16 sps:$4 sm:$0xff]  }
  0x6e   :  { %1632 = vmatpush1.bf16.msra.mxu0 %v7789_v41  ;;  %v7833_v37 = vld [vmem:[#allocation11 + $0x3ac] ss:$16 sps:$4 sm:$0xff]   ;;  %v7831_v39 = vld [vmem:[#allocation11 + $0x3a8] ss:$16 sps:$4 sm:$0xff]   ;;  %v8877_v41 = vmov 0  }
  0x6f   :  { %1633 = vmatprep.subr.bf16.mxu0 %v7797_v43  ;;  %89 = vst [vmem:[#allocation2 + $0xa8] sm:$0xff] %v8877_v41  ;;  %90 = vst [vmem:[#allocation2] sm:$0x11] %v8877_v41  ;;  %v7834_v43 = vld [vmem:[#allocation11 + $0x380] ss:$16 sps:$4 sm:$0xff]   ;;  %v1027_v47 = vrot.slane %v8877_v41, 4 }
  0x70   :  { %91 = vst [vmem:[#allocation2 + $0x10] sm:$0xff] %v8877_v41  ;;  %92 = vst [vmem:[#allocation2 + $0x30] sm:$0x11] %v8877_v41  ;;  %v7845_v46 = vld [vmem:[#allocation11 + $0x36c] ss:$16 sps:$4 sm:$0xff]   ;;  %v1030_v48 = vrot.slane %v8877_v41, 5 }
  0x71   :  { %93 = vst [vmem:[#allocation2 + $0x80] sm:$0xff] %v8877_v41  ;;  %94 = vst [vmem:[#allocation2 + $0x68] sm:$0x11] %v8877_v41  ;;  %v7843_v51 = vld [vmem:[#allocation11 + $0x368] ss:$16 sps:$4 sm:$0xff]  }
  0x72   :  { %1634 = vmatpush1.bf16.msra.mxu0 %v7795_v45  ;;  %95 = vst [vmem:[#allocation2 + $0x20] sm:$0xff] %v8877_v41  ;;  %96 = vst [vmem:[#allocation2 + $0xb0] sm:$0x11] %v8877_v41  ;;  %v7842_v45 = vld [vmem:[#allocation11 + $0x364] ss:$16 sps:$4 sm:$0xff]   ;;  %v1031_v55 = vor.u32 %v1030_v48, %v1027_v47 }
  0x73   :  { %1635 = vmatprep.subr.bf16.mxu0 %v7803_v19  ;;  %v7851_v57 = vld [vmem:[#allocation11 + $0x34c] ss:$16 sps:$4 sm:$0xff]   ;;  %vm1021_vm0 = vsmask.f32 3328  ;;  %v7846_v59 = vld [vmem:[#allocation11 + $0x340] ss:$16 sps:$4 sm:$0xff]  }
  0x74   :  { %v7849_v60 = vld [vmem:[#allocation11 + $0x348] ss:$16 sps:$4 sm:$0xff]   ;;  %vm1022_vm1 = vsmask.f32 7440  ;;  %v7854_v61 = vld [vmem:[#allocation11 + $0x324] ss:$16 sps:$4 sm:$0xff]  }
  0x75   :  { %vm9090_vm2 = vmor %vm1021_vm0, %vm1022_vm1  ;;  %v9094_v63 = vrot.slane %v1031_v55, 4  ;;  %v7857_v2 = vld [vmem:[#allocation11 + $0x32c] ss:$16 sps:$4 sm:$0xff]   ;;  %v7852_v5 = vld [vmem:[#allocation11 + $0x320] ss:$16 sps:$4 sm:$0xff]  }
  0x76   :  { %1636 = vmatpush1.bf16.msra.mxu0 %v7801_v18  ;;  %v1013_v52 = vld [vmem:[#allocation2] sm:$0x11]  ;;  %v7855_v7 = vld [vmem:[#allocation11 + $0x328] ss:$16 sps:$4 sm:$0xff]   ;;  %v7860_v8 = vld [vmem:[#allocation11 + $0x304] ss:$16 sps:$4 sm:$0xff]  }
  0x77   :  { %1637 = vmatprep.subr.bf16.mxu0 %v7809_v21  ;;  %v1014_v54 = vld [vmem:[#allocation2 + $0x30] sm:$0x11]  ;;  %v1034_v56 = vshll.u32 %v1013_v52, 16  ;;  %v7861_v11 = vld [vmem:[#allocation11 + $0x308] ss:$16 sps:$4 sm:$0xff]  }
  0x78   :  { %v1048_v58 = vshll.u32 %v1014_v54, 16  ;;  %v7863_v9 = vld [vmem:[#allocation11 + $0x30c] ss:$16 sps:$4 sm:$0xff]   ;;  %v7858_v10 = vld [vmem:[#allocation11 + $0x300] ss:$16 sps:$4 sm:$0xff]  }
  0x79   :  { %v1036_v0 = vrot.slane %v1034_v56, 5  ;;  %v7866_v12 = vld [vmem:[#allocation11 + $0xe4] ss:$16 sps:$4 sm:$0xff]   ;;  %v7869_v13 = vld [vmem:[#allocation11 + $0xec] ss:$16 sps:$4 sm:$0xff]  }
  0x7a   :  { %1638 = vmatpush1.bf16.msra.mxu0 %v7807_v23  ;;  %v1050_v1 = vrot.slane %v1048_v58, 5  ;;  %v7864_v15 = vld [vmem:[#allocation11 + $0xe0] ss:$16 sps:$4 sm:$0xff]   ;;  %v7875_v18 = vld [vmem:[#allocation11 + $0xcc] ss:$16 sps:$4 sm:$0xff]  }
  0x7b   :  { %1639 = vmatprep.subr.bf16.mxu0 %v7815_v25  ;;  %v1037_v3 = vsel %vm9090_vm2, %v9094_v63, %v1036_v0  ;;  %v7870_v19 = vld [vmem:[#allocation11 + $0xc0] ss:$16 sps:$4 sm:$0xff]   ;;  %v7878_v21 = vld [vmem:[#allocation11 + $0xa4] ss:$16 sps:$4 sm:$0xff]   ;;  %v7915_v48 = vld [vmem:[#allocation11 + $0x1e8] ss:$16 sps:$4 sm:$0xff]  }
  0x7c   :  { %v1051_v4 = vsel %vm9090_vm2, %v9094_v63, %v1050_v1  ;;  %v7876_v23 = vld [vmem:[#allocation11 + $0xa0] ss:$16 sps:$4 sm:$0xff]   ;;  %v7884_v25 = vld [vmem:[#allocation11 + $0x84] ss:$16 sps:$4 sm:$0xff]   ;;  %v7929_v55 = vld [vmem:[#allocation11 + $0x1ac] ss:$16 sps:$4 sm:$0xff]  }
  0x7d   :  { %v7011_v6 = vcombine.high %v1037_v3, %v1051_v4  ;;  %v7010_v14 = vcombine.low %v1037_v3, %v1051_v4  ;;  %v7908_v41 = vld [vmem:[#allocation11 + $0x4] ss:$16 sps:$4 sm:$0xff]   ;;  %v7912_v47 = vld [vmem:[#allocation11 + $0x1e0] ss:$16 sps:$4 sm:$0xff]  }
  0x7e   :  { %v7918_v52 = vld [vmem:[#allocation11 + $0x1c0] ss:$16 sps:$4 sm:$0xff]   ;;  %v7926_v54 = vld [vmem:[#allocation11 + $0x1a4] ss:$16 sps:$4 sm:$0xff]  }
  0x7f   :  { %1657 = vmatprep.mubr.bf16.mxu0 %v7011_v6  ;;  %v7924_v56 = vld [vmem:[#allocation11 + $0x1a0] ss:$16 sps:$4 sm:$0xff]   ;;  %v7932_v58 = vld [vmem:[#allocation11 + $0x184] ss:$16 sps:$4 sm:$0xff]  }
  0x80   :  { %v7938_v1 = vld [vmem:[#allocation11 + $0x164] ss:$16 sps:$4 sm:$0xff]  }
  0x81   :  { %v8576_v62 = vld [vmem:[#allocation11 + $0x1044] ss:$16 sps:$4 sm:$0xff]  }
 0x121   :  { %v7754_v26 = vpop.f32.mrf.mxu0 }
 0x123   :  { %v7755_v27 = vpop.f32.mrf.mxu0 }
 0x124   :  { %v7756_v29 = vadd.f32 %v7755_v27, %v7754_v26  ;;  %v7810_v26 = vld [vmem:[#allocation11 + $0x200] ss:$16 sps:$4 sm:$0xff]   ;;  %v7813_v27 = vld [vmem:[#allocation11 + $0x208] ss:$16 sps:$4 sm:$0xff]  }
 0x125   :  { %1640 = vmatpush1.bf16.msra.mxu0 %v7813_v27  ;;  %v7882_v27 = vld [vmem:[#allocation11 + $0x80] ss:$16 sps:$4 sm:$0xff]  }
 0x126   :  { %6985 = vmatmul.mubr.msk.f32.vlgmr.msra.gmra.mxu1 %vm393_vm3, %v7756_v29  ;;  %v7821_v29 = vld [vmem:[#allocation11 + $0x3ec] ss:$16 sps:$4 sm:$0xff]   ;;  %vm888_vm3 = vcmask 1043456  }
 0x127   :  { %1553 = vmatpush1.bf16.msra.mxu1 %v7768_v28  ;;  %v7818_v28 = vld [vmem:[#allocation11 + $0x3e4] ss:$16 sps:$4 sm:$0xff]   ;;  %1641 = vmatprep.subr.bf16.mxu0 %v7821_v29  ;;  %vm9198_vm5 = vmand %vm888_vm3, %vm129_vm9  ;;  %vm2229_vm9 = vcmask 1046532  }
 0x128   :  { %1554 = vmatprep.subr.bf16.mxu1 %v7776_v30  ;;  %v7816_v30 = vld [vmem:[#allocation11 + $0x3e0] ss:$16 sps:$4 sm:$0xff]   ;;  %1584 = vmatprep.mubr.bf16.mxu1 %v7011_v6  ;;  %v7890_v29 = vld [vmem:[#allocation11 + $0x64] ss:$16 sps:$4 sm:$0xff]   ;;  %vm9216_vm7 = vmor %vm9205_vm6, %vm9198_vm5 }
 0x129   :  { %1642 = vmatpush2.bf16.msra.mxu0 %v7819_v31  ;;  %v7888_v31 = vld [vmem:[#allocation11 + $0x60] ss:$16 sps:$4 sm:$0xff]   ;;  %vm9289_vm10 = vmor %vm2228_vm8, %vm2229_vm9 }
 0x12a   :  { %1643 = vmatprep.subr.bf16.mxu0 %v7827_v33  ;;  %v7896_v33 = vld [vmem:[#allocation11 + $0x44] ss:$16 sps:$4 sm:$0xff]  }
 0x12b   :  { %1555 = vmatpush1.bf16.msra.mxu1 %v7774_v32  ;;  %v7824_v32 = vld [vmem:[#allocation11 + $0x3c4] ss:$16 sps:$4 sm:$0xff]  }
 0x12c   :  { %1556 = vmatprep.subr.bf16.mxu1 %v7782_v34  ;;  %v7822_v34 = vld [vmem:[#allocation11 + $0x3c0] ss:$16 sps:$4 sm:$0xff]  }
 0x12d   :  { %1644 = vmatpush2.bf16.msra.mxu0 %v7825_v35  ;;  %v7894_v35 = vld [vmem:[#allocation11 + $0x40] ss:$16 sps:$4 sm:$0xff]  }
 0x12e   :  { %1645 = vmatprep.subr.bf16.mxu0 %v7833_v37  ;;  %v7902_v37 = vld [vmem:[#allocation11 + $0x24] ss:$16 sps:$4 sm:$0xff]  }
 0x12f   :  { %1557 = vmatpush1.bf16.msra.mxu1 %v7780_v36  ;;  %v7830_v36 = vld [vmem:[#allocation11 + $0x3a4] ss:$16 sps:$4 sm:$0xff]  }
 0x130   :  { %1558 = vmatprep.subr.bf16.mxu1 %v7788_v38  ;;  %v7828_v38 = vld [vmem:[#allocation11 + $0x3a0] ss:$16 sps:$4 sm:$0xff]  }
 0x131   :  { %1646 = vmatpush2.bf16.msra.mxu0 %v7831_v39  ;;  %v7900_v39 = vld [vmem:[#allocation11 + $0x20] ss:$16 sps:$4 sm:$0xff]  }
 0x133   :  { %1559 = vmatpush1.bf16.msra.mxu1 %v7786_v40  ;;  %v7836_v40 = vld [vmem:[#allocation11 + $0x384] ss:$16 sps:$4 sm:$0xff]  }
 0x134   :  { %1560 = vmatprep.subr.bf16.mxu1 %v7794_v42  ;;  %v7839_v42 = vld [vmem:[#allocation11 + $0x38c] ss:$16 sps:$4 sm:$0xff]  }
 0x135   :  { %1647 = vmatprep.subr.bf16.mxu0 %v7839_v42  ;;  %v7911_v42 = vld [vmem:[#allocation11 + $0xc] ss:$16 sps:$4 sm:$0xff]  }
 0x137   :  { %1561 = vmatpush1.bf16.msra.mxu1 %v7792_v44  ;;  %v7837_v44 = vld [vmem:[#allocation11 + $0x388] ss:$16 sps:$4 sm:$0xff]  }
 0x138   :  { %1562 = vmatprep.subr.bf16.mxu1 %v7800_v17  ;;  %1648 = vmatpush2.bf16.msra.mxu0 %v7837_v44  ;;  %v7872_v17 = vld [vmem:[#allocation11 + $0xc4] ss:$16 sps:$4 sm:$0xff]   ;;  %v7909_v44 = vld [vmem:[#allocation11 + $0x8] ss:$16 sps:$4 sm:$0xff]  }
 0x139   :  { %1649 = vmatprep.subr.bf16.mxu0 %v7845_v46  ;;  %v7917_v46 = vld [vmem:[#allocation11 + $0x1ec] ss:$16 sps:$4 sm:$0xff]  }
 0x13b   :  { %1563 = vmatpush1.bf16.msra.mxu1 %v7798_v16  ;;  %v7867_v16 = vld [vmem:[#allocation11 + $0xe8] ss:$16 sps:$4 sm:$0xff]  }
 0x13c   :  { %1564 = vmatprep.subr.bf16.mxu1 %v7806_v20  ;;  %1650 = vmatpush2.bf16.msra.mxu0 %v7843_v51  ;;  %v7873_v20 = vld [vmem:[#allocation11 + $0xc8] ss:$16 sps:$4 sm:$0xff]   ;;  %v7923_v51 = vld [vmem:[#allocation11 + $0x1cc] ss:$16 sps:$4 sm:$0xff]  }
 0x13d   :  { %1651 = vmatprep.subr.bf16.mxu0 %v7851_v57  ;;  %v7927_v57 = vld [vmem:[#allocation11 + $0x1a8] ss:$16 sps:$4 sm:$0xff]  }
 0x13f   :  { %1565 = vmatpush1.bf16.msra.mxu1 %v7804_v22  ;;  %v7881_v22 = vld [vmem:[#allocation11 + $0xac] ss:$16 sps:$4 sm:$0xff]  }
 0x140   :  { %1566 = vmatprep.subr.bf16.mxu1 %v7812_v24  ;;  %1652 = vmatpush2.bf16.msra.mxu0 %v7849_v60  ;;  %v7879_v24 = vld [vmem:[#allocation11 + $0xa8] ss:$16 sps:$4 sm:$0xff]   ;;  %v7930_v60 = vld [vmem:[#allocation11 + $0x180] ss:$16 sps:$4 sm:$0xff]  }
 0x141   :  { %1653 = vmatprep.subr.bf16.mxu0 %v7857_v2  ;;  %v7941_v2 = vld [vmem:[#allocation11 + $0x16c] ss:$16 sps:$4 sm:$0xff]  }
 0x143   :  { %1567 = vmatpush1.bf16.msra.mxu1 %v7810_v26  ;;  %v7887_v26 = vld [vmem:[#allocation11 + $0x8c] ss:$16 sps:$4 sm:$0xff]  }
 0x144   :  { %1568 = vmatprep.subr.bf16.mxu1 %v7818_v28  ;;  %1654 = vmatpush2.bf16.msra.mxu0 %v7855_v7  ;;  %v7885_v28 = vld [vmem:[#allocation11 + $0x88] ss:$16 sps:$4 sm:$0xff]   ;;  %v7936_v7 = vld [vmem:[#allocation11 + $0x160] ss:$16 sps:$4 sm:$0xff]  }
 0x145   :  { %1655 = vmatprep.subr.bf16.mxu0 %v7863_v9  ;;  %v7944_v9 = vld [vmem:[#allocation11 + $0x144] ss:$16 sps:$4 sm:$0xff]  }
 0x147   :  { %1569 = vmatpush2.bf16.msra.mxu1 %v7816_v30  ;;  %v7893_v30 = vld [vmem:[#allocation11 + $0x6c] ss:$16 sps:$4 sm:$0xff]  }
 0x148   :  { %1570 = vmatprep.subr.bf16.mxu1 %v7824_v32  ;;  %1656 = vmatpush2.bf16.msra.mxu0 %v7861_v11  ;;  %v7891_v32 = vld [vmem:[#allocation11 + $0x68] ss:$16 sps:$4 sm:$0xff]  }
 0x149   :  { %2131 = vmatprep.subr.bf16.mxu0 %v7869_v13 }
 0x14b   :  { %1571 = vmatpush2.bf16.msra.mxu1 %v7822_v34  ;;  %1658 = vmatmul.mubr.bf16.vlgmr.msra.gmra.mxu0 %v7010_v14  ;;  %v7899_v34 = vld [vmem:[#allocation11 + $0x4c] ss:$16 sps:$4 sm:$0xff]  }
 0x14c   :  { %1572 = vmatprep.subr.bf16.mxu1 %v7830_v36  ;;  %2132 = vmatpush1.bf16.msra.mxu0 %v7867_v16  ;;  %v7897_v36 = vld [vmem:[#allocation11 + $0x48] ss:$16 sps:$4 sm:$0xff]   ;;  %v7942_v16 = vld [vmem:[#allocation11 + $0x140] ss:$16 sps:$4 sm:$0xff]  }
 0x14d   :  { %2133 = vmatprep.subr.bf16.mxu0 %v7875_v18  ;;  %v7950_v18 = vld [vmem:[#allocation11 + $0x124] ss:$16 sps:$4 sm:$0xff]  }
 0x14f   :  { %1573 = vmatpush2.bf16.msra.mxu1 %v7828_v38  ;;  %v7905_v38 = vld [vmem:[#allocation11 + $0x2c] ss:$16 sps:$4 sm:$0xff]  }
 0x150   :  { %1574 = vmatprep.subr.bf16.mxu1 %v7836_v40  ;;  %2134 = vmatpush1.bf16.msra.mxu0 %v7873_v20  ;;  %v7903_v40 = vld [vmem:[#allocation11 + $0x28] ss:$16 sps:$4 sm:$0xff]  }
 0x151   :  { %2135 = vmatprep.subr.bf16.mxu0 %v7881_v22  ;;  %v7948_v22 = vld [vmem:[#allocation11 + $0x120] ss:$16 sps:$4 sm:$0xff]  }
 0x153   :  { %1575 = vmatpush2.bf16.msra.mxu1 %v7834_v43  ;;  %v7906_v43 = vld [vmem:[#allocation11] ss:$16 sps:$4 sm:$0xff]  }
 0x154   :  { %1576 = vmatprep.subr.bf16.mxu1 %v7842_v45  ;;  %2136 = vmatpush1.bf16.msra.mxu0 %v7879_v24  ;;  %v7914_v45 = vld [vmem:[#allocation11 + $0x1e4] ss:$16 sps:$4 sm:$0xff]  }
 0x155   :  { %2137 = vmatprep.subr.bf16.mxu0 %v7887_v26  ;;  %v7956_v24 = vld [vmem:[#allocation11 + $0x104] ss:$16 sps:$4 sm:$0xff]  }
 0x157   :  { %1577 = vmatpush2.bf16.msra.mxu1 %v7840_v49  ;;  %v7920_v49 = vld [vmem:[#allocation11 + $0x1c4] ss:$16 sps:$4 sm:$0xff]  }
 0x158   :  { %1578 = vmatprep.subr.bf16.mxu1 %v7848_v53  ;;  %2138 = vmatpush1.bf16.msra.mxu0 %v7885_v28  ;;  %v7921_v53 = vld [vmem:[#allocation11 + $0x1c8] ss:$16 sps:$4 sm:$0xff]  }
 0x159   :  { %2139 = vmatprep.subr.bf16.mxu0 %v7893_v30  ;;  %v7957_v28 = vld [vmem:[#allocation11 + $0x108] ss:$16 sps:$4 sm:$0xff]   ;;  %v7962_v30 = vld [vmem:[#allocation11 + $0x4e4] ss:$16 sps:$4 sm:$0xff]  }
 0x15b   :  { %1579 = vmatpush2.bf16.msra.mxu1 %v7846_v59  ;;  %v7935_v59 = vld [vmem:[#allocation11 + $0x18c] ss:$16 sps:$4 sm:$0xff]  }
 0x15c   :  { %1580 = vmatprep.subr.bf16.mxu1 %v7854_v61  ;;  %2140 = vmatpush1.bf16.msra.mxu0 %v7891_v32  ;;  %v7933_v61 = vld [vmem:[#allocation11 + $0x188] ss:$16 sps:$4 sm:$0xff]  }
 0x15d   :  { %2141 = vmatprep.subr.bf16.mxu0 %v7899_v34 }
 0x15f   :  { %1581 = vmatpush2.bf16.msra.mxu1 %v7852_v5 }
 0x160   :  { %1582 = vmatprep.subr.bf16.mxu1 %v7860_v8  ;;  %2142 = vmatpush1.bf16.msra.mxu0 %v7897_v36  ;;  %v7939_v8 = vld [vmem:[#allocation11 + $0x168] ss:$16 sps:$4 sm:$0xff]  }
 0x161   :  { %2143 = vmatprep.subr.bf16.mxu0 %v7905_v38 }
 0x163   :  { %1583 = vmatpush2.bf16.msra.mxu1 %v7858_v10  ;;  %v7947_v10 = vld [vmem:[#allocation11 + $0x14c] ss:$16 sps:$4 sm:$0xff]  }
 0x164   :  { %2058 = vmatprep.subr.bf16.mxu1 %v7866_v12  ;;  %2144 = vmatpush1.bf16.msra.mxu0 %v7903_v40  ;;  %v496_v40 = vld [vmem:[#allocation8] sm:$0x3] }
 0x165   :  { %2145 = vmatprep.subr.bf16.mxu0 %v7911_v42 }
 0x166   :  { %1585 = vmatmul.mubr.bf16.vlgmr.msra.gmra.mxu1 %v7010_v14  ;;  %v484_v14 = vlaneseq }
 0x167   :  { %2059 = vmatpush1.bf16.msra.mxu1 %v7864_v15 }
 0x168   :  { %2060 = vmatprep.subr.bf16.mxu1 %v7872_v17  ;;  %2146 = vmatpush1.bf16.msra.mxu0 %v7909_v44  ;;  %v7945_v17 = vld [vmem:[#allocation11 + $0x148] ss:$16 sps:$4 sm:$0xff]  }
 0x169   :  { %2147 = vmatprep.subr.bf16.mxu0 %v7917_v46 }
 0x16b   :  { %2061 = vmatpush1.bf16.msra.mxu1 %v7870_v19  ;;  %v7953_v19 = vld [vmem:[#allocation11 + $0x12c] ss:$16 sps:$4 sm:$0xff]  }
 0x16c   :  { %2062 = vmatprep.subr.bf16.mxu1 %v7878_v21  ;;  %2148 = vmatpush2.bf16.msra.mxu0 %v7915_v48  ;;  %v485_v21 = vshrl.u32 %v484_v14, 7 }
 0x16d   :  { %2149 = vmatprep.subr.bf16.mxu0 %v7923_v51 }
 0x16e   :  { %v9112_v26 = vsub.s32 0, %v485_v21  ;;  %v9114_v32 = vsub.s32 1, %v485_v21 }
 0x16f   :  { %2063 = vmatpush1.bf16.msra.mxu1 %v7876_v23  ;;  %v7951_v23 = vld [vmem:[#allocation11 + $0x128] ss:$16 sps:$4 sm:$0xff]  }
 0x170   :  { %2064 = vmatprep.subr.bf16.mxu1 %v7884_v25  ;;  %2150 = vmatpush2.bf16.msra.mxu0 %v7921_v53  ;;  %v7959_v25 = vld [vmem:[#allocation11 + $0x10c] ss:$16 sps:$4 sm:$0xff]  }
 0x171   :  { %2151 = vmatprep.subr.bf16.mxu0 %v7929_v55 }
 0x173   :  { %2065 = vmatpush1.bf16.msra.mxu1 %v7882_v27  ;;  %v7954_v27 = vld [vmem:[#allocation11 + $0x100] ss:$16 sps:$4 sm:$0xff]  }
 0x174   :  { %2066 = vmatprep.subr.bf16.mxu1 %v7890_v29  ;;  %2152 = vmatpush2.bf16.msra.mxu0 %v7927_v57  ;;  %v482_v29 = vld [vmem:[#allocation6] sm:$0x3] }
 0x175   :  { %2153 = vmatprep.subr.bf16.mxu0 %v7935_v59  ;;  %v491_v36 = vrot.slane %v482_v29, %v9114_v32 }
 0x177   :  { %2067 = vmatpush1.bf16.msra.mxu1 %v7888_v31  ;;  %v7965_v31 = vld [vmem:[#allocation11 + $0x4ec] ss:$16 sps:$4 sm:$0xff]  }
 0x178   :  { %2068 = vmatprep.subr.bf16.mxu1 %v7896_v33  ;;  %2154 = vmatpush2.bf16.msra.mxu0 %v7933_v61  ;;  %v8878_v33 = vmov 1966171168  }
 0x179   :  { %2155 = vmatprep.subr.bf16.mxu0 %v7941_v2  ;;  %v520_v34 = vunpack.c.l.s4 %v8878_v33 }
 0x17b   :  { %2069 = vmatpush1.bf16.msra.mxu1 %v7894_v35  ;;  %v487_v35 = vrot.slane %v482_v29, %v9112_v26 }
 0x17c   :  { %2070 = vmatprep.subr.bf16.mxu1 %v7902_v37  ;;  %2156 = vmatpush2.bf16.msra.mxu0 %v7939_v8  ;;  %v521_v37 = vunpack.c.0.s8 %v520_v34 }
 0x17d   :  { %2157 = vmatprep.subr.bf16.mxu0 %v7947_v10 }
 0x17e   :  { %v524_v44 = vsub.s32 %v521_v37, %v485_v21  ;;  %v8713_v21 = vld [vmem:[#allocation3 + $0x28] sm:$0xff] }
 0x17f   :  { %2071 = vmatpush1.bf16.msra.mxu1 %v7900_v39 }
 0x180   :  { %2072 = vmatprep.subr.bf16.mxu1 %v7908_v41  ;;  %2158 = vmatpush2.bf16.msra.mxu0 %v7945_v17 }
 0x181   :  { %2159 = vmatprep.subr.bf16.mxu0 %v7953_v19 }
 0x183   :  { %2073 = vmatpush1.bf16.msra.mxu1 %v7906_v43 }
 0x184   :  { %2074 = vmatprep.subr.bf16.mxu1 %v7914_v45  ;;  %2160 = vmatpush2.bf16.msra.mxu0 %v7951_v23  ;;  %v509_v45 = vrot.slane %v496_v40, %v9112_v26 }
 0x185   :  { %2161 = vmatprep.subr.bf16.mxu0 %v7959_v25  ;;  %v8714_v25 = vld [vmem:[#allocation3 + $0x30] sm:$0xff] }
 0x187   :  { %2075 = vmatpush2.bf16.msra.mxu1 %v7912_v47  ;;  %v513_v47 = vrot.slane %v496_v40, %v9114_v32  ;;  %v8717_v40 = vld [vmem:[#allocation3 + $0x48] sm:$0xff] }
 0x188   :  { %2076 = vmatprep.subr.bf16.mxu1 %v7920_v49  ;;  %2162 = vmatpush2.bf16.msra.mxu0 %v7957_v28 }
 0x189   :  { %2752 = vmatprep.subr.bf16.mxu0 %v7965_v31 }
 0x18b   :  { %2077 = vmatpush2.bf16.msra.mxu1 %v7918_v52 }
 0x18c   :  { %2078 = vmatprep.subr.bf16.mxu1 %v7926_v54 }
 0x18f   :  { %2079 = vmatpush2.bf16.msra.mxu1 %v7924_v56 }
 0x190   :  { %2080 = vmatprep.subr.bf16.mxu1 %v7932_v58 }
 0x193   :  { %2081 = vmatpush2.bf16.msra.mxu1 %v7930_v60 }
 0x194   :  { %2082 = vmatprep.subr.bf16.mxu1 %v7938_v1 }
 0x197   :  { %2083 = vmatpush2.bf16.msra.mxu1 %v7936_v7  ;;  %v8709_v7 = vld [vmem:[#allocation3 + $0x8] sm:$0xff] }
 0x198   :  { %2084 = vmatprep.subr.bf16.mxu1 %v7944_v9 }
 0x19b   :  { %2085 = vmatpush2.bf16.msra.mxu1 %v7942_v16  ;;  %v8712_v16 = vld [vmem:[#allocation3 + $0x20] sm:$0xff] }
 0x19c   :  { %2086 = vmatprep.subr.bf16.mxu1 %v7950_v18 }
 0x19f   :  { %2087 = vmatpush2.bf16.msra.mxu1 %v7948_v22 }
 0x1a0   :  { %2088 = vmatprep.subr.bf16.mxu1 %v7956_v24 }
 0x1a3   :  { %2089 = vmatpush2.bf16.msra.mxu1 %v7954_v27 }
 0x1a4   :  { %2679 = vmatprep.subr.bf16.mxu1 %v7962_v30  ;;  %v8715_v30 = vld [vmem:[#allocation3 + $0x38] sm:$0xff] }
 0x1e6   :  { %v9102_v0 = vpop.f32.mrf.mxu1 }
 0x1e7   :  { %v468_v3 = vmul.f32 %v9102_v0, %v9102_v0 }
 0x1e8   :  { %v9106_v4 = vpop.f32.mrf.mxu1 }
 0x1e9   :  { %v472_v5 = vrot.slane %v468_v3, 6  ;;  %v469_v6 = vmul.f32 %v9106_v4, %v9106_v4 }
 0x1eb   :  { %v476_v11 = vsub.f32 %v9102_v0, %v472_v5  ;;  %v473_v12 = vrot.slane %v469_v6, 6  ;;  %v8708_v5 = vld [vmem:[#allocation3] sm:$0xff] }
 0x1ed   :  { %v478_v13 = vadd.f32 1e-05, %v476_v11  ;;  %v477_v15 = vsub.f32 %v9106_v4, %v473_v12  ;;  %v8710_v11 = vld [vmem:[#allocation3 + $0x10] sm:$0xff] }
 0x1ef   :  { %8640 = vrsqrt.f32 %v478_v13  ;;  %v479_v20 = vadd.f32 1e-05, %v477_v15  ;;  %v8711_v13 = vld [vmem:[#allocation3 + $0x18] sm:$0xff] }
 0x1f1   :  { %8642 = vrsqrt.f32 %v479_v20 }
 0x1fc   :  { %v8641_v38 = vpop.eup %8640 }
 0x1fd   :  { %v494_v39 = vmul.f32 %v8641_v38, %v487_v35  ;;  %v8716_v35 = vld [vmem:[#allocation3 + $0x40] sm:$0xff] }
 0x1fe   :  { %v8643_v41 = vpop.eup %8642 }
 0x1ff   :  { %v499_v42 = vrot.slane %v494_v39, 2  ;;  %v495_v43 = vmul.f32 %v8643_v41, %v491_v36 }
 0x201   :  { %v503_v46 = vmul.f32 %v499_v42, %v9102_v0  ;;  %v500_v48 = vrot.slane %v495_v43, 2  ;;  %v518_v49 = vcombine.low %v494_v39, %v495_v43 }
 0x203   :  { %v504_v51 = vmul.f32 %v500_v48, %v9106_v4  ;;  %v525_v52 = vrot.slane %v518_v49, %v524_v44  ;;  %v516_v53 = vsub.f32 %v509_v45, %v503_v46 }
 0x205   :  { %v517_v54 = vsub.f32 %v513_v47, %v504_v51  ;;  %v533_v55 = vrot.slane %v525_v52, %v524_v44  ;;  %v526_v56 = vcombine.high %v525_v52, %v525_v52  ;;  %v8719_v47 = vld [vmem:[#allocation3 + $0x58] sm:$0xff]  ;;  %v8720_v52 = vld [vmem:[#allocation3 + $0x60] sm:$0xff] }
 0x207   :  { %v581_v57 = vcombine.low %v516_v53, %v517_v54  ;;  %v541_v58 = vcombine.high %v533_v55, %v533_v55  ;;  %v540_v59 = vrot.slane %v526_v56, %v524_v44  ;;  %v8721_v56 = vld [vmem:[#allocation3 + $0x68] sm:$0xff] }
 0x209   :  { %v588_v60 = vrot.slane %v581_v57, %v524_v44  ;;  %v546_v61 = vrot.slane %v541_v58, %v9112_v26  ;;  %v550_v1 = vrot.slane %v541_v58, %v9114_v32  ;;  %v542_v0 = vcombine.high %v540_v59, %v540_v59 }
 0x20b   :  { %v589_v2 = vcombine.high %v588_v60, %v588_v60  ;;  %v596_v3 = vrot.slane %v588_v60, %v524_v44  ;;  %v563_v6 = vmul.f32 %v8708_v5, %v546_v61  ;;  %v564_v4 = vmul.f32 %v8709_v7, %v550_v1  ;;  %v8722_v60 = vld [vmem:[#allocation3 + $0x70] sm:$0xff] }
 0x20c   :  { %v565_v12 = vmul.f32 %v8710_v11, %v546_v61  ;;  %v566_v14 = vmul.f32 %v8711_v13, %v550_v1  ;;  %v554_v15 = vrot.slane %v542_v0, %v9112_v26  ;;  %v567_v17 = vmul.f32 %v8712_v16, %v546_v61 }
 0x20d   :  { %v603_v8 = vrot.slane %v589_v2, %v524_v44  ;;  %v607_v9 = vrot.slane %v596_v3, %v9112_v26  ;;  %v611_v10 = vrot.slane %v596_v3, %v9114_v32  ;;  %v558_v20 = vrot.slane %v542_v0, %v9114_v32  ;;  %v8718_v44 = vld [vmem:[#allocation3 + $0x50] sm:$0xff]  ;;  %v8723_v2 = vld [vmem:[#allocation3 + $0x78] sm:$0xff] }
 0x20e   :  { %v568_v22 = vmul.f32 %v8713_v21, %v550_v1  ;;  %v569_v27 = vmul.f32 %v8714_v25, %v546_v61  ;;  %v570_v31 = vmul.f32 %v8715_v30, %v550_v1  ;;  %v571_v36 = vmul.f32 %v8716_v35, %v554_v15 }
 0x20f   :  { %v9127_v18 = vadd.f32 %v607_v9, %v563_v6  ;;  %v9129_v19 = vadd.f32 %v611_v10, %v564_v4  ;;  %v9132_v23 = vadd.f32 %v607_v9, %v565_v12  ;;  %v9134_v24 = vadd.f32 %v611_v10, %v566_v14 }
 0x210   :  { %v615_v28 = vrot.slane %v603_v8, %v9112_v26  ;;  %v9137_v29 = vadd.f32 %v607_v9, %v567_v17  ;;  %v619_v33 = vrot.slane %v603_v8, %v9114_v32  ;;  %v9140_v34 = vadd.f32 %v611_v10, %v568_v22 }
 0x211   :  { %v9142_v37 = vadd.f32 %v607_v9, %v569_v27  ;;  %v6986_v38 = vmul.f32 -1.442695, %v9127_v18  ;;  %v6987_v39 = vmul.f32 -1.442695, %v9129_v19  ;;  %v572_v41 = vmul.f32 %v8717_v40, %v558_v20 }
 0x212   :  { %v9146_v42 = vadd.f32 %v611_v10, %v570_v31  ;;  %v6988_v26 = vmul.f32 -1.442695, %v9132_v23  ;;  %v6989_v43 = vmul.f32 -1.442695, %v9134_v24  ;;  %v573_v32 = vmul.f32 %v8718_v44, %v554_v15 }
 0x213   :  { %v9150_v45 = vadd.f32 %v615_v28, %v571_v36  ;;  %8644 = vpow2.f32 %v6986_v38  ;;  %v6990_v46 = vmul.f32 -1.442695, %v9137_v29  ;;  %v574_v48 = vmul.f32 %v8719_v47, %v558_v20 }
 0x214   :  { %v9153_v49 = vadd.f32 %v619_v33, %v572_v41  ;;  %8646 = vpow2.f32 %v6987_v39  ;;  %v6991_v51 = vmul.f32 -1.442695, %v9140_v34  ;;  %v575_v53 = vmul.f32 %v8720_v52, %v554_v15 }
 0x215   :  { %v9156_v54 = vadd.f32 %v615_v28, %v573_v32  ;;  %8648 = vpow2.f32 %v6988_v26  ;;  %v6992_v55 = vmul.f32 -1.442695, %v9142_v37  ;;  %v576_v57 = vmul.f32 %v8721_v56, %v558_v20 }
 0x216   :  { %v9159_v58 = vadd.f32 %v619_v33, %v574_v48  ;;  %8650 = vpow2.f32 %v6989_v43  ;;  %v6993_v59 = vmul.f32 -1.442695, %v9146_v42  ;;  %v577_v61 = vmul.f32 %v8722_v60, %v554_v15 }
 0x217   :  { %v9162_v1 = vadd.f32 %v615_v28, %v575_v53  ;;  %8652 = vpow2.f32 %v6990_v46  ;;  %v6994_v0 = vmul.f32 -1.442695, %v9150_v45  ;;  %v578_v3 = vmul.f32 %v8723_v2, %v558_v20 }
 0x218   :  { %v9165_v5 = vadd.f32 %v619_v33, %v576_v57  ;;  %8654 = vpow2.f32 %v6991_v51  ;;  %v6995_v6 = vmul.f32 -1.442695, %v9153_v49  ;;  %v9168_v7 = vadd.f32 %v615_v28, %v577_v61 }
 0x219   :  { %8656 = vpow2.f32 %v6992_v55  ;;  %v6996_v4 = vmul.f32 -1.442695, %v9156_v54  ;;  %v9171_v8 = vadd.f32 %v619_v33, %v578_v3  ;;  %v6997_v9 = vmul.f32 -1.442695, %v9159_v58  ;;  %v9180_v3 = vld [vmem:[#allocation2 + $0x68] sm:$0x11] }
 0x21a   :  { %8658 = vpow2.f32 %v6993_v59  ;;  %v6998_v10 = vmul.f32 -1.442695, %v9162_v1  ;;  %v6999_v11 = vmul.f32 -1.442695, %v9165_v5  ;;  %v7000_v12 = vmul.f32 -1.442695, %v9168_v7 }
 0x21b   :  { %8660 = vpow2.f32 %v6994_v0  ;;  %v7001_v13 = vmul.f32 -1.442695, %v9171_v8 }
 0x21c   :  { %8662 = vpow2.f32 %v6995_v6 }
 0x21d   :  { %8664 = vpow2.f32 %v6996_v4 }
 0x21e   :  { %8666 = vpow2.f32 %v6997_v9 }
 0x21f   :  { %8668 = vpow2.f32 %v6998_v10 }
 0x220   :  { %v8645_v14 = vpop.eup %8644  ;;  %8670 = vpow2.f32 %v6999_v11 }
 0x221   :  { %v8647_v15 = vpop.eup %8646  ;;  %8672 = vpow2.f32 %v7000_v12  ;;  %v688_v16 = vadd.f32 1.0, %v8645_v14  ;;  %v1090_v14 = vshll.u32 %v9180_v3, 16 }
 0x222   :  { %v8649_v17 = vpop.eup %8648  ;;  %8674 = vpow2.f32 %v7001_v13  ;;  %v689_v20 = vadd.f32 1.0, %v8647_v15 }
 0x223   :  { %v8651_v21 = vpop.eup %8650  ;;  %v690_v22 = vadd.f32 1.0, %v8649_v17  ;;  %8676 = vrcp.f32 %v688_v16 }
 0x224   :  { %v8653_v25 = vpop.eup %8652  ;;  %v691_v27 = vadd.f32 1.0, %v8651_v21  ;;  %8678 = vrcp.f32 %v689_v20 }
 0x225   :  { %v8655_v28 = vpop.eup %8654  ;;  %v692_v30 = vadd.f32 1.0, %v8653_v25  ;;  %8680 = vrcp.f32 %v690_v22 }
 0x226   :  { %v8657_v31 = vpop.eup %8656  ;;  %v693_v33 = vadd.f32 1.0, %v8655_v28  ;;  %8682 = vrcp.f32 %v691_v27 }
 0x227   :  { %v8659_v35 = vpop.eup %8658  ;;  %v694_v36 = vadd.f32 1.0, %v8657_v31  ;;  %8684 = vrcp.f32 %v692_v30  ;;  %v9192_v31 = vrot.slane %v1090_v14, 5  ;;  %v899_v14 = vld [vmem:[#allocation2 + $0x48] sm:$0xff] }
 0x228   :  { %v8661_v38 = vpop.eup %8660  ;;  %v695_v39 = vadd.f32 1.0, %v8659_v35  ;;  %8686 = vrcp.f32 %v693_v33 }
 0x229   :  { %v8663_v40 = vpop.eup %8662  ;;  %v696_v41 = vadd.f32 1.0, %v8661_v38  ;;  %8688 = vrcp.f32 %v694_v36 }
 0x22a   :  { %v8665_v26 = vpop.eup %8664  ;;  %v697_v43 = vadd.f32 1.0, %v8663_v40  ;;  %8690 = vrcp.f32 %v695_v39 }
 0x22b   :  { %v8667_v44 = vpop.eup %8666  ;;  %v698_v32 = vadd.f32 1.0, %v8665_v26  ;;  %8692 = vrcp.f32 %v696_v41 }
 0x22c   :  { %v8669_v46 = vpop.eup %8668  ;;  %v699_v47 = vadd.f32 1.0, %v8667_v44  ;;  %8694 = vrcp.f32 %v697_v43  ;;  %v926_v44 = vld [vmem:[#allocation2 + $0xb8] sm:$0x11] }
 0x22d   :  { %v8671_v48 = vpop.eup %8670  ;;  %v700_v51 = vadd.f32 1.0, %v8669_v46  ;;  %8696 = vrcp.f32 %v698_v32 }
 0x22e   :  { %v8673_v52 = vpop.eup %8672  ;;  %v701_v53 = vadd.f32 1.0, %v8671_v48  ;;  %8698 = vrcp.f32 %v699_v47 }
 0x22f   :  { %v8675_v55 = vpop.eup %8674  ;;  %v702_v56 = vadd.f32 1.0, %v8673_v52  ;;  %8700 = vrcp.f32 %v700_v51 }
 0x230   :  { %v8677_v57 = vpop.eup %8676  ;;  %v703_v59 = vadd.f32 1.0, %v8675_v55  ;;  %8702 = vrcp.f32 %v701_v53 }
 0x231   :  { %v8679_v60 = vpop.eup %8678  ;;  %8704 = vrcp.f32 %v702_v56  ;;  %v736_v61 = vmul.f32 %v8677_v57, %v9127_v18 }
 0x232   :  { %v8681_v0 = vpop.eup %8680  ;;  %8706 = vrcp.f32 %v703_v59  ;;  %v737_v2 = vmul.f32 %v8679_v60, %v9129_v19  ;;  %v9187_v19 = vld [vmem:[#allocation2 + $0xb0] sm:$0x11] }
 0x233   :  { %v8683_v6 = vpop.eup %8682  ;;  %v738_v4 = vmul.f32 %v8681_v0, %v9132_v23  ;;  %v1104_v33 = vshll.u32 %v9187_v19, 16  ;;  %v893_v0 = vld [vmem:[#allocation2 + $0x38] sm:$0xff] }
 0x234   :  { %v8685_v9 = vpop.eup %8684  ;;  %v739_v10 = vmul.f32 %v8683_v6, %v9134_v24  ;;  %v7698_v11 = vpack.c.bf16 %v737_v2, %v736_v61 }
 0x235   :  { %v8687_v12 = vpop.eup %8686  ;;  %v740_v13 = vmul.f32 %v8685_v9, %v9137_v29 }
 0x236   :  { %v8689_v15 = vpop.eup %8688  ;;  %v741_v18 = vmul.f32 %v8687_v12, %v9140_v34  ;;  %v7699_v16 = vpack.c.bf16 %v739_v10, %v738_v4  ;;  %v809_v17 = vshrl.u32 %v7698_v11, 16  ;;  %v812_v23 = vshll.u32 %v7698_v11, 16  ;;  %v896_v10 = vld [vmem:[#allocation2 + $0x98] sm:$0x11] }
 0x237   :  { %v8691_v20 = vpop.eup %8690  ;;  %v742_v21 = vmul.f32 %v8689_v15, %v9142_v37 }
 0x238   :  { %v8693_v24 = vpop.eup %8692  ;;  %v743_v22 = vmul.f32 %v8691_v20, %v9146_v42  ;;  %v7700_v25 = vpack.c.bf16 %v741_v18, %v740_v13  ;;  %v811_v29 = vrot.slane %v809_v17, 7  ;;  %v817_v27 = vshrl.u32 %v7699_v16, 16  ;;  %v902_v20 = vld [vmem:[#allocation2 + $0x90] sm:$0x11]  ;;  %v920_v42 = vld [vmem:[#allocation2 + $0x28] sm:$0x11] }
 0x239   :  { %v8695_v28 = vpop.eup %8694  ;;  %v744_v30 = vmul.f32 %v8693_v24, %v9150_v45  ;;  %v820_v34 = vshll.u32 %v7699_v16, 16  ;;  %v905_v24 = vld [vmem:[#allocation2 + $0x18] sm:$0xff] }
 0x23a   :  { %v8697_v35 = vpop.eup %8696  ;;  %v745_v37 = vmul.f32 %v8695_v28, %v9153_v49  ;;  %v7701_v36 = vpack.c.bf16 %v743_v22, %v742_v21  ;;  %v814_v38 = vor.u32 %v812_v23, %v811_v29  ;;  %v815_v39 = vrot.slane %v811_v29, 4  ;;  %v908_v22 = vld [vmem:[#allocation2 + $0x70] sm:$0x11] }
 0x23b   :  { %v8699_v40 = vpop.eup %8698  ;;  %v746_v45 = vmul.f32 %v8697_v35, %v9156_v54  ;;  %v819_v41 = vrot.slane %v817_v27, 7  ;;  %v825_v26 = vshrl.u32 %v7700_v25, 16  ;;  %v828_v43 = vshll.u32 %v7700_v25, 16  ;;  %v917_v35 = vld [vmem:[#allocation2 + $0x78] sm:$0xff] }
 0x23c   :  { %v8701_v49 = vpop.eup %8700  ;;  %v747_v32 = vmul.f32 %v8699_v40, %v9159_v58  ;;  %v7702_v46 = vpack.c.bf16 %v745_v37, %v744_v30  ;;  %v833_v47 = vshrl.u32 %v7701_v36, 16  ;;  %v836_v48 = vshll.u32 %v7701_v36, 16  ;;  %v911_v30 = vld [vmem:[#allocation2 + $0x58] sm:$0xff]  ;;  %v923_v40 = vld [vmem:[#allocation2 + $0x40] sm:$0xff] }
 0x23d   :  { %v8703_v51 = vpop.eup %8702  ;;  %v748_v52 = vmul.f32 %v8701_v49, %v9162_v1  ;;  %v822_v53 = vor.u32 %v820_v34, %v819_v41  ;;  %v823_v54 = vrot.slane %v819_v41, 4  ;;  %v827_v55 = vrot.slane %v825_v26, 7  ;;  %v914_v34 = vld [vmem:[#allocation2 + $0x50] sm:$0x11]  ;;  %v929_v49 = vld [vmem:[#allocation2 + $0xa0] sm:$0xff] }
 0x23e   :  { %v8705_v56 = vpop.eup %8704  ;;  %v749_v57 = vmul.f32 %v8703_v51, %v9165_v5  ;;  %v7703_v59 = vpack.c.bf16 %v747_v32, %v746_v45  ;;  %v835_v60 = vrot.slane %v833_v47, 7  ;;  %v841_v61 = vshrl.u32 %v7702_v46, 16  ;;  %v932_v51 = vld [vmem:[#allocation2 + $0x60] sm:$0x11] }
 0x23f   :  { %v8707_v2 = vpop.eup %8706  ;;  %v750_v1 = vmul.f32 %v8705_v56, %v9168_v7  ;;  %v830_v6 = vor.u32 %v828_v43, %v827_v55  ;;  %v831_v4 = vrot.slane %v827_v55, 4  ;;  %v844_v9 = vshll.u32 %v7702_v46, 16  ;;  %v935_v56 = vld [vmem:[#allocation2 + $0x88] sm:$0xff] }
 0x240   :  { %v751_v5 = vmul.f32 %v8707_v2, %v9171_v8  ;;  %v7704_v11 = vpack.c.bf16 %v749_v57, %v748_v52  ;;  %v838_v12 = vor.u32 %v836_v48, %v835_v60  ;;  %v839_v13 = vrot.slane %v835_v60, 4  ;;  %v938_v57 = vld [vmem:[#allocation2 + $0x8] sm:$0x11] }
 0x241   :  { %v843_v15 = vrot.slane %v841_v61, 7  ;;  %v849_v18 = vshrl.u32 %v7703_v59, 16  ;;  %v852_v16 = vshll.u32 %v7703_v59, 16  ;;  %v9224_v17 = vsel %vm9216_vm7, %v814_v38, %v893_v0 }
 0x242   :  { %v7705_v21 = vpack.c.bf16 %v751_v5, %v750_v1  ;;  %v857_v7 = vshrl.u32 %v7704_v11, 16  ;;  %v860_v23 = vshll.u32 %v7704_v11, 16  ;;  %895 = vst [vmem:[#allocation2 + $0x38] sm:$0xff] %v9224_v17  ;;  %v897_v8 = vsel %vm9046_vm12, %v815_v39, %v896_v10 }
 0x243   :  { %v846_v25 = vor.u32 %v844_v9, %v843_v15  ;;  %v847_v29 = vrot.slane %v843_v15, 4  ;;  %v851_v27 = vrot.slane %v849_v18, 7  ;;  %v9231_v28 = vsel %vm9216_vm7, %v822_v53, %v899_v14  ;;  %898 = vst [vmem:[#allocation2 + $0x98] sm:$0x11] %v897_v8 }
 0x244   :  { %v859_v37 = vrot.slane %v857_v7, 7  ;;  %v865_v36 = vshrl.u32 %v7705_v21, 16  ;;  %v868_v38 = vshll.u32 %v7705_v21, 16  ;;  %901 = vst [vmem:[#allocation2 + $0x48] sm:$0xff] %v9231_v28  ;;  %v903_v39 = vsel %vm9046_vm12, %v823_v54, %v902_v20 }
 0x245   :  { %v854_v45 = vor.u32 %v852_v16, %v851_v27  ;;  %v855_v41 = vrot.slane %v851_v27, 4  ;;  %v906_v26 = vsel %vm9216_vm7, %v830_v6, %v905_v24  ;;  %v909_v43 = vsel %vm9046_vm12, %v831_v4, %v908_v22  ;;  %904 = vst [vmem:[#allocation2 + $0x90] sm:$0x11] %v903_v39 }
 0x246   :  { %v862_v32 = vor.u32 %v860_v23, %v859_v37  ;;  %v863_v46 = vrot.slane %v859_v37, 4  ;;  %v867_v47 = vrot.slane %v865_v36, 7  ;;  %v912_v48 = vsel %vm9216_vm7, %v838_v12, %v911_v30  ;;  %907 = vst [vmem:[#allocation2 + $0x18] sm:$0xff] %v906_v26  ;;  %910 = vst [vmem:[#allocation2 + $0x70] sm:$0x11] %v909_v43 }
 0x247   :  { %v915_v52 = vsel %vm9046_vm12, %v839_v13, %v914_v34  ;;  %v9246_v53 = vsel %vm9216_vm7, %v846_v25, %v917_v35  ;;  %v921_v54 = vsel %vm9046_vm12, %v847_v29, %v920_v42  ;;  %v9252_v55 = vsel %vm9216_vm7, %v854_v45, %v923_v40  ;;  %913 = vst [vmem:[#allocation2 + $0x58] sm:$0xff] %v912_v48 }
 0x248   :  { %v870_v59 = vor.u32 %v868_v38, %v867_v47  ;;  %v871_v60 = vrot.slane %v867_v47, 4  ;;  %919 = vst [vmem:[#allocation2 + $0x78] sm:$0xff] %v9246_v53  ;;  %925 = vst [vmem:[#allocation2 + $0x40] sm:$0xff] %v9252_v55  ;;  %v927_v61 = vsel %vm9046_vm12, %v855_v41, %v926_v44  ;;  %v930_v0 = vsel %vm9216_vm7, %v862_v32, %v929_v49 }
 0x249   :  { %916 = vst [vmem:[#allocation2 + $0x50] sm:$0x11] %v915_v52  ;;  %922 = vst [vmem:[#allocation2 + $0x28] sm:$0x11] %v921_v54  ;;  %v933_v2 = vsel %vm9046_vm12, %v863_v46, %v932_v51  ;;  %v1053_v1 = vshrl.u32 %v9224_v17, 16  ;;  %v1056_v6 = vshll.u32 %v9224_v17, 16  ;;  %v1093_v25 = vsel %vm9090_vm2, %v9094_v63, %v9192_v31 }
 0x24a   :  { %928 = vst [vmem:[#allocation2 + $0xb8] sm:$0x11] %v927_v61  ;;  %931 = vst [vmem:[#allocation2 + $0xa0] sm:$0xff] %v930_v0  ;;  %v1067_v4 = vshrl.u32 %v9231_v28, 16  ;;  %v936_v9 = vsel %vm9216_vm7, %v870_v59, %v935_v56  ;;  %v939_v10 = vsel %vm9046_vm12, %v871_v60, %v938_v57  ;;  %v1015_v5 = vld [vmem:[#allocation2 + $0x98] sm:$0x11] }
 0x24b   :  { %934 = vst [vmem:[#allocation2 + $0x60] sm:$0x11] %v933_v2  ;;  %v1070_v11 = vshll.u32 %v9231_v28, 16  ;;  %v1109_v12 = vshrl.u32 %v9246_v53, 16  ;;  %937 = vst [vmem:[#allocation2 + $0x88] sm:$0xff] %v936_v9  ;;  %v1055_v13 = vrot.slane %v1053_v1, 4 }
 0x24c   :  { %940 = vst [vmem:[#allocation2 + $0x8] sm:$0x11] %v939_v10  ;;  %v1058_v14 = vrot.slane %v1056_v6, 5  ;;  %v1062_v15 = vshll.u32 %v1015_v5, 16  ;;  %v1069_v18 = vrot.slane %v1067_v4, 4  ;;  %v1106_v58 = vrot.slane %v1104_v33, 5 }
 0x24d   :  { %v1016_v16 = vld [vmem:[#allocation2 + $0x90] sm:$0x11]  ;;  %v1072_v20 = vrot.slane %v1070_v11, 5  ;;  %v1112_v50 = vshll.u32 %v9246_v53, 16  ;;  %v1123_v21 = vshrl.u32 %v9252_v55, 16  ;;  %v1126_v24 = vshll.u32 %v9252_v55, 16 }
 0x24e   :  { %v1059_v7 = vor.u32 %v1058_v14, %v1055_v13  ;;  %v1064_v23 = vrot.slane %v1062_v15, 5  ;;  %v1076_v8 = vshll.u32 %v1016_v16, 16  ;;  %v2206_v29 = vld [vmem:[#allocation2 + $0x38] sm:$0xee]  ;;  %v1111_v34 = vrot.slane %v1109_v12, 4 }
 0x24f   :  { %v1073_v22 = vor.u32 %v1072_v20, %v1069_v18  ;;  %v1114_v35 = vrot.slane %v1112_v50, 5  ;;  %v1107_v36 = vsel %vm9090_vm2, %v9094_v63, %v1106_v58  ;;  %v1125_v39 = vrot.slane %v1123_v21, 4  ;;  %v2207_v31 = vld [vmem:[#allocation2 + $0x48] sm:$0xee]  ;;  %v2210_v54 = vld [vmem:[#allocation2 + $0x78] sm:$0xee] }
 0x250   :  { %v1060_v27 = vrot.slane %v1059_v7, 4  ;;  %v1078_v33 = vrot.slane %v1076_v8, 5  ;;  %v1019_v30 = vld [vmem:[#allocation2 + $0x28] sm:$0x11]  ;;  %v1128_v42 = vrot.slane %v1126_v24, 5  ;;  %v7156_v43 = vrot.slane %v2206_v29, 9 }
 0x251   :  { %v1074_v37 = vrot.slane %v1073_v22, 4  ;;  %v1020_v38 = vld [vmem:[#allocation2 + $0xb8] sm:$0x11]  ;;  %v1118_v41 = vshll.u32 %v1019_v30, 16  ;;  %v7015_v32 = vcombine.high %v1093_v25, %v1107_v36  ;;  %v1115_v46 = vor.u32 %v1114_v35, %v1111_v34  ;;  %v2211_v56 = vld [vmem:[#allocation2 + $0x40] sm:$0xee] }
 0x252   :  { %v1065_v40 = vsel %vm9090_vm2, %v1060_v27, %v1064_v23  ;;  %v1132_v26 = vshll.u32 %v1020_v38, 16  ;;  %v1129_v47 = vor.u32 %v1128_v42, %v1125_v39  ;;  %v2241_v48 = vrot.slane %v1015_v5, 5  ;;  %v9313_v58 = vld [vmem:[#allocation2 + $0xa8] sm:$0xff]  ;;  %v9319_v7 = vld [vmem:[#allocation2 + $0x30] sm:$0x11] }
 0x253   :  { %v1079_v45 = vsel %vm9090_vm2, %v1074_v37, %v1078_v33  ;;  %v7157_v51 = vrot.slane %v2207_v31, 9  ;;  %v2245_v52 = vrot.slane %v1016_v16, 5  ;;  %v1120_v57 = vrot.slane %v1118_v41, 5  ;;  %v4190_v23 = vld [vmem:[#allocation2 + $0x10] sm:$0xee] }
 0x254   :  { %v7013_v44 = vcombine.high %v1065_v40, %v1079_v45  ;;  %v7012_v49 = vcombine.low %v1065_v40, %v1079_v45  ;;  %v1134_v59 = vrot.slane %v1132_v26, 5  ;;  %v2242_v60 = vsel %vm9289_vm10, %v7156_v43, %v2241_v48  ;;  %v9324_v22 = vld [vmem:[#allocation2 + $0x98] sm:$0x11]  ;;  %v7960_v29 = vld [vmem:[#allocation11 + $0x4e0] ss:$16 sps:$4 sm:$0xff]  }
 0x255   :  { %v1116_v61 = vrot.slane %v1115_v46, 4  ;;  %v2246_v0 = vsel %vm9289_vm10, %v7157_v51, %v2245_v52  ;;  %v7160_v2 = vrot.slane %v2210_v54, 9  ;;  %v2257_v1 = vrot.slane %v1019_v30, 5  ;;  %v3477_v27 = vld [vmem:[#allocation2 + $0xb0] sm:$0x11] }
 0x256   :  { %1594 = vmatprep.mubr.bf16.mxu1 %v7013_v44  ;;  %1667 = vmatprep.mubr.bf16.mxu0 %v7013_v44  ;;  %v1130_v6 = vrot.slane %v1129_v47, 4  ;;  %v9297_v4 = vcombine.high %v2242_v60, %v2246_v0  ;;  %v9299_v9 = vcombine.low %v2242_v60, %v2246_v0  ;;  %v7161_v10 = vrot.slane %v2211_v56, 9  ;;  %v4194_v33 = vld [vmem:[#allocation2 + $0x20] sm:$0xee]  ;;  %v7963_v30 = vld [vmem:[#allocation11 + $0x4e8] ss:$16 sps:$4 sm:$0xff]  }
 0x257   :  { %1595 = vmatmul.mubr.bf16.gmra.mxu1 %v7012_v49  ;;  %1668 = vmatmul.mubr.bf16.gmra.mxu0 %v7012_v49  ;;  %v2258_v5 = vsel %vm9289_vm10, %v7160_v2, %v2257_v1  ;;  %v2261_v11 = vrot.slane %v1020_v38, 5  ;;  %v7014_v12 = vcombine.low %v1093_v25, %v1107_v36  ;;  %v1121_v13 = vsel %vm9090_vm2, %v1116_v61, %v1120_v57  ;;  %v4191_v25 = vld [vmem:[#allocation2 + $0x38] sm:$0xee]  ;;  %v3473_v35 = vld [vmem:[#allocation2 + $0x90] sm:$0x11] }
 0x258   :  { %1604 = vmatprep.mubr.bf16.mxu1 %v7015_v32  ;;  %1677 = vmatprep.mubr.bf16.mxu0 %v7015_v32  ;;  %v1135_v14 = vsel %vm9090_vm2, %v1130_v6, %v1134_v59  ;;  %v9317_v50 = vcombine.high %v9313_v58, %v9313_v58  ;;  %v7378_v8 = vrot.slane %v4190_v23, 9  ;;  %v4216_v24 = vrot.slane %v9319_v7, 5  ;;  %v4192_v37 = vld [vmem:[#allocation2 + $0x48] sm:$0xee]  ;;  %v4193_v40 = vld [vmem:[#allocation2 + $0x18] sm:$0xee] }
 0x259   :  { %v2262_v15 = vsel %vm9289_vm10, %v7161_v10, %v2261_v11  ;;  %v7017_v20 = vcombine.high %v1121_v13, %v1135_v14  ;;  %v7016_v21 = vcombine.low %v1121_v13, %v1135_v14  ;;  %v9328_v34 = vcombine.low %v9313_v58, %v9313_v58  ;;  %v7968_v36 = vld [vmem:[#allocation11 + $0x4c4] ss:$16 sps:$4 sm:$0xff]   ;;  %v7971_v31 = vld [vmem:[#allocation11 + $0x4cc] ss:$16 sps:$4 sm:$0xff]   ;;  %v7966_v43 = vld [vmem:[#allocation11 + $0x4c0] ss:$16 sps:$4 sm:$0xff]  }
 0x25a   :  { %v9309_v18 = vcombine.high %v2258_v5, %v2262_v15  ;;  %v9311_v16 = vcombine.low %v2258_v5, %v2262_v15  ;;  %v4217_v38 = vsel %vm9289_vm10, %v7378_v8, %v4216_v24  ;;  %v7379_v39 = vrot.slane %v4191_v25, 9  ;;  %v3475_v45 = vld [vmem:[#allocation2 + $0x70] sm:$0x11]  ;;  %v7969_v44 = vld [vmem:[#allocation11 + $0x4c8] ss:$16 sps:$4 sm:$0xff]  }
 0x25b   :  { %v4220_v42 = vrot.slane %v9324_v22, 5  ;;  %v7382_v41 = vrot.slane %v4194_v33, 9  ;;  %v4232_v26 = vrot.slane %v3477_v27, 5  ;;  %v3479_v49 = vld [vmem:[#allocation2 + $0x28] sm:$0x11]  ;;  %v7380_v46 = vrot.slane %v4192_v37, 9 }
 0x25c   :  { %v4224_v47 = vrot.slane %v3473_v35, 5  ;;  %v4195_v48 = vld [vmem:[#allocation2 + $0x78] sm:$0xee]  ;;  %v7085_v51 = vcombine.high %v9224_v17, %v9231_v28  ;;  %v3481_v52 = vld [vmem:[#allocation2 + $0xb8] sm:$0x11]  ;;  %v7381_v57 = vrot.slane %v4193_v40, 9  ;;  %v7084_v8 = vcombine.low %v9224_v17, %v9231_v28 }
 0x25d   :  { %v4221_v32 = vsel %vm9289_vm10, %v7379_v39, %v4220_v42  ;;  %v4196_v59 = vld [vmem:[#allocation2 + $0x40] sm:$0xee]  ;;  %v7974_v60 = vld [vmem:[#allocation11 + $0x4a4] ss:$16 sps:$4 sm:$0xff]   ;;  %v3483_v2 = vld [vmem:[#allocation2 + $0x60] sm:$0x11]  ;;  %v4233_v11 = vsel %vm9289_vm10, %v7382_v41, %v4232_v26 }
 0x25e   :  { %v9339_v54 = vcombine.low %v4217_v38, %v4221_v32  ;;  %v9341_v56 = vcombine.high %v4217_v38, %v4221_v32  ;;  %v7977_v61 = vld [vmem:[#allocation11 + $0x4ac] ss:$16 sps:$4 sm:$0xff]   ;;  %v4225_v1 = vsel %vm9289_vm10, %v7380_v46, %v4224_v47  ;;  %v4228_v6 = vrot.slane %v3475_v45, 5  ;;  %v7975_v23 = vld [vmem:[#allocation11 + $0x4a8] ss:$16 sps:$4 sm:$0xff]  }
 0x25f   :  { %1605 = vmatmul.mubr.bf16.gmra.mxu1 %v7014_v12  ;;  %1678 = vmatmul.mubr.bf16.gmra.mxu0 %v7014_v12  ;;  %v4197_v0 = vld [vmem:[#allocation2 + $0xa0] sm:$0xee]  ;;  %v7383_v10 = vrot.slane %v4195_v48, 9  ;;  %v4236_v5 = vrot.slane %v3479_v49, 5  ;;  %v7384_v12 = vrot.slane %v4196_v59, 9  ;;  %v4240_v13 = vrot.slane %v3481_v52, 5 }
 0x260   :  { %1614 = vmatprep.mubr.bf16.mxu1 %v7017_v20  ;;  %1687 = vmatprep.mubr.bf16.mxu0 %v7017_v20  ;;  %v4229_v14 = vsel %vm9289_vm10, %v7381_v57, %v4228_v6  ;;  %v7385_v20 = vrot.slane %v4197_v0, 9  ;;  %v4244_v25 = vrot.slane %v3483_v2, 5  ;;  %v7983_v27 = vld [vmem:[#allocation11 + $0x48c] ss:$16 sps:$4 sm:$0xff]   ;;  %v7978_v38 = vld [vmem:[#allocation11 + $0x480] ss:$16 sps:$4 sm:$0xff]   ;;  %v7089_v46 = vcombine.high %v9246_v53, %v9252_v55 }
 0x261   :  { %v4237_v15 = vsel %vm9289_vm10, %v7383_v10, %v4236_v5  ;;  %v9353_v24 = vcombine.high %v4225_v1, %v4229_v14  ;;  %v9355_v33 = vcombine.low %v4225_v1, %v4229_v14  ;;  %v4241_v37 = vsel %vm9289_vm10, %v7384_v12, %v4240_v13  ;;  %v7981_v39 = vld [vmem:[#allocation11 + $0x488] ss:$16 sps:$4 sm:$0xff]   ;;  %v7986_v42 = vld [vmem:[#allocation11 + $0x464] ss:$16 sps:$4 sm:$0xff]   ;;  %v7989_v40 = vld [vmem:[#allocation11 + $0x46c] ss:$16 sps:$4 sm:$0xff]  }
 0x262   :  { %v9359_v35 = vcombine.low %v4233_v11, %v4237_v15  ;;  %v7987_v45 = vld [vmem:[#allocation11 + $0x468] ss:$16 sps:$4 sm:$0xff]   ;;  %v2205_v26 = vld [vmem:[#allocation2 + $0x10] sm:$0xee]  ;;  %v8725_v49 = vld [vmem:[#allocation2] sm:$0x11]  ;;  %v7088_v1 = vcombine.low %v9246_v53, %v9252_v55 }
 0x263   :  { %v2204_v41 = vld [vmem:[#allocation2 + $0xa8] sm:$0xee]  ;;  %v2233_v32 = vrot.slane %v8725_v49, 5  ;;  %v7155_v47 = vrot.slane %v2205_v26, 9  ;;  %v8726_v48 = vld [vmem:[#allocation2 + $0x30] sm:$0x11] }
 0x264   :  { %v7990_v52 = vld [vmem:[#allocation11 + $0x440] ss:$16 sps:$4 sm:$0xff]   ;;  %v7993_v57 = vld [vmem:[#allocation11 + $0x448] ss:$16 sps:$4 sm:$0xff]   ;;  %v7998_v59 = vld [vmem:[#allocation11 + $0x424] ss:$16 sps:$4 sm:$0xff]  }
 0x265   :  { %v7996_v0 = vld [vmem:[#allocation11 + $0x420] ss:$16 sps:$4 sm:$0xff]   ;;  %v7999_v2 = vld [vmem:[#allocation11 + $0x428] ss:$16 sps:$4 sm:$0xff]   ;;  %v8004_v6 = vld [vmem:[#allocation11 + $0x404] ss:$16 sps:$4 sm:$0xff]  }
 0x266   :  { %v8007_v10 = vld [vmem:[#allocation11 + $0x40c] ss:$16 sps:$4 sm:$0xff]   ;;  %v8005_v12 = vld [vmem:[#allocation11 + $0x408] ss:$16 sps:$4 sm:$0xff]   ;;  %v8010_v13 = vld [vmem:[#allocation11 + $0x5e4] ss:$16 sps:$4 sm:$0xff]  }
 0x267   :  { %1615 = vmatmul.mubr.bf16.gmra.mxu1 %v7016_v21  ;;  %1688 = vmatmul.mubr.bf16.gmra.mxu0 %v7016_v21  ;;  %v7972_v21 = vld [vmem:[#allocation11 + $0x4a0] ss:$16 sps:$4 sm:$0xff]   ;;  %v8013_v14 = vld [vmem:[#allocation11 + $0x5ec] ss:$16 sps:$4 sm:$0xff]   ;;  %v6172_v53 = vld [vmem:[#allocation2 + $0x38] sm:$0xee] }
 0x268   :  { %2090 = vmatprep.mubr.bf16.mxu1 %v9317_v50  ;;  %2163 = vmatprep.mubr.bf16.mxu0 %v9317_v50  ;;  %v6173_v55 = vld [vmem:[#allocation2 + $0x48] sm:$0xee]  ;;  %v8074_v63 = vld [vmem:[#allocation11 + $0x680] ss:$16 sps:$4 sm:$0xff]  }
 0x269   :  { %v8022_v26 = vld [vmem:[#allocation11 + $0x5a4] ss:$16 sps:$4 sm:$0xff]  }
 0x26f   :  { %2091 = vmatmul.mubr.bf16.vlgmr.msra.gmra.mxu1 %v9328_v34  ;;  %2164 = vmatmul.mubr.bf16.vlgmr.msra.gmra.mxu0 %v9328_v34 }
 0x270   :  { %2680 = vmatpush1.bf16.msra.mxu1 %v7960_v29  ;;  %2753 = vmatpush1.bf16.msra.mxu0 %v7963_v30  ;;  %v7980_v29 = vld [vmem:[#allocation11 + $0x484] ss:$16 sps:$4 sm:$0xff]   ;;  %v9357_v30 = vcombine.high %v4233_v11, %v4237_v15  ;;  %v8002_v11 = vld [vmem:[#allocation11 + $0x400] ss:$16 sps:$4 sm:$0xff]  }
 0x271   :  { %2100 = vmatprep.mubr.bf16.mxu1 %v7085_v51  ;;  %2173 = vmatprep.mubr.bf16.mxu0 %v7085_v51  ;;  %v2237_v51 = vrot.slane %v8726_v48, 5  ;;  %v8008_v15 = vld [vmem:[#allocation11 + $0x5e0] ss:$16 sps:$4 sm:$0xff]  }
 0x272   :  { %2681 = vmatprep.subr.bf16.mxu1 %v7968_v36  ;;  %2754 = vmatprep.subr.bf16.mxu0 %v7971_v31  ;;  %v4245_v36 = vsel %vm9289_vm10, %v7385_v20, %v4244_v25  ;;  %v7984_v31 = vld [vmem:[#allocation11 + $0x460] ss:$16 sps:$4 sm:$0xff]   ;;  %v5451_v20 = vld [vmem:[#allocation2 + $0x98] sm:$0x11] }
 0x273   :  { %v9365_v17 = vcombine.high %v4241_v37, %v4245_v36  ;;  %v9367_v28 = vcombine.low %v4241_v37, %v4245_v36  ;;  %v5453_v25 = vld [vmem:[#allocation2 + $0x90] sm:$0x11]  ;;  %v7602_v37 = vrot.slane %v6172_v53, 9  ;;  %v6198_v36 = vrot.slane %v5451_v20, 5 }
 0x274   :  { %2682 = vmatpush1.bf16.msra.mxu1 %v7966_v43  ;;  %2755 = vmatpush1.bf16.msra.mxu0 %v7969_v44  ;;  %v7992_v43 = vld [vmem:[#allocation11 + $0x444] ss:$16 sps:$4 sm:$0xff]   ;;  %v7995_v44 = vld [vmem:[#allocation11 + $0x44c] ss:$16 sps:$4 sm:$0xff]  }
 0x275   :  { %2683 = vmatprep.subr.bf16.mxu1 %v7974_v60  ;;  %2756 = vmatprep.subr.bf16.mxu0 %v7977_v61  ;;  %10395 = vst [vmem:[#allocation17_spill] sm:$0xff] %v9365_v17  ;;  %10396 = vst [vmem:[#allocation18_spill] sm:$0xff] %v9367_v28  ;;  %v8001_v60 = vld [vmem:[#allocation11 + $0x42c] ss:$16 sps:$4 sm:$0xff]   ;;  %v9381_v61 = vsel %vm9289_vm10, %v7155_v47, %v2237_v51  ;;  %v6199_v49 = vsel %vm9289_vm10, %v7602_v37, %v6198_v36  ;;  %v8731_v28 = vld [vmem:[#allocation2 + $0xb8] sm:$0x11] }
 0x276   :  { %v8732_v17 = vld [vmem:[#allocation2 + $0x60] sm:$0x11] }
 0x277   :  { %2101 = vmatmul.mubr.bf16.gmra.mxu1 %v7084_v8  ;;  %2174 = vmatmul.mubr.bf16.gmra.mxu0 %v7084_v8  ;;  %v8019_v8 = vld [vmem:[#allocation11 + $0x5cc] ss:$16 sps:$4 sm:$0xff]  }
 0x278   :  { %2684 = vmatpush1.bf16.msra.mxu1 %v7972_v21  ;;  %2757 = vmatpush1.bf16.msra.mxu0 %v7975_v23  ;;  %v8011_v21 = vld [vmem:[#allocation11 + $0x5e8] ss:$16 sps:$4 sm:$0xff]   ;;  %v8016_v23 = vld [vmem:[#allocation11 + $0x5c4] ss:$16 sps:$4 sm:$0xff]  }
 0x279   :  { %2685 = vmatprep.subr.bf16.mxu1 %v7980_v29  ;;  %2758 = vmatprep.subr.bf16.mxu0 %v7983_v27  ;;  %v5455_v29 = vld [vmem:[#allocation2 + $0x70] sm:$0x11]  ;;  %v6174_v27 = vld [vmem:[#allocation2 + $0x18] sm:$0xee] }
 0x27a   :  { %2110 = vmatprep.mubr.bf16.mxu1 %v9317_v50  ;;  %2183 = vmatprep.mubr.bf16.mxu0 %v9317_v50  ;;  %v7154_v50 = vrot.slane %v2204_v41, 9  ;;  %v6176_v41 = vld [vmem:[#allocation2 + $0x78] sm:$0xee]  ;;  %v6206_v47 = vrot.slane %v5455_v29, 5 }
 0x27c   :  { %2686 = vmatpush1.bf16.msra.mxu1 %v7978_v38  ;;  %2759 = vmatpush1.bf16.msra.mxu0 %v7981_v39  ;;  %v7603_v38 = vrot.slane %v6173_v55, 9  ;;  %v6175_v39 = vld [vmem:[#allocation2 + $0x58] sm:$0xee] }
 0x27d   :  { %2687 = vmatprep.subr.bf16.mxu1 %v7986_v42  ;;  %2760 = vmatprep.subr.bf16.mxu0 %v7989_v40  ;;  %v8014_v42 = vld [vmem:[#allocation11 + $0x5c0] ss:$16 sps:$4 sm:$0xff]   ;;  %v8017_v40 = vld [vmem:[#allocation11 + $0x5c8] ss:$16 sps:$4 sm:$0xff]   ;;  %v7605_v48 = vrot.slane %v6175_v39, 9 }
 0x27f   :  { %2111 = vmatmul.mubr.bf16.gmra.mxu1 %v9328_v34  ;;  %2184 = vmatmul.mubr.bf16.gmra.mxu0 %v9328_v34  ;;  %v9377_v34 = vsel %vm9289_vm10, %v7154_v50, %v2233_v32  ;;  %v6202_v32 = vrot.slane %v5453_v25, 5  ;;  %v7604_v50 = vrot.slane %v6174_v27, 9 }
 0x280   :  { %2688 = vmatpush1.bf16.msra.mxu1 %v7984_v31  ;;  %2761 = vmatpush1.bf16.msra.mxu0 %v7987_v45  ;;  %v7163_v5 = vcombine.high %v9377_v34, %v9381_v61  ;;  %v5457_v31 = vld [vmem:[#allocation2 + $0x50] sm:$0x11]  ;;  %v5459_v45 = vld [vmem:[#allocation2 + $0x28] sm:$0x11] }
 0x281   :  { %2120 = vmatprep.mubr.bf16.mxu1 %v7089_v46  ;;  %2193 = vmatprep.mubr.bf16.mxu0 %v7089_v46  ;;  %v5463_v46 = vld [vmem:[#allocation2 + $0x60] sm:$0x11]  ;;  %v6203_v51 = vsel %vm9289_vm10, %v7603_v38, %v6202_v32  ;;  %v8040_v32 = vld [vmem:[#allocation11 + $0x544] ss:$16 sps:$4 sm:$0xff]  }
 0x282   :  { %2689 = vmatprep.subr.bf16.mxu1 %v7992_v43  ;;  %2762 = vmatprep.subr.bf16.mxu0 %v7995_v44  ;;  %v8025_v43 = vld [vmem:[#allocation11 + $0x5ac] ss:$16 sps:$4 sm:$0xff]   ;;  %v5461_v44 = vld [vmem:[#allocation2 + $0xb8] sm:$0x11]  ;;  %v6222_v25 = vrot.slane %v5463_v46, 5 }
 0x283   :  { %v8043_v46 = vld [vmem:[#allocation11 + $0x54c] ss:$16 sps:$4 sm:$0xff]  }
 0x284   :  { %2690 = vmatpush1.bf16.msra.mxu1 %v7990_v52  ;;  %2763 = vmatpush1.bf16.msra.mxu0 %v7993_v57  ;;  %v6210_v52 = vrot.slane %v5457_v31, 5  ;;  %v6177_v57 = vld [vmem:[#allocation2 + $0x40] sm:$0xee]  ;;  %v8029_v31 = vld [vmem:[#allocation11 + $0x588] ss:$16 sps:$4 sm:$0xff]  }
 0x285   :  { %2691 = vmatprep.subr.bf16.mxu1 %v7998_v59  ;;  %2764 = vmatprep.subr.bf16.mxu0 %v8001_v60  ;;  %v7606_v59 = vrot.slane %v6176_v41, 9  ;;  %v6214_v60 = vrot.slane %v5459_v45, 5  ;;  %v7607_v55 = vrot.slane %v6177_v57, 9  ;;  %v8047_v57 = vld [vmem:[#allocation11 + $0x528] ss:$16 sps:$4 sm:$0xff]  }
 0x287   :  { %2121 = vmatmul.mubr.bf16.gmra.mxu1 %v7088_v1  ;;  %2194 = vmatmul.mubr.bf16.gmra.mxu0 %v7088_v1  ;;  %v9393_v1 = vcombine.high %v6199_v49, %v6203_v51 }
 0x288   :  { %2692 = vmatpush1.bf16.msra.mxu1 %v7996_v0  ;;  %2765 = vmatpush1.bf16.msra.mxu0 %v7999_v2  ;;  %v5465_v0 = vld [vmem:[#allocation2 + $0x8] sm:$0x11]  ;;  %v9391_v2 = vcombine.low %v6199_v49, %v6203_v51  ;;  %v8049_v51 = vld [vmem:[#allocation11 + $0x52c] ss:$16 sps:$4 sm:$0xff]  }
 0x289   :  { %2693 = vmatprep.subr.bf16.mxu1 %v8004_v6  ;;  %2766 = vmatprep.subr.bf16.mxu0 %v8007_v10  ;;  %10398 = vst [vmem:[#allocation20_spill] sm:$0xff] %v9393_v1  ;;  %v6207_v6 = vsel %vm9289_vm10, %v7604_v50, %v6206_v47  ;;  %v6178_v10 = vld [vmem:[#allocation2 + $0xa0] sm:$0xee]  ;;  %v6226_v27 = vrot.slane %v5465_v0, 5  ;;  %v8035_v49 = vld [vmem:[#allocation11 + $0x568] ss:$16 sps:$4 sm:$0xff]  }
 0x28a   :  { %2711 = vmatprep.mubr.bf16.mxu1 %v7163_v5  ;;  %2784 = vmatprep.mubr.bf16.mxu0 %v7163_v5  ;;  %10397 = vst [vmem:[#allocation19_spill] sm:$0xff] %v9391_v2  ;;  %v6179_v5 = vld [vmem:[#allocation2 + $0x88] sm:$0xee]  ;;  %v8038_v50 = vld [vmem:[#allocation11 + $0x540] ss:$16 sps:$4 sm:$0xff]  }
 0x28b   :  { %v7609_v29 = vrot.slane %v6179_v5, 9  ;;  %v8041_v47 = vld [vmem:[#allocation11 + $0x548] ss:$16 sps:$4 sm:$0xff]   ;;  %v8050_v0 = vld [vmem:[#allocation11 + $0x500] ss:$16 sps:$4 sm:$0xff]  }
 0x28c   :  { %2694 = vmatpush1.bf16.msra.mxu1 %v8002_v11  ;;  %2767 = vmatpush1.bf16.msra.mxu0 %v8005_v12  ;;  %v8020_v11 = vld [vmem:[#allocation11 + $0x5a0] ss:$16 sps:$4 sm:$0xff]   ;;  %v6211_v12 = vsel %vm9289_vm10, %v7605_v48, %v6210_v52  ;;  %v8046_v48 = vld [vmem:[#allocation11 + $0x524] ss:$16 sps:$4 sm:$0xff]   ;;  %v8061_v5 = vld [vmem:[#allocation11 + $0x6ec] ss:$16 sps:$4 sm:$0xff]  }
 0x28d   :  { %2695 = vmatprep.subr.bf16.mxu1 %v8010_v13  ;;  %2768 = vmatprep.subr.bf16.mxu0 %v8013_v14  ;;  %v6215_v13 = vsel %vm9289_vm10, %v7606_v59, %v6214_v60  ;;  %v8023_v14 = vld [vmem:[#allocation11 + $0x5a8] ss:$16 sps:$4 sm:$0xff]   ;;  %v9401_v20 = vcombine.low %v6207_v6, %v6211_v12  ;;  %v9403_v53 = vcombine.high %v6207_v6, %v6211_v12  ;;  %v8044_v52 = vld [vmem:[#allocation11 + $0x520] ss:$16 sps:$4 sm:$0xff]   ;;  %v8052_v59 = vld [vmem:[#allocation11 + $0x504] ss:$16 sps:$4 sm:$0xff]  }
 0x28e   :  { %v8055_v60 = vld [vmem:[#allocation11 + $0x50c] ss:$16 sps:$4 sm:$0xff]   ;;  %v8053_v6 = vld [vmem:[#allocation11 + $0x508] ss:$16 sps:$4 sm:$0xff]  }
 0x28f   :  { %10399 = vst [vmem:[#allocation21_spill] sm:$0xff] %v9401_v20  ;;  %10400 = vst [vmem:[#allocation22_spill] sm:$0xff] %v9403_v53  ;;  %v2209_v12 = vld [vmem:[#allocation2 + $0x20] sm:$0xee]  ;;  %v8729_v2 = vld [vmem:[#allocation2 + $0xb0] sm:$0x11] }
 0x290   :  { %2696 = vmatpush2.bf16.msra.mxu1 %v8008_v15  ;;  %2769 = vmatpush2.bf16.msra.mxu0 %v8011_v21  ;;  %v8028_v15 = vld [vmem:[#allocation11 + $0x584] ss:$16 sps:$4 sm:$0xff]   ;;  %v6218_v21 = vrot.slane %v5461_v44, 5  ;;  %v8032_v44 = vld [vmem:[#allocation11 + $0x560] ss:$16 sps:$4 sm:$0xff]   ;;  %v3550_v1 = vshll.u32 %v8729_v2, 16 }
 0x291   :  { %2697 = vmatprep.subr.bf16.mxu1 %v8016_v23  ;;  %2770 = vmatprep.subr.bf16.mxu0 %v8019_v8  ;;  %v8031_v23 = vld [vmem:[#allocation11 + $0x58c] ss:$16 sps:$4 sm:$0xff]   ;;  %v7608_v8 = vrot.slane %v6178_v10, 9  ;;  %v8058_v10 = vld [vmem:[#allocation11 + $0x6e4] ss:$16 sps:$4 sm:$0xff]  }
 0x292   :  { %v6219_v37 = vsel %vm9289_vm10, %v7607_v55, %v6218_v21  ;;  %v2249_v21 = vrot.slane %v9180_v3, 5 }
 0x293   :  { %v9407_v36 = vcombine.low %v6215_v13, %v6219_v37  ;;  %v9409_v38 = vcombine.high %v6215_v13, %v6219_v37  ;;  %v6223_v39 = vsel %vm9289_vm10, %v7608_v8, %v6222_v25  ;;  %v7162_v13 = vcombine.low %v9377_v34, %v9381_v61  ;;  %v8064_v25 = vld [vmem:[#allocation11 + $0x6c4] ss:$16 sps:$4 sm:$0xff]   ;;  %v8062_v34 = vld [vmem:[#allocation11 + $0x6c0] ss:$16 sps:$4 sm:$0xff]   ;;  %v8065_v61 = vld [vmem:[#allocation11 + $0x6c8] ss:$16 sps:$4 sm:$0xff]  }
 0x294   :  { %2698 = vmatpush2.bf16.msra.mxu1 %v8014_v42  ;;  %2771 = vmatpush2.bf16.msra.mxu0 %v8017_v40  ;;  %v6227_v42 = vsel %vm9289_vm10, %v7609_v29, %v6226_v27  ;;  %v8026_v40 = vld [vmem:[#allocation11 + $0x580] ss:$16 sps:$4 sm:$0xff]   ;;  %v2253_v8 = vrot.slane %v9187_v19, 5  ;;  %v8067_v29 = vld [vmem:[#allocation11 + $0x6cc] ss:$16 sps:$4 sm:$0xff]  }
 0x295   :  { %2699 = vmatprep.subr.bf16.mxu1 %v8022_v26  ;;  %2772 = vmatprep.subr.bf16.mxu0 %v8025_v43  ;;  %10401 = vst [vmem:[#allocation23_spill] sm:$0xff] %v9407_v36  ;;  %10402 = vst [vmem:[#allocation24_spill] sm:$0xff] %v9409_v38  ;;  %v9415_v45 = vcombine.low %v6223_v39, %v6227_v42  ;;  %v9417_v41 = vcombine.high %v6223_v39, %v6227_v42  ;;  %v8034_v26 = vld [vmem:[#allocation11 + $0x564] ss:$16 sps:$4 sm:$0xff]   ;;  %v8037_v43 = vld [vmem:[#allocation11 + $0x56c] ss:$16 sps:$4 sm:$0xff]  }
 0x296   :  { %v8070_v19 = vld [vmem:[#allocation11 + $0x6a4] ss:$16 sps:$4 sm:$0xff]   ;;  %v8073_v37 = vld [vmem:[#allocation11 + $0x6ac] ss:$16 sps:$4 sm:$0xff]   ;;  %v8068_v42 = vld [vmem:[#allocation11 + $0x6a0] ss:$16 sps:$4 sm:$0xff]  }
 0x297   :  { %10403 = vst [vmem:[#allocation25_spill] sm:$0xff] %v9415_v45  ;;  %10404 = vst [vmem:[#allocation26_spill] sm:$0xff] %v9417_v41  ;;  %v8249_v45 = vld [vmem:[#allocation11 + $0x90c] ss:$16 sps:$4 sm:$0xff]  }
 0x298   :  { %2700 = vmatpush2.bf16.msra.mxu1 %v8020_v11  ;;  %2773 = vmatpush2.bf16.msra.mxu0 %v8023_v14  ;;  %v2208_v11 = vld [vmem:[#allocation2 + $0x80] sm:$0xee] }
 0x299   :  { %2701 = vmatprep.subr.bf16.mxu1 %v8028_v15  ;;  %2774 = vmatprep.subr.bf16.mxu0 %v8031_v23  ;;  %v8056_v14 = vld [vmem:[#allocation11 + $0x6e0] ss:$16 sps:$4 sm:$0xff]   ;;  %v8059_v15 = vld [vmem:[#allocation11 + $0x6e8] ss:$16 sps:$4 sm:$0xff]   ;;  %v7158_v55 = vrot.slane %v2208_v11, 9  ;;  %v7159_v23 = vrot.slane %v2209_v12, 9 }
 0x29a   :  { %v8106_v11 = vld [vmem:[#allocation11 + $0x7e4] ss:$16 sps:$4 sm:$0xff]   ;;  %v8109_v12 = vld [vmem:[#allocation11 + $0x7ec] ss:$16 sps:$4 sm:$0xff]  }
 0x29b   :  { %v2250_v27 = vsel %vm9289_vm10, %v7158_v55, %v2249_v21  ;;  %v2254_v3 = vsel %vm9289_vm10, %v7159_v23, %v2253_v8  ;;  %v8115_v55 = vld [vmem:[#allocation11 + $0x7cc] ss:$16 sps:$4 sm:$0xff]   ;;  %v8113_v21 = vld [vmem:[#allocation11 + $0x7c8] ss:$16 sps:$4 sm:$0xff]   ;;  %v8118_v23 = vld [vmem:[#allocation11 + $0x7a4] ss:$16 sps:$4 sm:$0xff]  }
 0x29c   :  { %2702 = vmatpush2.bf16.msra.mxu1 %v8026_v40  ;;  %2775 = vmatpush2.bf16.msra.mxu0 %v8029_v31  ;;  %v7167_v39 = vcombine.high %v2250_v27, %v2254_v3  ;;  %v8071_v40 = vld [vmem:[#allocation11 + $0x6a8] ss:$16 sps:$4 sm:$0xff]   ;;  %v8079_v31 = vld [vmem:[#allocation11 + $0x68c] ss:$16 sps:$4 sm:$0xff]  }
 0x29d   :  { %2703 = vmatprep.subr.bf16.mxu1 %v8034_v26  ;;  %2776 = vmatprep.subr.bf16.mxu0 %v8037_v43  ;;  %v8077_v26 = vld [vmem:[#allocation11 + $0x688] ss:$16 sps:$4 sm:$0xff]   ;;  %v8082_v43 = vld [vmem:[#allocation11 + $0x664] ss:$16 sps:$4 sm:$0xff]   ;;  %v8121_v8 = vld [vmem:[#allocation11 + $0x7ac] ss:$16 sps:$4 sm:$0xff]  }
 0x2a0   :  { %2704 = vmatpush2.bf16.msra.mxu1 %v8032_v44  ;;  %2777 = vmatpush2.bf16.msra.mxu0 %v8035_v49  ;;  %v8085_v44 = vld [vmem:[#allocation11 + $0x66c] ss:$16 sps:$4 sm:$0xff]   ;;  %v7166_v49 = vcombine.low %v2250_v27, %v2254_v3  ;;  %v8122_v27 = vld [vmem:[#allocation11 + $0x780] ss:$16 sps:$4 sm:$0xff]   ;;  %v8125_v3 = vld [vmem:[#allocation11 + $0x788] ss:$16 sps:$4 sm:$0xff]  }
 0x2a1   :  { %2705 = vmatprep.subr.bf16.mxu1 %v8040_v32  ;;  %2778 = vmatprep.subr.bf16.mxu0 %v8043_v46  ;;  %v8080_v32 = vld [vmem:[#allocation11 + $0x660] ss:$16 sps:$4 sm:$0xff]   ;;  %v8083_v46 = vld [vmem:[#allocation11 + $0x668] ss:$16 sps:$4 sm:$0xff]  }
 0x2a4   :  { %2706 = vmatpush2.bf16.msra.mxu1 %v8038_v50  ;;  %2779 = vmatpush2.bf16.msra.mxu0 %v8041_v47  ;;  %v8088_v50 = vld [vmem:[#allocation11 + $0x644] ss:$16 sps:$4 sm:$0xff]   ;;  %v8091_v47 = vld [vmem:[#allocation11 + $0x64c] ss:$16 sps:$4 sm:$0xff]  }
 0x2a5   :  { %2707 = vmatprep.subr.bf16.mxu1 %v8046_v48  ;;  %2780 = vmatprep.subr.bf16.mxu0 %v8049_v51  ;;  %v8089_v48 = vld [vmem:[#allocation11 + $0x648] ss:$16 sps:$4 sm:$0xff]   ;;  %v8094_v51 = vld [vmem:[#allocation11 + $0x624] ss:$16 sps:$4 sm:$0xff]  }
 0x2a8   :  { %2708 = vmatpush2.bf16.msra.mxu1 %v8044_v52  ;;  %2781 = vmatpush2.bf16.msra.mxu0 %v8047_v57  ;;  %v8097_v52 = vld [vmem:[#allocation11 + $0x62c] ss:$16 sps:$4 sm:$0xff]   ;;  %v9433_v57 = vld [vmem:[#allocation2 + $0x38] sm:$0xff] }
 0x2a9   :  { %2709 = vmatprep.subr.bf16.mxu1 %v8052_v59  ;;  %2782 = vmatprep.subr.bf16.mxu0 %v8055_v60  ;;  %v8092_v59 = vld [vmem:[#allocation11 + $0x620] ss:$16 sps:$4 sm:$0xff]   ;;  %v8095_v60 = vld [vmem:[#allocation11 + $0x628] ss:$16 sps:$4 sm:$0xff]  }
 0x2ac   :  { %2710 = vmatpush2.bf16.msra.mxu1 %v8050_v0  ;;  %2783 = vmatpush2.bf16.msra.mxu0 %v8053_v6  ;;  %v7235_v0 = vcombine.high %v9313_v58, %v9433_v57  ;;  %v8103_v6 = vld [vmem:[#allocation11 + $0x60c] ss:$16 sps:$4 sm:$0xff]  }
 0x2ad   :  { %3290 = vmatprep.subr.bf16.mxu1 %v8058_v10  ;;  %3363 = vmatprep.subr.bf16.mxu0 %v8061_v5  ;;  %v8098_v10 = vld [vmem:[#allocation11 + $0x600] ss:$16 sps:$4 sm:$0xff]   ;;  %v8101_v5 = vld [vmem:[#allocation11 + $0x608] ss:$16 sps:$4 sm:$0xff]  }
 0x2af   :  { %2712 = vmatmul.mubr.bf16.vlgmr.msra.gmra.mxu1 %v7162_v13  ;;  %2785 = vmatmul.mubr.bf16.vlgmr.msra.gmra.mxu0 %v7162_v13  ;;  %v8104_v13 = vld [vmem:[#allocation11 + $0x7e0] ss:$16 sps:$4 sm:$0xff]  }
 0x2b0   :  { %2721 = vmatprep.mubr.bf16.mxu1 %v9297_v4  ;;  %2794 = vmatprep.mubr.bf16.mxu0 %v9297_v4  ;;  %v8076_v4 = vld [vmem:[#allocation11 + $0x684] ss:$16 sps:$4 sm:$0xff]  }
 0x2b1   :  { %3291 = vmatpush1.bf16.msra.mxu1 %v8056_v14  ;;  %3364 = vmatpush1.bf16.msra.mxu0 %v8059_v15  ;;  %v8107_v14 = vld [vmem:[#allocation11 + $0x7e8] ss:$16 sps:$4 sm:$0xff]   ;;  %v8112_v15 = vld [vmem:[#allocation11 + $0x7c4] ss:$16 sps:$4 sm:$0xff]  }
 0x2b2   :  { %3292 = vmatprep.subr.bf16.mxu1 %v8064_v25  ;;  %3365 = vmatprep.subr.bf16.mxu0 %v8067_v29  ;;  %v8116_v25 = vld [vmem:[#allocation11 + $0x7a0] ss:$16 sps:$4 sm:$0xff]   ;;  %v8119_v29 = vld [vmem:[#allocation11 + $0x7a8] ss:$16 sps:$4 sm:$0xff]  }
 0x2b5   :  { %3293 = vmatpush1.bf16.msra.mxu1 %v8062_v34  ;;  %3366 = vmatpush1.bf16.msra.mxu0 %v8065_v61  ;;  %v8124_v34 = vld [vmem:[#allocation11 + $0x784] ss:$16 sps:$4 sm:$0xff]   ;;  %v8127_v61 = vld [vmem:[#allocation11 + $0x78c] ss:$16 sps:$4 sm:$0xff]  }
 0x2b6   :  { %3294 = vmatprep.subr.bf16.mxu1 %v8070_v19  ;;  %3367 = vmatprep.subr.bf16.mxu0 %v8073_v37  ;;  %v8130_v19 = vld [vmem:[#allocation11 + $0x764] ss:$16 sps:$4 sm:$0xff]   ;;  %v8133_v37 = vld [vmem:[#allocation11 + $0x76c] ss:$16 sps:$4 sm:$0xff]  }
 0x2b7   :  { %2722 = vmatmul.mubr.bf16.gmra.mxu1 %v9299_v9  ;;  %2795 = vmatmul.mubr.bf16.gmra.mxu0 %v9299_v9  ;;  %v8086_v9 = vld [vmem:[#allocation11 + $0x640] ss:$16 sps:$4 sm:$0xff]  }
 0x2b8   :  { %2731 = vmatprep.mubr.bf16.mxu1 %v7167_v39  ;;  %2804 = vmatprep.mubr.bf16.mxu0 %v7167_v39  ;;  %v8128_v39 = vld [vmem:[#allocation11 + $0x760] ss:$16 sps:$4 sm:$0xff]  }
 0x2b9   :  { %3295 = vmatpush1.bf16.msra.mxu1 %v8068_v42  ;;  %3368 = vmatpush1.bf16.msra.mxu0 %v8071_v40  ;;  %v8131_v42 = vld [vmem:[#allocation11 + $0x768] ss:$16 sps:$4 sm:$0xff]   ;;  %v8136_v40 = vld [vmem:[#allocation11 + $0x744] ss:$16 sps:$4 sm:$0xff]  }
 0x2ba   :  { %3296 = vmatprep.subr.bf16.mxu1 %v8076_v4  ;;  %3369 = vmatprep.subr.bf16.mxu0 %v8079_v31  ;;  %v8139_v4 = vld [vmem:[#allocation11 + $0x74c] ss:$16 sps:$4 sm:$0xff]   ;;  %v8134_v31 = vld [vmem:[#allocation11 + $0x740] ss:$16 sps:$4 sm:$0xff]  }
 0x2bd   :  { %3297 = vmatpush1.bf16.msra.mxu1 %v8074_v63  ;;  %3370 = vmatpush1.bf16.msra.mxu0 %v8077_v26  ;;  %v8137_v63 = vld [vmem:[#allocation11 + $0x748] ss:$16 sps:$4 sm:$0xff]   ;;  %v8142_v26 = vld [vmem:[#allocation11 + $0x724] ss:$16 sps:$4 sm:$0xff]  }
 0x2be   :  { %3298 = vmatprep.subr.bf16.mxu1 %v8082_v43  ;;  %3371 = vmatprep.subr.bf16.mxu0 %v8085_v44  ;;  %v8145_v43 = vld [vmem:[#allocation11 + $0x72c] ss:$16 sps:$4 sm:$0xff]   ;;  %v8140_v44 = vld [vmem:[#allocation11 + $0x720] ss:$16 sps:$4 sm:$0xff]  }
 0x2bf   :  { %2732 = vmatmul.mubr.bf16.gmra.mxu1 %v7166_v49  ;;  %2805 = vmatmul.mubr.bf16.gmra.mxu0 %v7166_v49  ;;  %v8143_v49 = vld [vmem:[#allocation11 + $0x728] ss:$16 sps:$4 sm:$0xff]  }
 0x2c0   :  { %2741 = vmatprep.mubr.bf16.mxu1 %v9309_v18  ;;  %2814 = vmatprep.mubr.bf16.mxu0 %v9309_v18  ;;  %v8100_v18 = vld [vmem:[#allocation11 + $0x604] ss:$16 sps:$4 sm:$0xff]  }
 0x2c1   :  { %3299 = vmatpush1.bf16.msra.mxu1 %v8080_v32  ;;  %3372 = vmatpush1.bf16.msra.mxu0 %v8083_v46  ;;  %v8148_v32 = vld [vmem:[#allocation11 + $0x704] ss:$16 sps:$4 sm:$0xff]   ;;  %v8151_v46 = vld [vmem:[#allocation11 + $0x70c] ss:$16 sps:$4 sm:$0xff]  }
 0x2c2   :  { %3300 = vmatprep.subr.bf16.mxu1 %v8088_v50  ;;  %3373 = vmatprep.subr.bf16.mxu0 %v8091_v47  ;;  %v8146_v50 = vld [vmem:[#allocation11 + $0x700] ss:$16 sps:$4 sm:$0xff]   ;;  %v8149_v47 = vld [vmem:[#allocation11 + $0x708] ss:$16 sps:$4 sm:$0xff]  }
 0x2c5   :  { %3301 = vmatpush1.bf16.msra.mxu1 %v8086_v9  ;;  %3374 = vmatpush1.bf16.msra.mxu0 %v8089_v48  ;;  %v8154_v9 = vld [vmem:[#allocation11 + $0x8e4] ss:$16 sps:$4 sm:$0xff]   ;;  %v8157_v48 = vld [vmem:[#allocation11 + $0x8ec] ss:$16 sps:$4 sm:$0xff]  }
 0x2c6   :  { %3302 = vmatprep.subr.bf16.mxu1 %v8094_v51  ;;  %3375 = vmatprep.subr.bf16.mxu0 %v8097_v52  ;;  %v9439_v51 = vld [vmem:[#allocation2 + $0x48] sm:$0xff]  ;;  %v9441_v52 = vld [vmem:[#allocation2 + $0x18] sm:$0xff] }
 0x2c7   :  { %2742 = vmatmul.mubr.bf16.gmra.mxu1 %v9311_v16  ;;  %2815 = vmatmul.mubr.bf16.gmra.mxu0 %v9311_v16  ;;  %v8110_v16 = vld [vmem:[#allocation11 + $0x7c0] ss:$16 sps:$4 sm:$0xff]  }
 0x2c8   :  { %3322 = vmatprep.mubr.bf16.mxu1 %v7235_v0  ;;  %3395 = vmatprep.mubr.bf16.mxu0 %v7235_v0  ;;  %v8155_v0 = vld [vmem:[#allocation11 + $0x8e8] ss:$16 sps:$4 sm:$0xff]  }
 0x2c9   :  { %3303 = vmatpush1.bf16.msra.mxu1 %v8092_v59  ;;  %3376 = vmatpush1.bf16.msra.mxu0 %v8095_v60  ;;  %v7234_v59 = vcombine.low %v9313_v58, %v9433_v57  ;;  %v8152_v60 = vld [vmem:[#allocation11 + $0x8e0] ss:$16 sps:$4 sm:$0xff]  }
 0x2ca   :  { %3304 = vmatprep.subr.bf16.mxu1 %v8100_v18  ;;  %3377 = vmatprep.subr.bf16.mxu0 %v8103_v6  ;;  %v7237_v18 = vcombine.high %v9439_v51, %v9441_v52  ;;  %v8161_v6 = vld [vmem:[#allocation11 + $0x8c4] ss:$16 sps:$4 sm:$0xff]  }
 0x2cd   :  { %3305 = vmatpush1.bf16.msra.mxu1 %v8098_v10  ;;  %3378 = vmatpush1.bf16.msra.mxu0 %v8101_v5  ;;  %v8164_v10 = vld [vmem:[#allocation11 + $0x8cc] ss:$16 sps:$4 sm:$0xff]   ;;  %v8159_v5 = vld [vmem:[#allocation11 + $0x8c0] ss:$16 sps:$4 sm:$0xff]  }
 0x2ce   :  { %3306 = vmatprep.subr.bf16.mxu1 %v8106_v11  ;;  %3379 = vmatprep.subr.bf16.mxu0 %v8109_v12  ;;  %v8162_v11 = vld [vmem:[#allocation11 + $0x8c8] ss:$16 sps:$4 sm:$0xff]   ;;  %v8168_v12 = vld [vmem:[#allocation11 + $0x8a4] ss:$16 sps:$4 sm:$0xff]  }
 0x2d1   :  { %3307 = vmatpush2.bf16.msra.mxu1 %v8104_v13  ;;  %3380 = vmatpush2.bf16.msra.mxu0 %v8107_v14  ;;  %v8171_v13 = vld [vmem:[#allocation11 + $0x8ac] ss:$16 sps:$4 sm:$0xff]   ;;  %v9447_v14 = vld [vmem:[#allocation2 + $0x78] sm:$0xff] }
 0x2d2   :  { %3308 = vmatprep.subr.bf16.mxu1 %v8112_v15  ;;  %3381 = vmatprep.subr.bf16.mxu0 %v8115_v55  ;;  %v3485_v15 = vshrl.u32 %v9313_v58, 16  ;;  %v3488_v55 = vshll.u32 %v9313_v58, 16 }
 0x2d5   :  { %3309 = vmatpush2.bf16.msra.mxu1 %v8110_v16  ;;  %3382 = vmatpush2.bf16.msra.mxu0 %v8113_v21  ;;  %v3499_v16 = vshrl.u32 %v9433_v57, 16  ;;  %v3502_v21 = vshll.u32 %v9433_v57, 16 }
 0x2d6   :  { %3310 = vmatprep.subr.bf16.mxu1 %v8118_v23  ;;  %3383 = vmatprep.subr.bf16.mxu0 %v8121_v8  ;;  %v7236_v23 = vcombine.low %v9439_v51, %v9441_v52  ;;  %v8166_v8 = vld [vmem:[#allocation11 + $0x8a0] ss:$16 sps:$4 sm:$0xff]  }
 0x2d7   :  { %v3504_v57 = vrot.slane %v3502_v21, 5  ;;  %v9484_v21 = vpop.f32.mrf.mxu0 }
 0x2d9   :  { %3311 = vmatpush2.bf16.msra.mxu1 %v8116_v25  ;;  %3384 = vmatpush2.bf16.msra.mxu0 %v8119_v29  ;;  %v8169_v25 = vld [vmem:[#allocation11 + $0x8a8] ss:$16 sps:$4 sm:$0xff]   ;;  %v7239_v29 = vcombine.high %v9313_v58, %v9447_v14 }
 0x2da   :  { %3312 = vmatprep.subr.bf16.mxu1 %v8124_v34  ;;  %3385 = vmatprep.subr.bf16.mxu0 %v8127_v61  ;;  %v8174_v34 = vld [vmem:[#allocation11 + $0x884] ss:$16 sps:$4 sm:$0xff]   ;;  %v8177_v61 = vld [vmem:[#allocation11 + $0x88c] ss:$16 sps:$4 sm:$0xff]  }
 0x2dd   :  { %3313 = vmatpush2.bf16.msra.mxu1 %v8122_v27  ;;  %3386 = vmatpush2.bf16.msra.mxu0 %v8125_v3  ;;  %v3487_v27 = vrot.slane %v3485_v15, 4  ;;  %v3490_v3 = vrot.slane %v3488_v55, 5  ;;  %v8198_v15 = vld [vmem:[#allocation11 + $0x804] ss:$16 sps:$4 sm:$0xff]   ;;  %v8201_v55 = vld [vmem:[#allocation11 + $0x80c] ss:$16 sps:$4 sm:$0xff]  }
 0x2de   :  { %3314 = vmatprep.subr.bf16.mxu1 %v8130_v19  ;;  %3387 = vmatprep.subr.bf16.mxu0 %v8133_v37  ;;  %v3501_v19 = vrot.slane %v3499_v16, 4  ;;  %v8172_v37 = vld [vmem:[#allocation11 + $0x880] ss:$16 sps:$4 sm:$0xff]   ;;  %v9482_v16 = vpop.f32.mrf.mxu1 }
 0x2e1   :  { %3315 = vmatpush2.bf16.msra.mxu1 %v8128_v39  ;;  %3388 = vmatpush2.bf16.msra.mxu0 %v8131_v42  ;;  %v8175_v39 = vld [vmem:[#allocation11 + $0x888] ss:$16 sps:$4 sm:$0xff]   ;;  %v8180_v42 = vld [vmem:[#allocation11 + $0x864] ss:$16 sps:$4 sm:$0xff]  }
 0x2e2   :  { %3316 = vmatprep.subr.bf16.mxu1 %v8136_v40  ;;  %3389 = vmatprep.subr.bf16.mxu0 %v8139_v4  ;;  %v8183_v40 = vld [vmem:[#allocation11 + $0x86c] ss:$16 sps:$4 sm:$0xff]  }
 0x2e3   :  { %v9457_v4 = vld [vmem:[#allocation2 + $0x40] sm:$0xff] }
 0x2e5   :  { %3317 = vmatpush2.bf16.msra.mxu1 %v8134_v31  ;;  %3390 = vmatpush2.bf16.msra.mxu0 %v8137_v63  ;;  %v9459_v31 = vld [vmem:[#allocation2 + $0xa0] sm:$0xff]  ;;  %v3491_v63 = vor.u32 %v3490_v3, %v3487_v27  ;;  %v8205_v3 = vld [vmem:[#allocation11 + $0x9e8] ss:$16 sps:$4 sm:$0xff]  }
 0x2e6   :  { %3318 = vmatprep.subr.bf16.mxu1 %v8142_v26  ;;  %3391 = vmatprep.subr.bf16.mxu0 %v8145_v43  ;;  %v3494_v26 = vshll.u32 %v9319_v7, 16  ;;  %v3505_v43 = vor.u32 %v3504_v57, %v3501_v19  ;;  %v8202_v27 = vld [vmem:[#allocation11 + $0x9e0] ss:$16 sps:$4 sm:$0xff]   ;;  %v8210_v19 = vld [vmem:[#allocation11 + $0x9c4] ss:$16 sps:$4 sm:$0xff]  }
 0x2e7   :  { %v9467_v7 = vrot.slane %v3491_v63, 4  ;;  %v8213_v57 = vld [vmem:[#allocation11 + $0x9cc] ss:$16 sps:$4 sm:$0xff]   ;;  %v8216_v63 = vld [vmem:[#allocation11 + $0x9a4] ss:$16 sps:$4 sm:$0xff]  }
 0x2e9   :  { %3319 = vmatpush2.bf16.msra.mxu1 %v8140_v44  ;;  %3392 = vmatpush2.bf16.msra.mxu0 %v8143_v49  ;;  %v7238_v44 = vcombine.low %v9313_v58, %v9447_v14  ;;  %v8178_v49 = vld [vmem:[#allocation11 + $0x860] ss:$16 sps:$4 sm:$0xff]  }
 0x2ea   :  { %3320 = vmatprep.subr.bf16.mxu1 %v8148_v32  ;;  %3393 = vmatprep.subr.bf16.mxu0 %v8151_v46  ;;  %v8181_v32 = vld [vmem:[#allocation11 + $0x868] ss:$16 sps:$4 sm:$0xff]   ;;  %v3508_v46 = vshll.u32 %v9324_v22, 16  ;;  %v8184_v58 = vld [vmem:[#allocation11 + $0x840] ss:$16 sps:$4 sm:$0xff]  }
 0x2ec   :  { %v3510_v22 = vrot.slane %v3508_v46, 5 }
 0x2ed   :  { %3321 = vmatpush2.bf16.msra.mxu1 %v8146_v50  ;;  %3394 = vmatpush2.bf16.msra.mxu0 %v8149_v47  ;;  %v7241_v50 = vcombine.high %v9457_v4, %v9459_v31  ;;  %v8186_v47 = vld [vmem:[#allocation11 + $0x844] ss:$16 sps:$4 sm:$0xff]  }
 0x2ee   :  { %4012 = vmatprep.subr.bf16.mxu1 %v8154_v9  ;;  %4085 = vmatprep.subr.bf16.mxu0 %v8157_v48  ;;  %v8189_v9 = vld [vmem:[#allocation11 + $0x84c] ss:$16 sps:$4 sm:$0xff]   ;;  %v3496_v48 = vrot.slane %v3494_v26, 5 }
 0x2ef   :  { %v8219_v26 = vld [vmem:[#allocation11 + $0x9ac] ss:$16 sps:$4 sm:$0xff]  }
 0x2f0   :  { %3323 = vmatmul.mubr.bf16.vlgmr.msra.gmra.mxu1 %v7234_v59  ;;  %3396 = vmatmul.mubr.bf16.vlgmr.msra.gmra.mxu0 %v7234_v59  ;;  %v3506_v59 = vrot.slane %v3505_v43, 4 }
 0x2f1   :  { %3332 = vmatprep.mubr.bf16.mxu1 %v7237_v18  ;;  %3405 = vmatprep.mubr.bf16.mxu0 %v7237_v18  ;;  %v8195_v18 = vld [vmem:[#allocation11 + $0x82c] ss:$16 sps:$4 sm:$0xff]  }
 0x2f2   :  { %4013 = vmatpush1.bf16.msra.mxu1 %v8152_v60  ;;  %4086 = vmatpush1.bf16.msra.mxu0 %v8155_v0  ;;  %v8187_v60 = vld [vmem:[#allocation11 + $0x848] ss:$16 sps:$4 sm:$0xff]   ;;  %v8192_v0 = vld [vmem:[#allocation11 + $0x824] ss:$16 sps:$4 sm:$0xff]  }
 0x2f3   :  { %4014 = vmatprep.subr.bf16.mxu1 %v8161_v6  ;;  %4087 = vmatprep.subr.bf16.mxu0 %v8164_v10  ;;  %v9472_v6 = vsel %vm9090_vm2, %v9467_v7, %v3496_v48  ;;  %v9476_v10 = vsel %vm9090_vm2, %v3506_v59, %v3510_v22 }
 0x2f4   :  { %v7306_v2 = vcombine.low %v9472_v6, %v9476_v10 }
 0x2f6   :  { %4015 = vmatpush1.bf16.msra.mxu1 %v8159_v5  ;;  %4088 = vmatpush1.bf16.msra.mxu0 %v8162_v11  ;;  %v7240_v5 = vcombine.low %v9457_v4, %v9459_v31  ;;  %v8190_v11 = vld [vmem:[#allocation11 + $0x820] ss:$16 sps:$4 sm:$0xff]  }
 0x2f7   :  { %4016 = vmatprep.subr.bf16.mxu1 %v8168_v12  ;;  %4089 = vmatprep.subr.bf16.mxu0 %v8171_v13  ;;  %v8193_v12 = vld [vmem:[#allocation11 + $0x828] ss:$16 sps:$4 sm:$0xff]   ;;  %v7307_v13 = vcombine.high %v9472_v6, %v9476_v10 }
 0x2f8   :  { %3333 = vmatmul.mubr.bf16.gmra.mxu1 %v7236_v23  ;;  %3406 = vmatmul.mubr.bf16.gmra.mxu0 %v7236_v23  ;;  %v8196_v23 = vld [vmem:[#allocation11 + $0x800] ss:$16 sps:$4 sm:$0xff]  }
 0x2f9   :  { %3342 = vmatprep.mubr.bf16.mxu1 %v7239_v29  ;;  %3415 = vmatprep.mubr.bf16.mxu0 %v7239_v29  ;;  %v8207_v29 = vld [vmem:[#allocation11 + $0x9ec] ss:$16 sps:$4 sm:$0xff]  }
 0x2fa   :  { %4017 = vmatpush1.bf16.msra.mxu1 %v8166_v8  ;;  %4090 = vmatpush1.bf16.msra.mxu0 %v8169_v25  ;;  %v8199_v8 = vld [vmem:[#allocation11 + $0x808] ss:$16 sps:$4 sm:$0xff]   ;;  %v8204_v25 = vld [vmem:[#allocation11 + $0x9e4] ss:$16 sps:$4 sm:$0xff]  }
 0x2fb   :  { %4018 = vmatprep.subr.bf16.mxu1 %v8174_v34  ;;  %4091 = vmatprep.subr.bf16.mxu0 %v8177_v61  ;;  %v9486_v34 = vpop.f32.mrf.mxu1  ;;  %v9488_v61 = vpop.f32.mrf.mxu0 }
 0x2fe   :  { %4019 = vmatpush1.bf16.msra.mxu1 %v8172_v37  ;;  %4092 = vmatpush1.bf16.msra.mxu0 %v8175_v39  ;;  %v9490_v37 = vpop.f32.mrf.mxu1  ;;  %v9492_v39 = vpop.f32.mrf.mxu0 }
 0x2ff   :  { %4020 = vmatprep.subr.bf16.mxu1 %v8180_v42  ;;  %4093 = vmatprep.subr.bf16.mxu0 %v8183_v40  ;;  %v8208_v42 = vld [vmem:[#allocation11 + $0x9c0] ss:$16 sps:$4 sm:$0xff]   ;;  %v8211_v40 = vld [vmem:[#allocation11 + $0x9c8] ss:$16 sps:$4 sm:$0xff]  }
 0x300   :  { %3343 = vmatmul.mubr.bf16.gmra.mxu1 %v7238_v44  ;;  %3416 = vmatmul.mubr.bf16.gmra.mxu0 %v7238_v44  ;;  %v9494_v43 = vpop.f32.mrf.mxu1  ;;  %v9496_v44 = vpop.f32.mrf.mxu0 }
 0x301   :  { %3352 = vmatprep.mubr.bf16.mxu1 %v7241_v50  ;;  %3425 = vmatprep.mubr.bf16.mxu0 %v7241_v50  ;;  %10405 = vst [vmem:[#allocation27_spill] sm:$0xff] %v9494_v43  ;;  %10406 = vst [vmem:[#allocation28_spill] sm:$0xff] %v9496_v44  ;;  %v8267_v44 = vld [vmem:[#allocation11 + $0xaac] ss:$16 sps:$4 sm:$0xff]  }
 0x302   :  { %4021 = vmatpush1.bf16.msra.mxu1 %v8178_v49  ;;  %4094 = vmatpush1.bf16.msra.mxu0 %v8181_v32  ;;  %v8214_v49 = vld [vmem:[#allocation11 + $0x9a0] ss:$16 sps:$4 sm:$0xff]   ;;  %v8217_v32 = vld [vmem:[#allocation11 + $0x9a8] ss:$16 sps:$4 sm:$0xff]  }
 0x303   :  { %4022 = vmatprep.subr.bf16.mxu1 %v8186_v47  ;;  %4095 = vmatprep.subr.bf16.mxu0 %v8189_v9  ;;  %v8222_v47 = vld [vmem:[#allocation11 + $0x984] ss:$16 sps:$4 sm:$0xff]   ;;  %v8225_v9 = vld [vmem:[#allocation11 + $0x98c] ss:$16 sps:$4 sm:$0xff]  }
 0x306   :  { %4023 = vmatpush1.bf16.msra.mxu1 %v8184_v58  ;;  %4096 = vmatpush1.bf16.msra.mxu0 %v8187_v60  ;;  %v8220_v58 = vld [vmem:[#allocation11 + $0x980] ss:$16 sps:$4 sm:$0xff]   ;;  %v8223_v60 = vld [vmem:[#allocation11 + $0x988] ss:$16 sps:$4 sm:$0xff]  }
 0x307   :  { %4024 = vmatprep.subr.bf16.mxu1 %v8192_v0  ;;  %4097 = vmatprep.subr.bf16.mxu0 %v8195_v18  ;;  %v8228_v18 = vld [vmem:[#allocation11 + $0x964] ss:$16 sps:$4 sm:$0xff]  }
 0x308   :  { %3353 = vmatmul.mubr.bf16.gmra.mxu1 %v7240_v5  ;;  %3426 = vmatmul.mubr.bf16.gmra.mxu0 %v7240_v5  ;;  %v8231_v5 = vld [vmem:[#allocation11 + $0x96c] ss:$16 sps:$4 sm:$0xff]  }
 0x309   :  { %4044 = vmatprep.mubr.bf16.mxu1 %v7307_v13  ;;  %4117 = vmatprep.mubr.bf16.mxu0 %v7307_v13 }
 0x30a   :  { %4025 = vmatpush1.bf16.msra.mxu1 %v8190_v11  ;;  %4098 = vmatpush1.bf16.msra.mxu0 %v8193_v12  ;;  %v3513_v11 = vshrl.u32 %v9439_v51, 16  ;;  %v3516_v12 = vshll.u32 %v9439_v51, 16  ;;  %v8237_v51 = vld [vmem:[#allocation11 + $0x94c] ss:$16 sps:$4 sm:$0xff]  }
 0x30b   :  { %4026 = vmatprep.subr.bf16.mxu1 %v8198_v15  ;;  %4099 = vmatprep.subr.bf16.mxu0 %v8201_v55  ;;  %v3527_v55 = vshrl.u32 %v9441_v52, 16 }
 0x30e   :  { %4027 = vmatpush1.bf16.msra.mxu1 %v8196_v23  ;;  %4100 = vmatpush1.bf16.msra.mxu0 %v8199_v8  ;;  %v3530_v23 = vshll.u32 %v9441_v52, 16  ;;  %v8226_v8 = vld [vmem:[#allocation11 + $0x960] ss:$16 sps:$4 sm:$0xff]  }
 0x30f   :  { %4028 = vmatprep.subr.bf16.mxu1 %v8204_v25  ;;  %4101 = vmatprep.subr.bf16.mxu0 %v8207_v29  ;;  %v8229_v25 = vld [vmem:[#allocation11 + $0x968] ss:$16 sps:$4 sm:$0xff]  }
 0x310   :  { %v3532_v52 = vrot.slane %v3530_v23, 5  ;;  %v8238_v23 = vld [vmem:[#allocation11 + $0x920] ss:$16 sps:$4 sm:$0xff]  }
 0x312   :  { %4029 = vmatpush2.bf16.msra.mxu1 %v8202_v27  ;;  %4102 = vmatpush2.bf16.msra.mxu0 %v8205_v3  ;;  %v8234_v3 = vld [vmem:[#allocation11 + $0x944] ss:$16 sps:$4 sm:$0xff]  }
 0x313   :  { %4030 = vmatprep.subr.bf16.mxu1 %v8210_v19  ;;  %4103 = vmatprep.subr.bf16.mxu0 %v8213_v57  ;;  %v3515_v19 = vrot.slane %v3513_v11, 4  ;;  %v3518_v57 = vrot.slane %v3516_v12, 5 }
 0x316   :  { %4031 = vmatpush2.bf16.msra.mxu1 %v8208_v42  ;;  %4104 = vmatpush2.bf16.msra.mxu0 %v8211_v40 }
 0x317   :  { %4032 = vmatprep.subr.bf16.mxu1 %v8216_v63  ;;  %4105 = vmatprep.subr.bf16.mxu0 %v8219_v26  ;;  %v9498_v46 = vpop.f32.mrf.mxu1  ;;  %v9500_v50 = vpop.f32.mrf.mxu0  ;;  %v3529_v63 = vrot.slane %v3527_v55, 4  ;;  %v8232_v26 = vld [vmem:[#allocation11 + $0x940] ss:$16 sps:$4 sm:$0xff]  }
 0x319   :  { %v9502_v48 = vpop.f32.mrf.mxu1  ;;  %v9504_v59 = vpop.f32.mrf.mxu0  ;;  %v3533_v55 = vor.u32 %v3532_v52, %v3529_v63 }
 0x31a   :  { %4033 = vmatpush2.bf16.msra.mxu1 %v8214_v49  ;;  %4106 = vmatpush2.bf16.msra.mxu0 %v8217_v32  ;;  %v8235_v49 = vld [vmem:[#allocation11 + $0x948] ss:$16 sps:$4 sm:$0xff]  }
 0x31b   :  { %4034 = vmatprep.subr.bf16.mxu1 %v8222_v47  ;;  %4107 = vmatprep.subr.bf16.mxu0 %v8225_v9  ;;  %v9506_v22 = vpop.f32.mrf.mxu1  ;;  %v9508_v0 = vpop.f32.mrf.mxu0  ;;  %v8240_v9 = vld [vmem:[#allocation11 + $0x924] ss:$16 sps:$4 sm:$0xff]  }
 0x31d   :  { %v9512_v13 = vpop.f32.mrf.mxu1  ;;  %v9514_v15 = vpop.f32.mrf.mxu0 }
 0x31e   :  { %10407 = vst [vmem:[#allocation29_spill] sm:$0xff] %v9512_v13  ;;  %10408 = vst [vmem:[#allocation30_spill] sm:$0xff] %v9514_v15  ;;  %4035 = vmatpush2.bf16.msra.mxu1 %v8220_v58  ;;  %4108 = vmatpush2.bf16.msra.mxu0 %v8223_v60  ;;  %v8243_v58 = vld [vmem:[#allocation11 + $0x92c] ss:$16 sps:$4 sm:$0xff]   ;;  %v3519_v60 = vor.u32 %v3518_v57, %v3515_v19  ;;  %v8246_v57 = vld [vmem:[#allocation11 + $0x904] ss:$16 sps:$4 sm:$0xff]  }
 0x31f   :  { %4036 = vmatprep.subr.bf16.mxu1 %v8228_v18  ;;  %4109 = vmatprep.subr.bf16.mxu0 %v8231_v5  ;;  %v9518_v29 = vpop.f32.mrf.mxu1  ;;  %v9520_v27 = vpop.f32.mrf.mxu0  ;;  %v3555_v18 = vshrl.u32 %v9447_v14, 16  ;;  %v3558_v5 = vshll.u32 %v9447_v14, 16  ;;  %v8728_v14 = vld [vmem:[#allocation2 + $0x70] sm:$0x11]  ;;  %v8259_v15 = vld [vmem:[#allocation11 + $0xac8] ss:$16 sps:$4 sm:$0xff]  }
 0x320   :  { %v3536_v41 = vshll.u32 %v8728_v14, 16  ;;  %v3520_v36 = vrot.slane %v3519_v60, 4  ;;  %v8252_v14 = vld [vmem:[#allocation11 + $0xae4] ss:$16 sps:$4 sm:$0xff]   ;;  %v8255_v60 = vld [vmem:[#allocation11 + $0xaec] ss:$16 sps:$4 sm:$0xff]  }
 0x321   :  { %v9522_v42 = vpop.f32.mrf.mxu1  ;;  %v9524_v40 = vpop.f32.mrf.mxu0  ;;  %v3557_v38 = vrot.slane %v3555_v18, 4  ;;  %v3560_v20 = vrot.slane %v3558_v5, 5 }
 0x322   :  { %4037 = vmatpush2.bf16.msra.mxu1 %v8226_v8  ;;  %4110 = vmatpush2.bf16.msra.mxu0 %v8229_v25  ;;  %v8241_v8 = vld [vmem:[#allocation11 + $0x928] ss:$16 sps:$4 sm:$0xff]   ;;  %v8727_v25 = vld [vmem:[#allocation2 + $0x90] sm:$0x11]  ;;  %v3538_v18 = vrot.slane %v3536_v41, 5  ;;  %v3586_v41 = vshll.u32 %v9459_v31, 16 }
 0x323   :  { %4038 = vmatprep.subr.bf16.mxu1 %v8234_v3  ;;  %4111 = vmatprep.subr.bf16.mxu0 %v8237_v51  ;;  %v9526_v32 = vpop.f32.mrf.mxu1  ;;  %v9528_v47 = vpop.f32.mrf.mxu0  ;;  %v3522_v3 = vshll.u32 %v8727_v25, 16 }
 0x325   :  { %v9532_v11 = vpop.f32.mrf.mxu1  ;;  %v9534_v12 = vpop.f32.mrf.mxu0 }
 0x326   :  { %10409 = vst [vmem:[#allocation31_spill] sm:$0xff] %v9532_v11  ;;  %10410 = vst [vmem:[#allocation32_spill] sm:$0xff] %v9534_v12  ;;  %4039 = vmatpush2.bf16.msra.mxu1 %v8232_v26  ;;  %4112 = vmatpush2.bf16.msra.mxu0 %v8235_v49  ;;  %v3534_v26 = vrot.slane %v3533_v55, 4  ;;  %v8244_v49 = vld [vmem:[#allocation11 + $0x900] ss:$16 sps:$4 sm:$0xff]   ;;  %v3561_v55 = vor.u32 %v3560_v20, %v3557_v38  ;;  %v3583_v12 = vshrl.u32 %v9459_v31, 16 }
 0x327   :  { %4040 = vmatprep.subr.bf16.mxu1 %v8240_v9  ;;  %4113 = vmatprep.subr.bf16.mxu0 %v8243_v58  ;;  %v9536_v51 = vpop.f32.mrf.mxu1  ;;  %v9538_v19 = vpop.f32.mrf.mxu0  ;;  %v8247_v9 = vld [vmem:[#allocation11 + $0x908] ss:$16 sps:$4 sm:$0xff]   ;;  %v3524_v58 = vrot.slane %v3522_v3, 5  ;;  %v8250_v20 = vld [vmem:[#allocation11 + $0xae0] ss:$16 sps:$4 sm:$0xff]   ;;  %v3552_v11 = vrot.slane %v3550_v1, 5 }
 0x328   :  { %v3562_v10 = vrot.slane %v3561_v55, 4 }
 0x329   :  { %v9540_v63 = vpop.f32.mrf.mxu1  ;;  %v9542_v52 = vpop.f32.mrf.mxu0  ;;  %v3525_v5 = vsel %vm9090_vm2, %v3520_v36, %v3524_v58  ;;  %v8253_v36 = vld [vmem:[#allocation11 + $0xae8] ss:$16 sps:$4 sm:$0xff]  }
 0x32a   :  { %4041 = vmatpush2.bf16.msra.mxu1 %v8238_v23  ;;  %4114 = vmatpush2.bf16.msra.mxu0 %v8241_v8  ;;  %v3569_v23 = vshrl.u32 %v9457_v4, 16 }
 0x32b   :  { %4042 = vmatprep.subr.bf16.mxu1 %v8246_v57  ;;  %4115 = vmatprep.subr.bf16.mxu0 %v8249_v45  ;;  %v9544_v25 = vpop.f32.mrf.mxu1  ;;  %v9546_v53 = vpop.f32.mrf.mxu0  ;;  %v3539_v45 = vsel %vm9090_vm2, %v3534_v26, %v3538_v18  ;;  %v3572_v57 = vshll.u32 %v9457_v4, 16  ;;  %v8730_v26 = vld [vmem:[#allocation2 + $0x28] sm:$0x11] }
 0x32c   :  { %v3564_v18 = vshll.u32 %v8730_v26, 16  ;;  %v7309_v4 = vcombine.high %v3525_v5, %v3539_v45  ;;  %v3571_v31 = vrot.slane %v3569_v23, 4  ;;  %v8256_v26 = vld [vmem:[#allocation11 + $0xac0] ss:$16 sps:$4 sm:$0xff]  }
 0x32d   :  { %v9551_v8 = vpop.f32.mrf.mxu1  ;;  %v9553_v3 = vpop.f32.mrf.mxu0 }
 0x32e   :  { %10411 = vst [vmem:[#allocation33_spill] sm:$0xff] %v9551_v8  ;;  %10412 = vst [vmem:[#allocation34_spill] sm:$0xff] %v9553_v3  ;;  %4043 = vmatpush2.bf16.msra.mxu1 %v8244_v49  ;;  %4116 = vmatpush2.bf16.msra.mxu0 %v8247_v9  ;;  %v8258_v3 = vld [vmem:[#allocation11 + $0xac4] ss:$16 sps:$4 sm:$0xff]   ;;  %v8261_v8 = vld [vmem:[#allocation11 + $0xacc] ss:$16 sps:$4 sm:$0xff]  }
 0x32f   :  { %4662 = vmatprep.subr.bf16.mxu1 %v8252_v14  ;;  %4735 = vmatprep.subr.bf16.mxu0 %v8255_v60  ;;  %v9562_v38 = vpop.f32.mrf.mxu1  ;;  %v9564_v58 = vpop.f32.mrf.mxu0  ;;  %v3574_v9 = vrot.slane %v3572_v57, 5  ;;  %v3585_v14 = vrot.slane %v3583_v12, 4  ;;  %v3588_v60 = vrot.slane %v3586_v41, 5  ;;  %v3566_v23 = vrot.slane %v3564_v18, 5 }
 0x330   :  { %v3553_v12 = vsel %vm9090_vm2, %v9467_v7, %v3552_v11 }
 0x331   :  { %4045 = vmatmul.mubr.bf16.vlgmr.msra.gmra.mxu1 %v7306_v2  ;;  %4118 = vmatmul.mubr.bf16.vlgmr.msra.gmra.mxu0 %v7306_v2  ;;  %v9566_v49 = vpop.f32.mrf.mxu1  ;;  %v9568_v6 = vpop.f32.mrf.mxu0  ;;  %v8264_v2 = vld [vmem:[#allocation11 + $0xaa4] ss:$16 sps:$4 sm:$0xff]   ;;  %v3567_v57 = vsel %vm9090_vm2, %v3562_v10, %v3566_v23  ;;  %v3575_v41 = vor.u32 %v3574_v9, %v3571_v31 }
 0x332   :  { %4054 = vmatprep.mubr.bf16.mxu1 %v7309_v4  ;;  %4127 = vmatprep.mubr.bf16.mxu0 %v7309_v4  ;;  %v7311_v31 = vcombine.high %v3553_v12, %v3567_v57  ;;  %v8270_v10 = vld [vmem:[#allocation11 + $0xa84] ss:$16 sps:$4 sm:$0xff]  }
 0x333   :  { %4663 = vmatpush1.bf16.msra.mxu1 %v8250_v20  ;;  %4736 = vmatpush1.bf16.msra.mxu0 %v8253_v36  ;;  %v9570_v13 = vpop.f32.mrf.mxu1  ;;  %v9572_v1 = vpop.f32.mrf.mxu0  ;;  %v3589_v20 = vor.u32 %v3588_v60, %v3585_v14  ;;  %v7308_v36 = vcombine.low %v3525_v5, %v3539_v45  ;;  %v3576_v9 = vrot.slane %v3575_v41, 4 }
 0x334   :  { %4664 = vmatprep.subr.bf16.mxu1 %v8258_v3  ;;  %4737 = vmatprep.subr.bf16.mxu0 %v8261_v8  ;;  %v8262_v3 = vld [vmem:[#allocation11 + $0xaa0] ss:$16 sps:$4 sm:$0xff]   ;;  %v8265_v8 = vld [vmem:[#allocation11 + $0xaa8] ss:$16 sps:$4 sm:$0xff]  }
 0x335   :  { %v9574_v43 = vpop.f32.mrf.mxu1  ;;  %v9576_v55 = vpop.f32.mrf.mxu0  ;;  %v3590_v14 = vrot.slane %v3589_v20, 4  ;;  %v8279_v20 = vld [vmem:[#allocation11 + $0xa6c] ss:$16 sps:$4 sm:$0xff]  }
 0x336   :  { %10413 = vst [vmem:[#allocation35_spill] sm:$0xff] %v9574_v43  ;;  %10414 = vst [vmem:[#allocation36_spill] sm:$0xff] %v9576_v55  ;;  %v3578_v43 = vshll.u32 %v8731_v28, 16  ;;  %v3592_v55 = vshll.u32 %v8732_v17, 16 }
 0x337   :  { %4665 = vmatpush1.bf16.msra.mxu1 %v8256_v26  ;;  %4738 = vmatpush1.bf16.msra.mxu0 %v8259_v15  ;;  %v2102_v18 = vpop.f32.mrf.mxu1  ;;  %v2175_v4 = vpop.f32.mrf.mxu0  ;;  %v8273_v15 = vld [vmem:[#allocation11 + $0xa8c] ss:$16 sps:$4 sm:$0xff]  }
 0x338   :  { %4666 = vmatprep.subr.bf16.mxu1 %v8264_v2  ;;  %4739 = vmatprep.subr.bf16.mxu0 %v8267_v44  ;;  %v9584_v7 = vadd.f32 %v2102_v18, %v9498_v46  ;;  %v9587_v11 = vadd.f32 %v2175_v4, %v9500_v50  ;;  %v8268_v44 = vld [vmem:[#allocation11 + $0xa80] ss:$16 sps:$4 sm:$0xff]   ;;  %v8271_v46 = vld [vmem:[#allocation11 + $0xa88] ss:$16 sps:$4 sm:$0xff]   ;;  %v3580_v26 = vrot.slane %v3578_v43, 5  ;;  %v3594_v23 = vrot.slane %v3592_v55, 5 }
 0x339   :  { %4055 = vmatmul.mubr.bf16.gmra.mxu1 %v7308_v36  ;;  %4128 = vmatmul.mubr.bf16.gmra.mxu0 %v7308_v36  ;;  %v2104_v5 = vpop.f32.mrf.mxu1  ;;  %v2177_v45 = vpop.f32.mrf.mxu0  ;;  %v7310_v55 = vcombine.low %v3553_v12, %v3567_v57 }
 0x33a   :  { %4064 = vmatprep.mubr.bf16.mxu1 %v7311_v31  ;;  %4137 = vmatprep.mubr.bf16.mxu0 %v7311_v31  ;;  %v9590_v17 = vadd.f32 %v2104_v5, %v9502_v48  ;;  %v9593_v28 = vadd.f32 %v2177_v45, %v9504_v59  ;;  %v8276_v48 = vld [vmem:[#allocation11 + $0xa64] ss:$16 sps:$4 sm:$0xff]   ;;  %v3595_v43 = vsel %vm9090_vm2, %v3590_v14, %v3594_v23  ;;  %v8285_v5 = vld [vmem:[#allocation11 + $0xa4c] ss:$16 sps:$4 sm:$0xff]  }
 0x33b   :  { %4667 = vmatpush1.bf16.msra.mxu1 %v8262_v3  ;;  %4740 = vmatpush1.bf16.msra.mxu0 %v8265_v8  ;;  %v2106_v50 = vpop.f32.mrf.mxu1  ;;  %v2179_v60 = vpop.f32.mrf.mxu0  ;;  %v3581_v3 = vsel %vm9090_vm2, %v3576_v9, %v3580_v26  ;;  %v8277_v8 = vld [vmem:[#allocation11 + $0xa68] ss:$16 sps:$4 sm:$0xff]  }
 0x33c   :  { %4668 = vmatprep.subr.bf16.mxu1 %v8270_v10  ;;  %4741 = vmatprep.subr.bf16.mxu0 %v8273_v15  ;;  %v9596_v2 = vadd.f32 %v2106_v50, %v9506_v22  ;;  %v9599_v41 = vadd.f32 %v2179_v60, %v9508_v0  ;;  %v8274_v22 = vld [vmem:[#allocation11 + $0xa60] ss:$16 sps:$4 sm:$0xff]   ;;  %v7313_v10 = vcombine.high %v3581_v3, %v3595_v43  ;;  %v8282_v15 = vld [vmem:[#allocation11 + $0xa44] ss:$16 sps:$4 sm:$0xff]  }
 0x33d   :  { %v9601_v59 = vpop.f32.mrf.mxu1  ;;  %v9603_v36 = vpop.f32.mrf.mxu0  ;;  %v8288_v60 = vld [vmem:[#allocation11 + $0xa24] ss:$16 sps:$4 sm:$0xff]   ;;  %v7312_v23 = vcombine.low %v3581_v3, %v3595_v43 }
 0x33f   :  { %4669 = vmatpush1.bf16.msra.mxu1 %v8268_v44  ;;  %4742 = vmatpush1.bf16.msra.mxu0 %v8271_v46  ;;  %v2112_v18 = vpop.f32.mrf.mxu1  ;;  %v2185_v0 = vpop.f32.mrf.mxu0 }
 0x340   :  { %4670 = vmatprep.subr.bf16.mxu1 %v8276_v48  ;;  %4743 = vmatprep.subr.bf16.mxu0 %v8279_v20  ;;  %v9610_v4 = vadd.f32 %v2112_v18, %v9518_v29  ;;  %v9613_v31 = vadd.f32 %v2185_v0, %v9520_v27  ;;  %v8280_v29 = vld [vmem:[#allocation11 + $0xa40] ss:$16 sps:$4 sm:$0xff]   ;;  %v8283_v27 = vld [vmem:[#allocation11 + $0xa48] ss:$16 sps:$4 sm:$0xff]   ;;  %v8297_v18 = vld [vmem:[#allocation11 + $0xa0c] ss:$16 sps:$4 sm:$0xff]  }
 0x341   :  { %4065 = vmatmul.mubr.bf16.gmra.mxu1 %v7310_v55  ;;  %4138 = vmatmul.mubr.bf16.gmra.mxu0 %v7310_v55  ;;  %v2114_v45 = vpop.f32.mrf.mxu1  ;;  %v2187_v9 = vpop.f32.mrf.mxu0  ;;  %v8286_v48 = vld [vmem:[#allocation11 + $0xa20] ss:$16 sps:$4 sm:$0xff]   ;;  %v8289_v20 = vld [vmem:[#allocation11 + $0xa28] ss:$16 sps:$4 sm:$0xff]  }
 0x342   :  { %4074 = vmatprep.mubr.bf16.mxu1 %v7313_v10  ;;  %4147 = vmatprep.mubr.bf16.mxu0 %v7313_v10  ;;  %v9616_v12 = vadd.f32 %v2114_v45, %v9522_v42  ;;  %v9619_v57 = vadd.f32 %v2187_v9, %v9524_v40  ;;  %v8291_v42 = vld [vmem:[#allocation11 + $0xa2c] ss:$16 sps:$4 sm:$0xff]  }
 0x343   :  { %4671 = vmatpush1.bf16.msra.mxu1 %v8274_v22  ;;  %4744 = vmatpush1.bf16.msra.mxu0 %v8277_v8  ;;  %v2116_v14 = vpop.f32.mrf.mxu1  ;;  %v2189_v44 = vpop.f32.mrf.mxu0  ;;  %v8294_v8 = vld [vmem:[#allocation11 + $0xa04] ss:$16 sps:$4 sm:$0xff]  }
 0x344   :  { %4672 = vmatprep.subr.bf16.mxu1 %v8282_v15  ;;  %4745 = vmatprep.subr.bf16.mxu0 %v8285_v5  ;;  %v9622_v46 = vadd.f32 %v2116_v14, %v9526_v32  ;;  %v9625_v50 = vadd.f32 %v2189_v44, %v9528_v47  ;;  %v8309_v14 = vld [vmem:[#allocation11 + $0xbcc] ss:$16 sps:$4 sm:$0xff]   ;;  %v8304_v44 = vld [vmem:[#allocation11 + $0xbc0] ss:$16 sps:$4 sm:$0xff]  }
 0x345   :  { %v9627_v26 = vpop.f32.mrf.mxu1  ;;  %v9629_v40 = vpop.f32.mrf.mxu0 }
 0x347   :  { %4673 = vmatpush1.bf16.msra.mxu1 %v8280_v29  ;;  %4746 = vmatpush1.bf16.msra.mxu0 %v8283_v27  ;;  %v2122_v55 = vpop.f32.mrf.mxu1  ;;  %v2195_v22 = vpop.f32.mrf.mxu0  ;;  %v8301_v29 = vld [vmem:[#allocation11 + $0xbe8] ss:$16 sps:$4 sm:$0xff]   ;;  %v8306_v27 = vld [vmem:[#allocation11 + $0xbc4] ss:$16 sps:$4 sm:$0xff]  }
 0x348   :  { %4674 = vmatprep.subr.bf16.mxu1 %v8288_v60  ;;  %4747 = vmatprep.subr.bf16.mxu0 %v8291_v42  ;;  %v9632_v32 = vadd.f32 %v2122_v55, %v9536_v51  ;;  %v9635_v47 = vadd.f32 %v2195_v22, %v9538_v19  ;;  %v8292_v51 = vld [vmem:[#allocation11 + $0xa00] ss:$16 sps:$4 sm:$0xff]   ;;  %v8295_v19 = vld [vmem:[#allocation11 + $0xa08] ss:$16 sps:$4 sm:$0xff]   ;;  %v8315_v42 = vld [vmem:[#allocation11 + $0xbac] ss:$16 sps:$4 sm:$0xff]  }
 0x349   :  { %4075 = vmatmul.mubr.bf16.gmra.mxu1 %v7312_v23  ;;  %4148 = vmatmul.mubr.bf16.gmra.mxu0 %v7312_v23  ;;  %v2124_v0 = vpop.f32.mrf.mxu1  ;;  %v2197_v10 = vpop.f32.mrf.mxu0  ;;  %v8307_v60 = vld [vmem:[#allocation11 + $0xbc8] ss:$16 sps:$4 sm:$0xff]   ;;  %v8316_v55 = vld [vmem:[#allocation11 + $0xb80] ss:$16 sps:$4 sm:$0xff]  }
 0x34a   :  { %4694 = vmatprep.mubr.bf16.mxu1 %v9341_v56  ;;  %4767 = vmatprep.mubr.bf16.mxu0 %v9341_v56  ;;  %v9640_v3 = vadd.f32 %v2124_v0, %v9540_v63  ;;  %v9643_v43 = vadd.f32 %v2197_v10, %v9542_v52  ;;  %v8300_v56 = vld [vmem:[#allocation11 + $0xbe4] ss:$16 sps:$4 sm:$0xff]   ;;  %v8303_v63 = vld [vmem:[#allocation11 + $0xbec] ss:$16 sps:$4 sm:$0xff]   ;;  %v8298_v52 = vld [vmem:[#allocation11 + $0xbe0] ss:$16 sps:$4 sm:$0xff]  }
 0x34b   :  { %4675 = vmatpush1.bf16.msra.mxu1 %v8286_v48  ;;  %4748 = vmatpush1.bf16.msra.mxu0 %v8289_v20  ;;  %v2126_v15 = vpop.f32.mrf.mxu1  ;;  %v2199_v5 = vpop.f32.mrf.mxu0  ;;  %v8313_v23 = vld [vmem:[#allocation11 + $0xba8] ss:$16 sps:$4 sm:$0xff]   ;;  %v8318_v48 = vld [vmem:[#allocation11 + $0xb84] ss:$16 sps:$4 sm:$0xff]   ;;  %v8321_v20 = vld [vmem:[#allocation11 + $0xb8c] ss:$16 sps:$4 sm:$0xff]  }
 0x34c   :  { %4676 = vmatprep.subr.bf16.mxu1 %v8294_v8  ;;  %4749 = vmatprep.subr.bf16.mxu0 %v8297_v18  ;;  %v9646_v45 = vadd.f32 %v2126_v15, %v9544_v25  ;;  %v9649_v9 = vadd.f32 %v2199_v5, %v9546_v53  ;;  %v8312_v25 = vld [vmem:[#allocation11 + $0xba4] ss:$16 sps:$4 sm:$0xff]   ;;  %v8310_v53 = vld [vmem:[#allocation11 + $0xba0] ss:$16 sps:$4 sm:$0xff]   ;;  %v8319_v22 = vld [vmem:[#allocation11 + $0xb88] ss:$16 sps:$4 sm:$0xff]  }
 0x34d   :  { %v8324_v8 = vld [vmem:[#allocation11 + $0xb64] ss:$16 sps:$4 sm:$0xff]   ;;  %v8327_v18 = vld [vmem:[#allocation11 + $0xb6c] ss:$16 sps:$4 sm:$0xff]   ;;  %v8322_v0 = vld [vmem:[#allocation11 + $0xb60] ss:$16 sps:$4 sm:$0xff]  }
 0x34e   :  { %v8325_v10 = vld [vmem:[#allocation11 + $0xb68] ss:$16 sps:$4 sm:$0xff]   ;;  %v8328_v15 = vld [vmem:[#allocation11 + $0xb40] ss:$16 sps:$4 sm:$0xff]  }
 0x34f   :  { %4677 = vmatpush1.bf16.msra.mxu1 %v8292_v51  ;;  %4750 = vmatpush1.bf16.msra.mxu0 %v8295_v19  ;;  %v8330_v51 = vld [vmem:[#allocation11 + $0xb44] ss:$16 sps:$4 sm:$0xff]   ;;  %v8333_v19 = vld [vmem:[#allocation11 + $0xb4c] ss:$16 sps:$4 sm:$0xff]   ;;  %v8331_v5 = vld [vmem:[#allocation11 + $0xb48] ss:$16 sps:$4 sm:$0xff]  }
 0x350   :  { %4678 = vmatprep.subr.bf16.mxu1 %v8300_v56  ;;  %4751 = vmatprep.subr.bf16.mxu0 %v8303_v63  ;;  %v8336_v56 = vld [vmem:[#allocation11 + $0xb24] ss:$16 sps:$4 sm:$0xff]   ;;  %v8339_v63 = vld [vmem:[#allocation11 + $0xb2c] ss:$16 sps:$4 sm:$0xff]  }
 0x353   :  { %4679 = vmatpush2.bf16.msra.mxu1 %v8298_v52  ;;  %4752 = vmatpush2.bf16.msra.mxu0 %v8301_v29  ;;  %v8334_v52 = vld [vmem:[#allocation11 + $0xb20] ss:$16 sps:$4 sm:$0xff]   ;;  %v8337_v29 = vld [vmem:[#allocation11 + $0xb28] ss:$16 sps:$4 sm:$0xff]  }
 0x354   :  { %4680 = vmatprep.subr.bf16.mxu1 %v8306_v27  ;;  %4753 = vmatprep.subr.bf16.mxu0 %v8309_v14  ;;  %v8342_v27 = vld [vmem:[#allocation11 + $0xb04] ss:$16 sps:$4 sm:$0xff]   ;;  %v8345_v14 = vld [vmem:[#allocation11 + $0xb0c] ss:$16 sps:$4 sm:$0xff]  }
 0x357   :  { %4681 = vmatpush2.bf16.msra.mxu1 %v8304_v44  ;;  %4754 = vmatpush2.bf16.msra.mxu0 %v8307_v60  ;;  %v8340_v44 = vld [vmem:[#allocation11 + $0xb00] ss:$16 sps:$4 sm:$0xff]   ;;  %v8343_v60 = vld [vmem:[#allocation11 + $0xb08] ss:$16 sps:$4 sm:$0xff]  }
 0x358   :  { %4682 = vmatprep.subr.bf16.mxu1 %v8312_v25  ;;  %4755 = vmatprep.subr.bf16.mxu0 %v8315_v42  ;;  %v8348_v25 = vld [vmem:[#allocation11 + $0xce4] ss:$16 sps:$4 sm:$0xff]   ;;  %v8351_v42 = vld [vmem:[#allocation11 + $0xcec] ss:$16 sps:$4 sm:$0xff]  }
 0x35b   :  { %4683 = vmatpush2.bf16.msra.mxu1 %v8310_v53  ;;  %4756 = vmatpush2.bf16.msra.mxu0 %v8313_v23  ;;  %v9651_v53 = vpop.f32.mrf.mxu1  ;;  %v9653_v23 = vpop.f32.mrf.mxu0 }
 0x35c   :  { %4684 = vmatprep.subr.bf16.mxu1 %v8318_v48  ;;  %4757 = vmatprep.subr.bf16.mxu0 %v8321_v20  ;;  %v2093_v48 = vadd.f32 %v9562_v38, %v9482_v16  ;;  %v2166_v20 = vadd.f32 %v9564_v58, %v9484_v21  ;;  %v8349_v16 = vld [vmem:[#allocation11 + $0xce8] ss:$16 sps:$4 sm:$0xff]   ;;  %v2097_v21 = vadd.f32 %v9570_v13, %v9490_v37  ;;  %v8354_v58 = vld [vmem:[#allocation11 + $0xcc4] ss:$16 sps:$4 sm:$0xff]  }
 0x35f   :  { %4685 = vmatpush2.bf16.msra.mxu1 %v8316_v55  ;;  %4758 = vmatpush2.bf16.msra.mxu0 %v8319_v22  ;;  %v2095_v55 = vadd.f32 %v9566_v49, %v9486_v34  ;;  %v8357_v49 = vld [vmem:[#allocation11 + $0xccc] ss:$16 sps:$4 sm:$0xff]  }
 0x360   :  { %4686 = vmatprep.subr.bf16.mxu1 %v8324_v8  ;;  %4759 = vmatprep.subr.bf16.mxu0 %v8327_v18  ;;  %v2168_v18 = vadd.f32 %v9568_v6, %v9488_v61 }
 0x363   :  { %4687 = vmatpush2.bf16.msra.mxu1 %v8322_v0  ;;  %4760 = vmatpush2.bf16.msra.mxu0 %v8325_v10 }
 0x364   :  { %4688 = vmatprep.subr.bf16.mxu1 %v8330_v51  ;;  %4761 = vmatprep.subr.bf16.mxu0 %v8333_v19  ;;  %v8346_v51 = vld [vmem:[#allocation11 + $0xce0] ss:$16 sps:$4 sm:$0xff]   ;;  %v2170_v19 = vadd.f32 %v9572_v1, %v9492_v39  ;;  %v8355_v1 = vld [vmem:[#allocation11 + $0xcc8] ss:$16 sps:$4 sm:$0xff]  }
 0x365   :  { %v8352_v39 = vld [vmem:[#allocation11 + $0xcc0] ss:$16 sps:$4 sm:$0xff]  }
 0x367   :  { %4689 = vmatpush2.bf16.msra.mxu1 %v8328_v15  ;;  %4762 = vmatpush2.bf16.msra.mxu0 %v8331_v5 }
 0x368   :  { %4690 = vmatprep.subr.bf16.mxu1 %v8336_v56  ;;  %4763 = vmatprep.subr.bf16.mxu0 %v8339_v63  ;;  %v8360_v63 = vld [vmem:[#allocation11 + $0xca4] ss:$16 sps:$4 sm:$0xff]  }
 0x36b   :  { %4691 = vmatpush2.bf16.msra.mxu1 %v8334_v52  ;;  %4764 = vmatpush2.bf16.msra.mxu0 %v8337_v29  ;;  %v8363_v52 = vld [vmem:[#allocation11 + $0xcac] ss:$16 sps:$4 sm:$0xff]  }
 0x36c   :  { %4692 = vmatprep.subr.bf16.mxu1 %v8342_v27  ;;  %4765 = vmatprep.subr.bf16.mxu0 %v8345_v14 }
 0x36f   :  { %4693 = vmatpush2.bf16.msra.mxu1 %v8340_v44  ;;  %4766 = vmatpush2.bf16.msra.mxu0 %v8343_v60  ;;  %v2713_v22 = vpop.f32.mrf.mxu1  ;;  %v2786_v8 = vpop.f32.mrf.mxu0  ;;  %v8358_v44 = vld [vmem:[#allocation11 + $0xca0] ss:$16 sps:$4 sm:$0xff]   ;;  %v8361_v60 = vld [vmem:[#allocation11 + $0xca8] ss:$16 sps:$4 sm:$0xff]  }
 0x370   :  { %v9663_v0 = vadd.f32 %v2713_v22, %v2093_v48  ;;  %v9665_v10 = vadd.f32 %v2786_v8, %v2166_v20  ;;  %5272 = vmatprep.subr.bf16.mxu1 %v8348_v25  ;;  %5345 = vmatprep.subr.bf16.mxu0 %v8351_v42  ;;  %v8366_v48 = vld [vmem:[#allocation11 + $0xc84] ss:$16 sps:$4 sm:$0xff]   ;;  %v8369_v20 = vld [vmem:[#allocation11 + $0xc8c] ss:$16 sps:$4 sm:$0xff]  }
 0x371   :  { %v2715_v38 = vpop.f32.mrf.mxu1  ;;  %v2788_v34 = vpop.f32.mrf.mxu0 }
 0x372   :  { %4695 = vmatmul.mubr.bf16.vlgmr.msra.gmra.mxu1 %v9339_v54  ;;  %4768 = vmatmul.mubr.bf16.vlgmr.msra.gmra.mxu0 %v9339_v54  ;;  %v9673_v61 = vadd.f32 %v2715_v38, %v2095_v55  ;;  %v9675_v6 = vadd.f32 %v2788_v34, %v2168_v18  ;;  %v8370_v34 = vld [vmem:[#allocation11 + $0xc60] ss:$16 sps:$4 sm:$0xff]  }
 0x373   :  { %4704 = vmatprep.mubr.bf16.mxu1 %v9353_v24  ;;  %4777 = vmatprep.mubr.bf16.mxu0 %v9353_v24  ;;  %v2717_v37 = vpop.f32.mrf.mxu1  ;;  %v2790_v13 = vpop.f32.mrf.mxu0 }
 0x374   :  { %5273 = vmatpush1.bf16.msra.mxu1 %v8346_v51  ;;  %5346 = vmatpush1.bf16.msra.mxu0 %v8349_v16  ;;  %v9679_v15 = vadd.f32 %v2717_v37, %v2097_v21  ;;  %v9681_v5 = vadd.f32 %v2790_v13, %v2170_v19  ;;  %v8372_v16 = vld [vmem:[#allocation11 + $0xc64] ss:$16 sps:$4 sm:$0xff]   ;;  %v8381_v13 = vld [vmem:[#allocation11 + $0xc4c] ss:$16 sps:$4 sm:$0xff]  }
 0x375   :  { %5274 = vmatprep.subr.bf16.mxu1 %v8354_v58  ;;  %5347 = vmatprep.subr.bf16.mxu0 %v8357_v49  ;;  %v9683_v54 = vpop.f32.mrf.mxu1  ;;  %v9685_v56 = vpop.f32.mrf.mxu0  ;;  %v8373_v58 = vld [vmem:[#allocation11 + $0xc68] ss:$16 sps:$4 sm:$0xff]   ;;  %v8378_v37 = vld [vmem:[#allocation11 + $0xc44] ss:$16 sps:$4 sm:$0xff]  }
 0x377   :  { %v2723_v29 = vpop.f32.mrf.mxu1  ;;  %v2796_v24 = vpop.f32.mrf.mxu0 }
 0x378   :  { %5275 = vmatpush1.bf16.msra.mxu1 %v8352_v39  ;;  %5348 = vmatpush1.bf16.msra.mxu0 %v8355_v1  ;;  %v9688_v27 = vadd.f32 %v2723_v29, %v9584_v7  ;;  %v9691_v14 = vadd.f32 %v2796_v24, %v9587_v11 }
 0x379   :  { %5276 = vmatprep.subr.bf16.mxu1 %v8360_v63  ;;  %5349 = vmatprep.subr.bf16.mxu0 %v8363_v52  ;;  %v2725_v25 = vpop.f32.mrf.mxu1  ;;  %v2798_v42 = vpop.f32.mrf.mxu0 }
 0x37a   :  { %4705 = vmatmul.mubr.bf16.gmra.mxu1 %v9355_v33  ;;  %4778 = vmatmul.mubr.bf16.gmra.mxu0 %v9355_v33  ;;  %v9696_v55 = vadd.f32 %v2725_v25, %v9590_v17  ;;  %v9699_v7 = vadd.f32 %v2798_v42, %v9593_v28  ;;  %v8364_v33 = vld [vmem:[#allocation11 + $0xc80] ss:$16 sps:$4 sm:$0xff]   ;;  %v8367_v17 = vld [vmem:[#allocation11 + $0xc88] ss:$16 sps:$4 sm:$0xff]  }
 0x37b   :  { %4714 = vmatprep.mubr.bf16.mxu1 %v9357_v30  ;;  %4787 = vmatprep.mubr.bf16.mxu0 %v9357_v30  ;;  %v2727_v11 = vpop.f32.mrf.mxu1  ;;  %v2800_v22 = vpop.f32.mrf.mxu0  ;;  %v8375_v30 = vld [vmem:[#allocation11 + $0xc6c] ss:$16 sps:$4 sm:$0xff]   ;;  %v9739_v25 = vld [vmem:[#allocation2 + $0x38] sm:$0xff]  ;;  %v9741_v42 = vld [vmem:[#allocation2 + $0x48] sm:$0xff] }
 0x37c   :  { %5277 = vmatpush1.bf16.msra.mxu1 %v8358_v44  ;;  %5350 = vmatpush1.bf16.msra.mxu0 %v8361_v60  ;;  %v9704_v8 = vadd.f32 %v2727_v11, %v9596_v2  ;;  %v9707_v18 = vadd.f32 %v2800_v22, %v9599_v41  ;;  %v8384_v44 = vld [vmem:[#allocation11 + $0xc24] ss:$16 sps:$4 sm:$0xff]   ;;  %v8387_v60 = vld [vmem:[#allocation11 + $0xc2c] ss:$16 sps:$4 sm:$0xff]   ;;  %v8382_v11 = vld [vmem:[#allocation11 + $0xc20] ss:$16 sps:$4 sm:$0xff]  }
 0x37d   :  { %5278 = vmatprep.subr.bf16.mxu1 %v8366_v48  ;;  %5351 = vmatprep.subr.bf16.mxu0 %v8369_v20  ;;  %v9709_v28 = vpop.f32.mrf.mxu1  ;;  %v9711_v51 = vpop.f32.mrf.mxu0  ;;  %v8385_v22 = vld [vmem:[#allocation11 + $0xc28] ss:$16 sps:$4 sm:$0xff]  }
 0x37f   :  { %v2733_v21 = vpop.f32.mrf.mxu1  ;;  %v2806_v38 = vpop.f32.mrf.mxu0 }
 0x380   :  { %5279 = vmatpush1.bf16.msra.mxu1 %v8364_v33  ;;  %5352 = vmatpush1.bf16.msra.mxu0 %v8367_v17  ;;  %v9714_v2 = vadd.f32 %v2733_v21, %v9610_v4  ;;  %v9717_v41 = vadd.f32 %v2806_v38, %v9613_v31  ;;  %v10415_v31 = vld [vmem:[#allocation17_spill] sm:$0xff]  ;;  %v7459_v33 = vcombine.high %v9739_v25, %v9741_v42  ;;  %v8395_v21 = vld [vmem:[#allocation11 + $0xc0c] ss:$16 sps:$4 sm:$0xff]  }
 0x381   :  { %5280 = vmatprep.subr.bf16.mxu1 %v8372_v16  ;;  %5353 = vmatprep.subr.bf16.mxu0 %v8375_v30  ;;  %v2735_v49 = vpop.f32.mrf.mxu1  ;;  %v2808_v19 = vpop.f32.mrf.mxu0  ;;  %v8392_v30 = vld [vmem:[#allocation11 + $0xc04] ss:$16 sps:$4 sm:$0xff]   ;;  %v10416_v38 = vld [vmem:[#allocation18_spill] sm:$0xff] }
 0x382   :  { %4715 = vmatmul.mubr.bf16.gmra.mxu1 %v9359_v35  ;;  %4788 = vmatmul.mubr.bf16.gmra.mxu0 %v9359_v35  ;;  %v9722_v39 = vadd.f32 %v2735_v49, %v9616_v12  ;;  %v9725_v4 = vadd.f32 %v2808_v19, %v9619_v57  ;;  %v8376_v35 = vld [vmem:[#allocation11 + $0xc40] ss:$16 sps:$4 sm:$0xff]   ;;  %v8379_v12 = vld [vmem:[#allocation11 + $0xc48] ss:$16 sps:$4 sm:$0xff]  }
 0x383   :  { %4724 = vmatprep.mubr.bf16.mxu1 %v10415_v31  ;;  %4797 = vmatprep.mubr.bf16.mxu0 %v10415_v31  ;;  %v2737_v1 = vpop.f32.mrf.mxu1  ;;  %v2810_v63 = vpop.f32.mrf.mxu0  ;;  %v8401_v31 = vld [vmem:[#allocation11 + $0xdec] ss:$16 sps:$4 sm:$0xff]  }
 0x384   :  { %5281 = vmatpush1.bf16.msra.mxu1 %v8370_v34  ;;  %5354 = vmatpush1.bf16.msra.mxu0 %v8373_v58  ;;  %v9730_v52 = vadd.f32 %v2737_v1, %v9622_v46  ;;  %v9733_v29 = vadd.f32 %v2810_v63, %v9625_v50  ;;  %v8399_v1 = vld [vmem:[#allocation11 + $0xde8] ss:$16 sps:$4 sm:$0xff]   ;;  %v8404_v63 = vld [vmem:[#allocation11 + $0xdc4] ss:$16 sps:$4 sm:$0xff]  }
 0x385   :  { %5282 = vmatprep.subr.bf16.mxu1 %v8378_v37  ;;  %5355 = vmatprep.subr.bf16.mxu0 %v8381_v13  ;;  %v9735_v57 = vpop.f32.mrf.mxu1  ;;  %v9737_v24 = vpop.f32.mrf.mxu0  ;;  %v8390_v37 = vld [vmem:[#allocation11 + $0xc00] ss:$16 sps:$4 sm:$0xff]   ;;  %v8393_v13 = vld [vmem:[#allocation11 + $0xc08] ss:$16 sps:$4 sm:$0xff]  }
 0x387   :  { %v2743_v48 = vpop.f32.mrf.mxu1  ;;  %v2816_v46 = vpop.f32.mrf.mxu0 }
 0x388   :  { %5283 = vmatpush1.bf16.msra.mxu1 %v8376_v35  ;;  %5356 = vmatpush1.bf16.msra.mxu0 %v8379_v12  ;;  %v9744_v50 = vadd.f32 %v2743_v48, %v9632_v32  ;;  %v9747_v20 = vadd.f32 %v2816_v46, %v9635_v47  ;;  %v8407_v35 = vld [vmem:[#allocation11 + $0xdcc] ss:$16 sps:$4 sm:$0xff]   ;;  %v8405_v12 = vld [vmem:[#allocation11 + $0xdc8] ss:$16 sps:$4 sm:$0xff]   ;;  %v8416_v46 = vld [vmem:[#allocation11 + $0xd84] ss:$16 sps:$4 sm:$0xff]  }
 0x389   :  { %5284 = vmatprep.subr.bf16.mxu1 %v8384_v44  ;;  %5357 = vmatprep.subr.bf16.mxu0 %v8387_v60  ;;  %v2745_v17 = vpop.f32.mrf.mxu1  ;;  %v2818_v16 = vpop.f32.mrf.mxu0  ;;  %v8413_v44 = vld [vmem:[#allocation11 + $0xdac] ss:$16 sps:$4 sm:$0xff]   ;;  %v8408_v60 = vld [vmem:[#allocation11 + $0xda0] ss:$16 sps:$4 sm:$0xff]   ;;  %v8411_v48 = vld [vmem:[#allocation11 + $0xda8] ss:$16 sps:$4 sm:$0xff]  }
 0x38a   :  { %4725 = vmatmul.mubr.bf16.gmra.mxu1 %v10416_v38  ;;  %4798 = vmatmul.mubr.bf16.gmra.mxu0 %v10416_v38  ;;  %v9754_v32 = vadd.f32 %v2745_v17, %v9640_v3  ;;  %v9757_v47 = vadd.f32 %v2818_v16, %v9643_v43  ;;  %v8398_v3 = vld [vmem:[#allocation11 + $0xde4] ss:$16 sps:$4 sm:$0xff]   ;;  %v8396_v43 = vld [vmem:[#allocation11 + $0xde0] ss:$16 sps:$4 sm:$0xff]   ;;  %v8425_v16 = vld [vmem:[#allocation11 + $0xd6c] ss:$16 sps:$4 sm:$0xff]  }
 0x38b   :  { %5304 = vmatprep.mubr.bf16.mxu1 %v7459_v33  ;;  %5377 = vmatprep.mubr.bf16.mxu0 %v7459_v33  ;;  %v2747_v34 = vpop.f32.mrf.mxu1  ;;  %v2820_v58 = vpop.f32.mrf.mxu0  ;;  %v8417_v33 = vld [vmem:[#allocation11 + $0xd88] ss:$16 sps:$4 sm:$0xff]   ;;  %v8422_v17 = vld [vmem:[#allocation11 + $0xd64] ss:$16 sps:$4 sm:$0xff]  }
 0x38c   :  { %5285 = vmatpush1.bf16.msra.mxu1 %v8382_v11  ;;  %5358 = vmatpush1.bf16.msra.mxu0 %v8385_v22  ;;  %v9760_v49 = vadd.f32 %v2747_v34, %v9646_v45  ;;  %v9763_v19 = vadd.f32 %v2820_v58, %v9649_v9  ;;  %v8402_v45 = vld [vmem:[#allocation11 + $0xdc0] ss:$16 sps:$4 sm:$0xff]   ;;  %v8410_v9 = vld [vmem:[#allocation11 + $0xda4] ss:$16 sps:$4 sm:$0xff]   ;;  %v8419_v11 = vld [vmem:[#allocation11 + $0xd8c] ss:$16 sps:$4 sm:$0xff]  }
 0x38d   :  { %5286 = vmatprep.subr.bf16.mxu1 %v8392_v30  ;;  %5359 = vmatprep.subr.bf16.mxu0 %v8395_v21  ;;  %v8414_v22 = vld [vmem:[#allocation11 + $0xd80] ss:$16 sps:$4 sm:$0xff]   ;;  %v8423_v21 = vld [vmem:[#allocation11 + $0xd68] ss:$16 sps:$4 sm:$0xff]   ;;  %v8428_v38 = vld [vmem:[#allocation11 + $0xd44] ss:$16 sps:$4 sm:$0xff]  }
 0x38e   :  { %v8420_v30 = vld [vmem:[#allocation11 + $0xd60] ss:$16 sps:$4 sm:$0xff]   ;;  %v8431_v34 = vld [vmem:[#allocation11 + $0xd4c] ss:$16 sps:$4 sm:$0xff]  }
 0x38f   :  { %v8426_v58 = vld [vmem:[#allocation11 + $0xd40] ss:$16 sps:$4 sm:$0xff]  }
 0x390   :  { %5287 = vmatpush1.bf16.msra.mxu1 %v8390_v37  ;;  %5360 = vmatpush1.bf16.msra.mxu0 %v8393_v13  ;;  %v8429_v37 = vld [vmem:[#allocation11 + $0xd48] ss:$16 sps:$4 sm:$0xff]   ;;  %v8434_v13 = vld [vmem:[#allocation11 + $0xd24] ss:$16 sps:$4 sm:$0xff]  }
 0x391   :  { %5288 = vmatprep.subr.bf16.mxu1 %v8398_v3  ;;  %5361 = vmatprep.subr.bf16.mxu0 %v8401_v31  ;;  %v8437_v3 = vld [vmem:[#allocation11 + $0xd2c] ss:$16 sps:$4 sm:$0xff]   ;;  %v8432_v31 = vld [vmem:[#allocation11 + $0xd20] ss:$16 sps:$4 sm:$0xff]  }
 0x394   :  { %5289 = vmatpush2.bf16.msra.mxu1 %v8396_v43  ;;  %5362 = vmatpush2.bf16.msra.mxu0 %v8399_v1  ;;  %v8435_v43 = vld [vmem:[#allocation11 + $0xd28] ss:$16 sps:$4 sm:$0xff]   ;;  %v8440_v1 = vld [vmem:[#allocation11 + $0xd04] ss:$16 sps:$4 sm:$0xff]  }
 0x395   :  { %5290 = vmatprep.subr.bf16.mxu1 %v8404_v63  ;;  %5363 = vmatprep.subr.bf16.mxu0 %v8407_v35  ;;  %v8443_v63 = vld [vmem:[#allocation11 + $0xd0c] ss:$16 sps:$4 sm:$0xff]   ;;  %v8438_v35 = vld [vmem:[#allocation11 + $0xd00] ss:$16 sps:$4 sm:$0xff]  }
 0x398   :  { %5291 = vmatpush2.bf16.msra.mxu1 %v8402_v45  ;;  %5364 = vmatpush2.bf16.msra.mxu0 %v8405_v12  ;;  %v8441_v45 = vld [vmem:[#allocation11 + $0xd08] ss:$16 sps:$4 sm:$0xff]   ;;  %v8446_v12 = vld [vmem:[#allocation11 + $0xee4] ss:$16 sps:$4 sm:$0xff]  }
 0x399   :  { %5292 = vmatprep.subr.bf16.mxu1 %v8410_v9  ;;  %5365 = vmatprep.subr.bf16.mxu0 %v8413_v44  ;;  %v8449_v9 = vld [vmem:[#allocation11 + $0xeec] ss:$16 sps:$4 sm:$0xff]   ;;  %v9765_v44 = vpop.f32.mrf.mxu1 }
 0x39c   :  { %5293 = vmatpush2.bf16.msra.mxu1 %v8408_v60  ;;  %5366 = vmatpush2.bf16.msra.mxu0 %v8411_v48  ;;  %v9767_v60 = vpop.f32.mrf.mxu0  ;;  %v9769_v48 = vld [vmem:[#allocation2 + $0x18] sm:$0xff] }
 0x39d   :  { %5294 = vmatprep.subr.bf16.mxu1 %v8416_v46  ;;  %5367 = vmatprep.subr.bf16.mxu0 %v8419_v11  ;;  %v9771_v46 = vld [vmem:[#allocation2 + $0x58] sm:$0xff] }
 0x3a0   :  { %5295 = vmatpush2.bf16.msra.mxu1 %v8414_v22  ;;  %5368 = vmatpush2.bf16.msra.mxu0 %v8417_v33  ;;  %v7458_v33 = vcombine.low %v9739_v25, %v9741_v42 }
 0x3a1   :  { %5296 = vmatprep.subr.bf16.mxu1 %v8422_v17  ;;  %5369 = vmatprep.subr.bf16.mxu0 %v8425_v16 }
 0x3a4   :  { %5297 = vmatpush2.bf16.msra.mxu1 %v8420_v30  ;;  %5370 = vmatpush2.bf16.msra.mxu0 %v8423_v21  ;;  %v8444_v30 = vld [vmem:[#allocation11 + $0xee0] ss:$16 sps:$4 sm:$0xff]   ;;  %v8447_v21 = vld [vmem:[#allocation11 + $0xee8] ss:$16 sps:$4 sm:$0xff]  }
 0x3a5   :  { %5298 = vmatprep.subr.bf16.mxu1 %v8428_v38  ;;  %5371 = vmatprep.subr.bf16.mxu0 %v8431_v34  ;;  %v10417_v38 = vld [vmem:[#allocation27_spill] sm:$0xff] }
 0x3a6   :  { %v10418_v34 = vld [vmem:[#allocation35_spill] sm:$0xff] }
 0x3a8   :  { %5299 = vmatpush2.bf16.msra.mxu1 %v8426_v58  ;;  %5372 = vmatpush2.bf16.msra.mxu0 %v8429_v37  ;;  %v2099_v58 = vadd.f32 %v10418_v34, %v10417_v38  ;;  %v7461_v37 = vcombine.high %v9769_v48, %v9771_v46  ;;  %v8453_v38 = vld [vmem:[#allocation11 + $0xec8] ss:$16 sps:$4 sm:$0xff]  }
 0x3a9   :  { %5300 = vmatprep.subr.bf16.mxu1 %v8434_v13  ;;  %5373 = vmatprep.subr.bf16.mxu0 %v8437_v3 }
 0x3ac   :  { %5301 = vmatpush2.bf16.msra.mxu1 %v8432_v31  ;;  %5374 = vmatpush2.bf16.msra.mxu0 %v8435_v43  ;;  %v8452_v31 = vld [vmem:[#allocation11 + $0xec4] ss:$16 sps:$4 sm:$0xff]   ;;  %v8455_v43 = vld [vmem:[#allocation11 + $0xecc] ss:$16 sps:$4 sm:$0xff]  }
 0x3ad   :  { %5302 = vmatprep.subr.bf16.mxu1 %v8440_v1  ;;  %5375 = vmatprep.subr.bf16.mxu0 %v8443_v63  ;;  %v10419_v1 = vld [vmem:[#allocation28_spill] sm:$0xff] }
 0x3b0   :  { %5303 = vmatpush2.bf16.msra.mxu1 %v8438_v35  ;;  %5376 = vmatpush2.bf16.msra.mxu0 %v8441_v45  ;;  %v3324_v11 = vpop.f32.mrf.mxu1  ;;  %v3397_v22 = vpop.f32.mrf.mxu0  ;;  %v2830_v45 = vadd.f32 %v9683_v54, %v2099_v58  ;;  %v8458_v58 = vld [vmem:[#allocation11 + $0xea4] ss:$16 sps:$4 sm:$0xff]  }
 0x3b1   :  { %v9776_v17 = vadd.f32 %v3324_v11, %v9663_v0  ;;  %v9779_v16 = vadd.f32 %v3397_v22, %v9665_v10  ;;  %5994 = vmatprep.subr.bf16.mxu1 %v8446_v12  ;;  %6067 = vmatprep.subr.bf16.mxu0 %v8449_v9  ;;  %v10420_v0 = vld [vmem:[#allocation36_spill] sm:$0xff] }
 0x3b2   :  { %v3326_v13 = vpop.f32.mrf.mxu1  ;;  %v3399_v3 = vpop.f32.mrf.mxu0  ;;  %v2172_v63 = vadd.f32 %v10420_v0, %v10419_v1  ;;  %v7460_v0 = vcombine.low %v9769_v48, %v9771_v46 }
 0x3b3   :  { %5305 = vmatmul.mubr.bf16.vlgmr.msra.gmra.mxu1 %v7458_v33  ;;  %5378 = vmatmul.mubr.bf16.vlgmr.msra.gmra.mxu0 %v7458_v33  ;;  %v9788_v10 = vadd.f32 %v3326_v13, %v9673_v61  ;;  %v9791_v35 = vadd.f32 %v3399_v3, %v9675_v6  ;;  %v8450_v61 = vld [vmem:[#allocation11 + $0xec0] ss:$16 sps:$4 sm:$0xff]   ;;  %v5467_v6 = vshrl.u32 %v9739_v25, 16  ;;  %v5484_v3 = vshll.u32 %v9741_v42, 16 }
 0x3b4   :  { %5314 = vmatprep.mubr.bf16.mxu1 %v7461_v37  ;;  %5387 = vmatprep.mubr.bf16.mxu0 %v7461_v37  ;;  %v3328_v12 = vpop.f32.mrf.mxu1  ;;  %v3401_v9 = vpop.f32.mrf.mxu0  ;;  %v2832_v11 = vadd.f32 %v9685_v56, %v2172_v63  ;;  %v8461_v37 = vld [vmem:[#allocation11 + $0xeac] ss:$16 sps:$4 sm:$0xff]   ;;  %v5470_v56 = vshll.u32 %v9739_v25, 16  ;;  %v8456_v63 = vld [vmem:[#allocation11 + $0xea0] ss:$16 sps:$4 sm:$0xff]  }
 0x3b5   :  { %5995 = vmatpush1.bf16.msra.mxu1 %v8444_v30  ;;  %6068 = vmatpush1.bf16.msra.mxu0 %v8447_v21  ;;  %v9796_v22 = vadd.f32 %v3328_v12, %v9679_v15  ;;  %v9799_v33 = vadd.f32 %v3401_v9, %v9681_v5  ;;  %v5481_v30 = vshrl.u32 %v9741_v42, 16  ;;  %v9808_v5 = vld [vmem:[#allocation2 + $0x78] sm:$0xff]  ;;  %v9810_v13 = vld [vmem:[#allocation2 + $0x40] sm:$0xff]  ;;  %v5469_v12 = vrot.slane %v5467_v6, 4 }
 0x3b6   :  { %5996 = vmatprep.subr.bf16.mxu1 %v8452_v31  ;;  %6069 = vmatprep.subr.bf16.mxu0 %v8455_v43  ;;  %v3330_v54 = vpop.f32.mrf.mxu1  ;;  %v3403_v34 = vpop.f32.mrf.mxu0  ;;  %v10422_v9 = vld [vmem:[#allocation29_spill] sm:$0xff]  ;;  %v7463_v42 = vcombine.high %v9808_v5, %v9810_v13 }
 0x3b7   :  { %v9804_v21 = vadd.f32 %v3330_v54, %v2830_v45  ;;  %v9806_v15 = vadd.f32 %v3403_v34, %v2832_v11  ;;  %v8459_v45 = vld [vmem:[#allocation11 + $0xea8] ss:$16 sps:$4 sm:$0xff]   ;;  %v2109_v11 = vadd.f32 %v9601_v59, %v10422_v9  ;;  %v8468_v54 = vld [vmem:[#allocation11 + $0xe8c] ss:$16 sps:$4 sm:$0xff]   ;;  %v5483_v34 = vrot.slane %v5481_v30, 4 }
 0x3b8   :  { %v3334_v31 = vpop.f32.mrf.mxu1  ;;  %v3407_v43 = vpop.f32.mrf.mxu0  ;;  %v8463_v30 = vld [vmem:[#allocation11 + $0xe80] ss:$16 sps:$4 sm:$0xff]  }
 0x3b9   :  { %5997 = vmatpush1.bf16.msra.mxu1 %v8450_v61  ;;  %6070 = vmatpush1.bf16.msra.mxu0 %v8453_v38  ;;  %v9814_v1 = vadd.f32 %v3334_v31, %v9688_v27  ;;  %v9817_v25 = vadd.f32 %v3407_v43, %v9691_v14  ;;  %v8465_v38 = vld [vmem:[#allocation11 + $0xe84] ss:$16 sps:$4 sm:$0xff]   ;;  %v5472_v14 = vrot.slane %v5470_v56, 5  ;;  %v10423_v31 = vld [vmem:[#allocation30_spill] sm:$0xff] }
 0x3ba   :  { %5998 = vmatprep.subr.bf16.mxu1 %v8458_v58  ;;  %6071 = vmatprep.subr.bf16.mxu0 %v8461_v37  ;;  %v3336_v61 = vpop.f32.mrf.mxu1  ;;  %v3409_v27 = vpop.f32.mrf.mxu0  ;;  %v2182_v43 = vadd.f32 %v9603_v36, %v10423_v31  ;;  %v5486_v58 = vrot.slane %v5484_v3, 5  ;;  %v2838_v37 = vadd.f32 %v9709_v28, %v2109_v11  ;;  %v8475_v11 = vld [vmem:[#allocation11 + $0xe6c] ss:$16 sps:$4 sm:$0xff]  }
 0x3bb   :  { %10421 = vst [vmem:[#allocation17_spill] sm:$0xff] %v9817_v25  ;;  %5315 = vmatmul.mubr.bf16.gmra.mxu1 %v7460_v0  ;;  %5388 = vmatmul.mubr.bf16.gmra.mxu0 %v7460_v0  ;;  %v9828_v6 = vadd.f32 %v3336_v61, %v9696_v55  ;;  %v9831_v59 = vadd.f32 %v3409_v27, %v9699_v7  ;;  %v8466_v7 = vld [vmem:[#allocation11 + $0xe88] ss:$16 sps:$4 sm:$0xff]   ;;  %v8472_v0 = vld [vmem:[#allocation11 + $0xe64] ss:$16 sps:$4 sm:$0xff]  }
 0x3bc   :  { %5324 = vmatprep.mubr.bf16.mxu1 %v7463_v42  ;;  %5397 = vmatprep.mubr.bf16.mxu0 %v7463_v42  ;;  %v3338_v9 = vpop.f32.mrf.mxu1  ;;  %v3411_v25 = vpop.f32.mrf.mxu0  ;;  %v2840_v56 = vadd.f32 %v9711_v51, %v2182_v43  ;;  %v5473_v42 = vor.u32 %v5472_v14, %v5469_v12  ;;  %v8733_v27 = vld [vmem:[#allocation2 + $0x98] sm:$0x11]  ;;  %v8470_v14 = vld [vmem:[#allocation11 + $0xe60] ss:$16 sps:$4 sm:$0xff]  }
 0x3bd   :  { %5999 = vmatpush1.bf16.msra.mxu1 %v8456_v63  ;;  %6072 = vmatpush1.bf16.msra.mxu0 %v8459_v45  ;;  %v9836_v36 = vadd.f32 %v3338_v9, %v9704_v8  ;;  %v9839_v55 = vadd.f32 %v3411_v25, %v9707_v18  ;;  %v9845_v63 = vld [vmem:[#allocation2 + $0xa0] sm:$0xff]  ;;  %v9847_v8 = vld [vmem:[#allocation2 + $0x88] sm:$0xff]  ;;  %v5487_v45 = vor.u32 %v5486_v58, %v5483_v34  ;;  %v5476_v31 = vshll.u32 %v8733_v27, 16  ;;  %v10424_v34 = vld [vmem:[#allocation31_spill] sm:$0xff] }
 0x3be   :  { %6000 = vmatprep.subr.bf16.mxu1 %v8465_v38  ;;  %6073 = vmatprep.subr.bf16.mxu0 %v8468_v54  ;;  %v3340_v3 = vpop.f32.mrf.mxu1  ;;  %v3413_v28 = vpop.f32.mrf.mxu0  ;;  %v7462_v54 = vcombine.low %v9808_v5, %v9810_v13  ;;  %v8473_v43 = vld [vmem:[#allocation11 + $0xe68] ss:$16 sps:$4 sm:$0xff]   ;;  %v2119_v58 = vadd.f32 %v9627_v26, %v10424_v34 }
 0x3bf   :  { %v9841_v61 = vadd.f32 %v3340_v3, %v2838_v37  ;;  %v9843_v51 = vadd.f32 %v3413_v28, %v2840_v56  ;;  %v8734_v37 = vld [vmem:[#allocation2 + $0x90] sm:$0x11]  ;;  %v7465_v56 = vcombine.high %v9845_v63, %v9847_v8  ;;  %v5474_v3 = vrot.slane %v5473_v42, 4  ;;  %v10425_v28 = vld [vmem:[#allocation32_spill] sm:$0xff] }
 0x3c0   :  { %v3344_v18 = vpop.f32.mrf.mxu1  ;;  %v3417_v25 = vpop.f32.mrf.mxu0  ;;  %v5490_v9 = vshll.u32 %v8734_v37, 16  ;;  %v5478_v34 = vrot.slane %v5476_v31, 5 }
 0x3c1   :  { %6001 = vmatpush1.bf16.msra.mxu1 %v8463_v30  ;;  %6074 = vmatpush1.bf16.msra.mxu0 %v8466_v7  ;;  %v9850_v38 = vadd.f32 %v3344_v18, %v9714_v2  ;;  %v9853_v12 = vadd.f32 %v3417_v25, %v9717_v41  ;;  %v8480_v7 = vld [vmem:[#allocation11 + $0xe44] ss:$16 sps:$4 sm:$0xff]   ;;  %v8483_v41 = vld [vmem:[#allocation11 + $0xe4c] ss:$16 sps:$4 sm:$0xff]   ;;  %v2192_v18 = vadd.f32 %v9629_v40, %v10425_v28 }
 0x3c2   :  { %6002 = vmatprep.subr.bf16.mxu1 %v8472_v0  ;;  %6075 = vmatprep.subr.bf16.mxu0 %v8475_v11  ;;  %v3346_v2 = vpop.f32.mrf.mxu1  ;;  %v3419_v30 = vpop.f32.mrf.mxu0  ;;  %v5488_v0 = vrot.slane %v5487_v45, 4  ;;  %v2846_v11 = vadd.f32 %v9735_v57, %v2119_v58  ;;  %v5492_v45 = vrot.slane %v5490_v9, 5  ;;  %v7464_v9 = vcombine.low %v9845_v63, %v9847_v8  ;;  %v10426_v28 = vld [vmem:[#allocation33_spill] sm:$0xff] }
 0x3c3   :  { %5325 = vmatmul.mubr.bf16.gmra.mxu1 %v7462_v54  ;;  %5398 = vmatmul.mubr.bf16.gmra.mxu0 %v7462_v54  ;;  %v9864_v25 = vadd.f32 %v3346_v2, %v9722_v39  ;;  %v9867_v26 = vadd.f32 %v3419_v30, %v9725_v4  ;;  %v2848_v42 = vadd.f32 %v9737_v24, %v2192_v18  ;;  %v8478_v4 = vld [vmem:[#allocation11 + $0xe40] ss:$16 sps:$4 sm:$0xff]   ;;  %v8481_v54 = vld [vmem:[#allocation11 + $0xe48] ss:$16 sps:$4 sm:$0xff]   ;;  %v8489_v2 = vld [vmem:[#allocation11 + $0xe2c] ss:$16 sps:$4 sm:$0xff]  }
 0x3c4   :  { %5334 = vmatprep.mubr.bf16.mxu1 %v7465_v56  ;;  %5407 = vmatprep.mubr.bf16.mxu0 %v7465_v56  ;;  %v3348_v27 = vpop.f32.mrf.mxu1  ;;  %v3421_v37 = vpop.f32.mrf.mxu0  ;;  %v8486_v56 = vld [vmem:[#allocation11 + $0xe24] ss:$16 sps:$4 sm:$0xff]   ;;  %v2129_v18 = vadd.f32 %v9651_v53, %v10426_v28  ;;  %v8505_v28 = vld [vmem:[#allocation11 + $0xfc8] ss:$16 sps:$4 sm:$0xff]  }
 0x3c5   :  { %6003 = vmatpush1.bf16.msra.mxu1 %v8470_v14  ;;  %6076 = vmatpush1.bf16.msra.mxu0 %v8473_v43  ;;  %v9872_v40 = vadd.f32 %v3348_v27, %v9730_v52  ;;  %v9875_v39 = vadd.f32 %v3421_v37, %v9733_v29  ;;  %v9883_v52 = vsel %vm9090_vm2, %v5474_v3, %v5478_v34  ;;  %v8487_v3 = vld [vmem:[#allocation11 + $0xe28] ss:$16 sps:$4 sm:$0xff]   ;;  %v8492_v37 = vld [vmem:[#allocation11 + $0xe04] ss:$16 sps:$4 sm:$0xff]   ;;  %v8495_v34 = vld [vmem:[#allocation11 + $0xe0c] ss:$16 sps:$4 sm:$0xff]  }
 0x3c6   :  { %6004 = vmatprep.subr.bf16.mxu1 %v8480_v7  ;;  %6077 = vmatprep.subr.bf16.mxu0 %v8483_v41  ;;  %v3350_v57 = vpop.f32.mrf.mxu1  ;;  %v3423_v58 = vpop.f32.mrf.mxu0  ;;  %v9887_v29 = vsel %vm9090_vm2, %v5488_v0, %v5492_v45  ;;  %v8484_v41 = vld [vmem:[#allocation11 + $0xe20] ss:$16 sps:$4 sm:$0xff]   ;;  %v2854_v53 = vadd.f32 %v9765_v44, %v2129_v18  ;;  %v8510_v18 = vld [vmem:[#allocation11 + $0xfa4] ss:$16 sps:$4 sm:$0xff]  }
 0x3c7   :  { %v9877_v31 = vadd.f32 %v3350_v57, %v2846_v11  ;;  %v9879_v24 = vadd.f32 %v3423_v58, %v2848_v42  ;;  %v7531_v0 = vcombine.high %v9883_v52, %v9887_v29  ;;  %v10427_v42 = vld [vmem:[#allocation34_spill] sm:$0xff] }
 0x3c8   :  { %v3354_v14 = vpop.f32.mrf.mxu1  ;;  %v3427_v43 = vpop.f32.mrf.mxu0 }
 0x3c9   :  { %6005 = vmatpush1.bf16.msra.mxu1 %v8478_v4  ;;  %6078 = vmatpush1.bf16.msra.mxu0 %v8481_v54  ;;  %v9892_v30 = vadd.f32 %v3354_v14, %v9744_v50  ;;  %v9895_v7 = vadd.f32 %v3427_v43, %v9747_v20  ;;  %v2202_v50 = vadd.f32 %v9653_v23, %v10427_v42  ;;  %v8501_v14 = vld [vmem:[#allocation11 + $0xfec] ss:$16 sps:$4 sm:$0xff]   ;;  %v8514_v42 = vld [vmem:[#allocation11 + $0xf80] ss:$16 sps:$4 sm:$0xff]  }
 0x3ca   :  { %6006 = vmatprep.subr.bf16.mxu1 %v8486_v56  ;;  %6079 = vmatprep.subr.bf16.mxu0 %v8489_v2  ;;  %v3356_v11 = vpop.f32.mrf.mxu1  ;;  %v3429_v27 = vpop.f32.mrf.mxu0  ;;  %v8493_v56 = vld [vmem:[#allocation11 + $0xe08] ss:$16 sps:$4 sm:$0xff]   ;;  %v8498_v2 = vld [vmem:[#allocation11 + $0xfe4] ss:$16 sps:$4 sm:$0xff]  }
 0x3cb   :  { %5335 = vmatmul.mubr.bf16.gmra.mxu1 %v7464_v9  ;;  %5408 = vmatmul.mubr.bf16.gmra.mxu0 %v7464_v9  ;;  %v9904_v20 = vadd.f32 %v3356_v11, %v9754_v32  ;;  %v9907_v4 = vadd.f32 %v3429_v27, %v9757_v47  ;;  %v2856_v57 = vadd.f32 %v9767_v60, %v2202_v50  ;;  %v8490_v32 = vld [vmem:[#allocation11 + $0xe00] ss:$16 sps:$4 sm:$0xff]   ;;  %v8511_v27 = vld [vmem:[#allocation11 + $0xfa8] ss:$16 sps:$4 sm:$0xff]  }
 0x3cc   :  { %6026 = vmatprep.mubr.bf16.mxu1 %v7531_v0  ;;  %6099 = vmatprep.mubr.bf16.mxu0 %v7531_v0  ;;  %v3358_v54 = vpop.f32.mrf.mxu1  ;;  %v3431_v45 = vpop.f32.mrf.mxu0  ;;  %v8496_v60 = vld [vmem:[#allocation11 + $0xfe0] ss:$16 sps:$4 sm:$0xff]   ;;  %v8513_v0 = vld [vmem:[#allocation11 + $0xfac] ss:$16 sps:$4 sm:$0xff]   ;;  %v8517_v50 = vld [vmem:[#allocation11 + $0xf88] ss:$16 sps:$4 sm:$0xff]  }
 0x3cd   :  { %6007 = vmatpush1.bf16.msra.mxu1 %v8484_v41  ;;  %6080 = vmatpush1.bf16.msra.mxu0 %v8487_v3  ;;  %v9912_v23 = vadd.f32 %v3358_v54, %v9760_v49  ;;  %v9915_v58 = vadd.f32 %v3431_v45, %v9763_v19  ;;  %v8499_v49 = vld [vmem:[#allocation11 + $0xfe8] ss:$16 sps:$4 sm:$0xff]   ;;  %v8504_v19 = vld [vmem:[#allocation11 + $0xfc4] ss:$16 sps:$4 sm:$0xff]   ;;  %v8507_v41 = vld [vmem:[#allocation11 + $0xfcc] ss:$16 sps:$4 sm:$0xff]  }
 0x3ce   :  { %6008 = vmatprep.subr.bf16.mxu1 %v8492_v37  ;;  %6081 = vmatprep.subr.bf16.mxu0 %v8495_v34  ;;  %v3360_v47 = vpop.f32.mrf.mxu1  ;;  %v3433_v44 = vpop.f32.mrf.mxu0  ;;  %v8502_v3 = vld [vmem:[#allocation11 + $0xfc0] ss:$16 sps:$4 sm:$0xff]   ;;  %v8516_v37 = vld [vmem:[#allocation11 + $0xf84] ss:$16 sps:$4 sm:$0xff]   ;;  %v8519_v34 = vld [vmem:[#allocation11 + $0xf8c] ss:$16 sps:$4 sm:$0xff]  }
 0x3cf   :  { %v9917_v43 = vadd.f32 %v3360_v47, %v2854_v53  ;;  %v9919_v9 = vadd.f32 %v3433_v44, %v2856_v57  ;;  %v8508_v11 = vld [vmem:[#allocation11 + $0xfa0] ss:$16 sps:$4 sm:$0xff]   ;;  %v8522_v53 = vld [vmem:[#allocation11 + $0xf64] ss:$16 sps:$4 sm:$0xff]   ;;  %v8525_v54 = vld [vmem:[#allocation11 + $0xf6c] ss:$16 sps:$4 sm:$0xff]  }
 0x3d0   :  { %v5495_v45 = vshrl.u32 %v9769_v48, 16  ;;  %v5498_v57 = vshll.u32 %v9769_v48, 16  ;;  %v8520_v47 = vld [vmem:[#allocation11 + $0xf60] ss:$16 sps:$4 sm:$0xff]   ;;  %v8523_v44 = vld [vmem:[#allocation11 + $0xf68] ss:$16 sps:$4 sm:$0xff]  }
 0x3d1   :  { %6009 = vmatpush1.bf16.msra.mxu1 %v8490_v32  ;;  %6082 = vmatpush1.bf16.msra.mxu0 %v8493_v56  ;;  %v5509_v32 = vshrl.u32 %v9771_v46, 16  ;;  %v5512_v56 = vshll.u32 %v9771_v46, 16  ;;  %v8529_v48 = vld [vmem:[#allocation11 + $0xf48] ss:$16 sps:$4 sm:$0xff]   ;;  %v8537_v46 = vld [vmem:[#allocation11 + $0xf2c] ss:$16 sps:$4 sm:$0xff]  }
 0x3d2   :  { %6010 = vmatprep.subr.bf16.mxu1 %v8498_v2  ;;  %6083 = vmatprep.subr.bf16.mxu0 %v8501_v14  ;;  %v8528_v2 = vld [vmem:[#allocation11 + $0xf44] ss:$16 sps:$4 sm:$0xff]   ;;  %v8531_v14 = vld [vmem:[#allocation11 + $0xf4c] ss:$16 sps:$4 sm:$0xff]  }
 0x3d5   :  { %6011 = vmatpush2.bf16.msra.mxu1 %v8496_v60  ;;  %6084 = vmatpush2.bf16.msra.mxu0 %v8499_v49  ;;  %v5497_v60 = vrot.slane %v5495_v45, 4  ;;  %v5500_v49 = vrot.slane %v5498_v57, 5  ;;  %v8736_v45 = vld [vmem:[#allocation2 + $0x50] sm:$0x11] }
 0x3d6   :  { %6012 = vmatprep.subr.bf16.mxu1 %v8504_v19  ;;  %6085 = vmatprep.subr.bf16.mxu0 %v8507_v41  ;;  %v5511_v19 = vrot.slane %v5509_v32, 4  ;;  %v5514_v41 = vrot.slane %v5512_v56, 5  ;;  %v5518_v57 = vshll.u32 %v8736_v45, 16  ;;  %v8540_v32 = vld [vmem:[#allocation11 + $0xf04] ss:$16 sps:$4 sm:$0xff]  }
 0x3d7   :  { %v8543_v56 = vld [vmem:[#allocation11 + $0xf0c] ss:$16 sps:$4 sm:$0xff]   ;;  %v8738_v45 = vld [vmem:[#allocation2 + $0xb8] sm:$0x11] }
 0x3d9   :  { %6013 = vmatpush2.bf16.msra.mxu1 %v8502_v3  ;;  %6086 = vmatpush2.bf16.msra.mxu0 %v8505_v28  ;;  %v8526_v3 = vld [vmem:[#allocation11 + $0xf40] ss:$16 sps:$4 sm:$0xff]   ;;  %v8534_v28 = vld [vmem:[#allocation11 + $0xf24] ss:$16 sps:$4 sm:$0xff]  }
 0x3da   :  { %6014 = vmatprep.subr.bf16.mxu1 %v8510_v18  ;;  %6087 = vmatprep.subr.bf16.mxu0 %v8513_v0  ;;  %v5523_v18 = vshrl.u32 %v9808_v5, 16  ;;  %v5526_v0 = vshll.u32 %v9808_v5, 16 }
 0x3dc   :  { %v5528_v5 = vrot.slane %v5526_v0, 5 }
 0x3dd   :  { %6015 = vmatpush2.bf16.msra.mxu1 %v8508_v11  ;;  %6088 = vmatpush2.bf16.msra.mxu0 %v8511_v27  ;;  %v5537_v11 = vshrl.u32 %v9810_v13, 16  ;;  %v5540_v27 = vshll.u32 %v9810_v13, 16 }
 0x3de   :  { %6016 = vmatprep.subr.bf16.mxu1 %v8516_v37  ;;  %6089 = vmatprep.subr.bf16.mxu0 %v8519_v34  ;;  %v5501_v37 = vor.u32 %v5500_v49, %v5497_v60  ;;  %v5515_v34 = vor.u32 %v5514_v41, %v5511_v19  ;;  %v8538_v60 = vld [vmem:[#allocation11 + $0xf00] ss:$16 sps:$4 sm:$0xff]   ;;  %v8541_v49 = vld [vmem:[#allocation11 + $0xf08] ss:$16 sps:$4 sm:$0xff]   ;;  %v5520_v41 = vrot.slane %v5518_v57, 5  ;;  %v5546_v57 = vshll.u32 %v8738_v45, 16 }
 0x3e0   :  { %v5516_v13 = vrot.slane %v5515_v34, 4  ;;  %v5568_v34 = vshll.u32 %v9847_v8, 16 }
 0x3e1   :  { %6017 = vmatpush2.bf16.msra.mxu1 %v8514_v42  ;;  %6090 = vmatpush2.bf16.msra.mxu0 %v8517_v50  ;;  %v8532_v42 = vld [vmem:[#allocation11 + $0xf20] ss:$16 sps:$4 sm:$0xff]   ;;  %v8535_v50 = vld [vmem:[#allocation11 + $0xf28] ss:$16 sps:$4 sm:$0xff]  }
 0x3e2   :  { %6018 = vmatprep.subr.bf16.mxu1 %v8522_v53  ;;  %6091 = vmatprep.subr.bf16.mxu0 %v8525_v54  ;;  %v8735_v53 = vld [vmem:[#allocation2 + $0x70] sm:$0x11] }
 0x3e3   :  { %v5504_v54 = vshll.u32 %v8735_v53, 16 }
 0x3e5   :  { %6019 = vmatpush2.bf16.msra.mxu1 %v8520_v47  ;;  %6092 = vmatpush2.bf16.msra.mxu0 %v8523_v44  ;;  %v5525_v47 = vrot.slane %v5523_v18, 4  ;;  %v5539_v44 = vrot.slane %v5537_v11, 4  ;;  %v5506_v19 = vrot.slane %v5504_v54, 5 }
 0x3e6   :  { %6020 = vmatprep.subr.bf16.mxu1 %v8528_v2  ;;  %6093 = vmatprep.subr.bf16.mxu0 %v8531_v14  ;;  %v5542_v2 = vrot.slane %v5540_v27, 5  ;;  %v5502_v14 = vrot.slane %v5501_v37, 4  ;;  %v5521_v27 = vsel %vm9090_vm2, %v5516_v13, %v5520_v41  ;;  %v5565_v37 = vshrl.u32 %v9847_v8, 16  ;;  %v8547_v8 = vld [vmem:[#allocation11 + $0x10e8] ss:$16 sps:$4 sm:$0xff]  }
 0x3e7   :  { %v5529_v18 = vor.u32 %v5528_v5, %v5525_v47  ;;  %v8544_v47 = vld [vmem:[#allocation11 + $0x10e0] ss:$16 sps:$4 sm:$0xff]   ;;  %v8555_v13 = vld [vmem:[#allocation11 + $0x10cc] ss:$16 sps:$4 sm:$0xff]   ;;  %v5570_v41 = vrot.slane %v5568_v34, 5 }
 0x3e8   :  { %v5543_v0 = vor.u32 %v5542_v2, %v5539_v44  ;;  %v5507_v11 = vsel %vm9090_vm2, %v5502_v14, %v5506_v19  ;;  %v8552_v14 = vld [vmem:[#allocation11 + $0x10c4] ss:$16 sps:$4 sm:$0xff]   ;;  %v5567_v19 = vrot.slane %v5565_v37, 4 }
 0x3e9   :  { %6021 = vmatpush2.bf16.msra.mxu1 %v8526_v3  ;;  %6094 = vmatpush2.bf16.msra.mxu0 %v8529_v48  ;;  %v8546_v3 = vld [vmem:[#allocation11 + $0x10e4] ss:$16 sps:$4 sm:$0xff]   ;;  %v8549_v48 = vld [vmem:[#allocation11 + $0x10ec] ss:$16 sps:$4 sm:$0xff]  }
 0x3ea   :  { %6022 = vmatprep.subr.bf16.mxu1 %v8534_v28  ;;  %6095 = vmatprep.subr.bf16.mxu0 %v8537_v46  ;;  %v5551_v28 = vshrl.u32 %v9845_v63, 16  ;;  %v5554_v46 = vshll.u32 %v9845_v63, 16  ;;  %v8737_v63 = vld [vmem:[#allocation2 + $0x28] sm:$0x11]  ;;  %v5571_v45 = vor.u32 %v5570_v41, %v5567_v19  ;;  %v8567_v19 = vld [vmem:[#allocation11 + $0x108c] ss:$16 sps:$4 sm:$0xff]  }
 0x3eb   :  { %v5532_v54 = vshll.u32 %v8737_v63, 16  ;;  %v8558_v34 = vld [vmem:[#allocation11 + $0x10a4] ss:$16 sps:$4 sm:$0xff]  }
 0x3ec   :  { %v9945_v5 = vrot.slane %v5551_v28, 4 }
 0x3ed   :  { %6023 = vmatpush2.bf16.msra.mxu1 %v8532_v42  ;;  %6096 = vmatpush2.bf16.msra.mxu0 %v8535_v50  ;;  %v7530_v42 = vcombine.low %v9883_v52, %v9887_v29  ;;  %v5556_v52 = vrot.slane %v5554_v46, 5  ;;  %v7533_v29 = vcombine.high %v5507_v11, %v5521_v27  ;;  %v5534_v28 = vrot.slane %v5532_v54, 5 }
 0x3ee   :  { %6024 = vmatprep.subr.bf16.mxu1 %v8540_v32  ;;  %6097 = vmatprep.subr.bf16.mxu0 %v8543_v56 }
 0x3ef   :  { %v5557_v63 = vor.u32 %v5556_v52, %v9945_v5  ;;  %v8559_v52 = vld [vmem:[#allocation11 + $0x10a8] ss:$16 sps:$4 sm:$0xff]  }
 0x3f1   :  { %6025 = vmatpush2.bf16.msra.mxu1 %v8538_v60  ;;  %6098 = vmatpush2.bf16.msra.mxu0 %v8541_v49  ;;  %v4046_v50 = vpop.f32.mrf.mxu1  ;;  %v4119_v53 = vpop.f32.mrf.mxu0  ;;  %v5530_v60 = vrot.slane %v5529_v18, 4  ;;  %v5544_v49 = vrot.slane %v5543_v0, 4  ;;  %v8553_v0 = vld [vmem:[#allocation11 + $0x10c8] ss:$16 sps:$4 sm:$0xff]  }
 0x3f2   :  { %v9940_v32 = vadd.f32 %v4046_v50, %v9776_v17  ;;  %v9943_v56 = vadd.f32 %v4119_v53, %v9779_v16  ;;  %6644 = vmatprep.subr.bf16.mxu1 %v8546_v3  ;;  %6717 = vmatprep.subr.bf16.mxu0 %v8549_v48  ;;  %v8561_v50 = vld [vmem:[#allocation11 + $0x10ac] ss:$16 sps:$4 sm:$0xff]  }
 0x3f3   :  { %v4048_v44 = vpop.f32.mrf.mxu1  ;;  %v4121_v2 = vpop.f32.mrf.mxu0  ;;  %v5535_v53 = vsel %vm9090_vm2, %v5530_v60, %v5534_v28 }
 0x3f4   :  { %6027 = vmatmul.mubr.bf16.vlgmr.msra.gmra.mxu1 %v7530_v42  ;;  %6100 = vmatmul.mubr.bf16.vlgmr.msra.gmra.mxu0 %v7530_v42  ;;  %v9948_v17 = vadd.f32 %v4048_v44, %v9788_v10  ;;  %v9951_v16 = vadd.f32 %v4121_v2, %v9791_v35  ;;  %v8550_v10 = vld [vmem:[#allocation11 + $0x10c0] ss:$16 sps:$4 sm:$0xff]   ;;  %v5548_v42 = vrot.slane %v5546_v57, 5  ;;  %v7532_v57 = vcombine.low %v5507_v11, %v5521_v27 }
 0x3f5   :  { %6036 = vmatprep.mubr.bf16.mxu1 %v7533_v29  ;;  %6109 = vmatprep.mubr.bf16.mxu0 %v7533_v29  ;;  %v4050_v3 = vpop.f32.mrf.mxu1  ;;  %v4123_v48 = vpop.f32.mrf.mxu0  ;;  %v10428_v44 = vld [vmem:[#allocation17_spill] sm:$0xff] }
 0x3f6   :  { %6645 = vmatpush1.bf16.msra.mxu1 %v8544_v47  ;;  %6718 = vmatpush1.bf16.msra.mxu0 %v8547_v8  ;;  %v9954_v46 = vadd.f32 %v4050_v3, %v9796_v22  ;;  %v9957_v18 = vadd.f32 %v4123_v48, %v9799_v33  ;;  %v5549_v54 = vsel %vm9090_vm2, %v5544_v49, %v5548_v42  ;;  %v8739_v2 = vld [vmem:[#allocation2 + $0x60] sm:$0x11]  ;;  %v8564_v49 = vld [vmem:[#allocation11 + $0x1084] ss:$16 sps:$4 sm:$0xff]   ;;  %v5558_v3 = vrot.slane %v5557_v63, 4 }
 0x3f7   :  { %6646 = vmatprep.subr.bf16.mxu1 %v8552_v14  ;;  %6719 = vmatprep.subr.bf16.mxu0 %v8555_v13  ;;  %v4052_v35 = vpop.f32.mrf.mxu1  ;;  %v4125_v37 = vpop.f32.mrf.mxu0  ;;  %v8740_v14 = vld [vmem:[#allocation2 + $0x8] sm:$0x11]  ;;  %v7535_v60 = vcombine.high %v5535_v53, %v5549_v54  ;;  %v5572_v48 = vrot.slane %v5571_v45, 4  ;;  %v8573_v45 = vld [vmem:[#allocation11 + $0x106c] ss:$16 sps:$4 sm:$0xff]  }
 0x3f8   :  { %v9963_v22 = vadd.f32 %v4052_v35, %v9804_v21  ;;  %v9966_v33 = vadd.f32 %v4125_v37, %v9806_v15  ;;  %v8556_v21 = vld [vmem:[#allocation11 + $0x10a0] ss:$16 sps:$4 sm:$0xff]   ;;  %v5560_v15 = vshll.u32 %v8739_v2, 16  ;;  %v5574_v13 = vshll.u32 %v8740_v14, 16  ;;  %v8570_v63 = vld [vmem:[#allocation11 + $0x1064] ss:$16 sps:$4 sm:$0xff]  }
 0x3f9   :  { %v4056_v47 = vpop.f32.mrf.mxu1  ;;  %v4129_v8 = vpop.f32.mrf.mxu0  ;;  %v8562_v35 = vld [vmem:[#allocation11 + $0x1080] ss:$16 sps:$4 sm:$0xff]  }
 0x3fa   :  { %6647 = vmatpush1.bf16.msra.mxu1 %v8550_v10  ;;  %6720 = vmatpush1.bf16.msra.mxu0 %v8553_v0  ;;  %v9971_v29 = vadd.f32 %v4056_v47, %v9814_v1  ;;  %v9974_v5 = vadd.f32 %v4129_v8, %v10428_v44  ;;  %v5562_v37 = vrot.slane %v5560_v15, 5  ;;  %v8568_v2 = vld [vmem:[#allocation11 + $0x1060] ss:$16 sps:$4 sm:$0xff]  }
 0x3fb   :  { %6648 = vmatprep.subr.bf16.mxu1 %v8558_v34  ;;  %6721 = vmatprep.subr.bf16.mxu0 %v8561_v50  ;;  %v4058_v11 = vpop.f32.mrf.mxu1  ;;  %v4131_v27 = vpop.f32.mrf.mxu0  ;;  %v5576_v34 = vrot.slane %v5574_v13, 5 }
 0x3fc   :  { %6037 = vmatmul.mubr.bf16.gmra.mxu1 %v7532_v57  ;;  %6110 = vmatmul.mubr.bf16.gmra.mxu0 %v7532_v57  ;;  %v9977_v1 = vadd.f32 %v4058_v11, %v9828_v6  ;;  %v9980_v41 = vadd.f32 %v4131_v27, %v9831_v59  ;;  %v8565_v6 = vld [vmem:[#allocation11 + $0x1088] ss:$16 sps:$4 sm:$0xff]  }
 0x3fd   :  { %6046 = vmatprep.mubr.bf16.mxu1 %v7535_v60  ;;  %6119 = vmatprep.mubr.bf16.mxu0 %v7535_v60  ;;  %v4060_v28 = vpop.f32.mrf.mxu1  ;;  %v4133_v10 = vpop.f32.mrf.mxu0  ;;  %v8579_v60 = vld [vmem:[#allocation11 + $0x104c] ss:$16 sps:$4 sm:$0xff]  }
 0x3fe   :  { %6649 = vmatpush1.bf16.msra.mxu1 %v8556_v21  ;;  %6722 = vmatpush1.bf16.msra.mxu0 %v8559_v52  ;;  %v9983_v0 = vadd.f32 %v4060_v28, %v9836_v36  ;;  %v9986_v42 = vadd.f32 %v4133_v10, %v9839_v55  ;;  %v5563_v36 = vsel %vm9090_vm2, %v5558_v3, %v5562_v37 }
 0x3ff   :  { %6650 = vmatprep.subr.bf16.mxu1 %v8564_v49  ;;  %6723 = vmatprep.subr.bf16.mxu0 %v8567_v19  ;;  %v4062_v59 = vpop.f32.mrf.mxu1  ;;  %v4135_v50 = vpop.f32.mrf.mxu0  ;;  %v5577_v55 = vsel %vm9090_vm2, %v5572_v48, %v5576_v34  ;;  %v7534_v21 = vcombine.low %v5535_v53, %v5549_v54  ;;  %v8574_v49 = vld [vmem:[#allocation11 + $0x1040] ss:$16 sps:$4 sm:$0xff]   ;;  %v8577_v19 = vld [vmem:[#allocation11 + $0x1048] ss:$16 sps:$4 sm:$0xff]   ;;  %v8585_v48 = vld [vmem:[#allocation11 + $0x102c] ss:$16 sps:$4 sm:$0xff]  }
 0x400   :  { %v9989_v57 = vadd.f32 %v4062_v59, %v9841_v61  ;;  %v9992_v47 = vadd.f32 %v4135_v50, %v9843_v51  ;;  %v8571_v51 = vld [vmem:[#allocation11 + $0x1068] ss:$16 sps:$4 sm:$0xff]   ;;  %v7537_v15 = vcombine.high %v5563_v36, %v5577_v55  ;;  %v8580_v34 = vld [vmem:[#allocation11 + $0x1020] ss:$16 sps:$4 sm:$0xff]  }
 0x401   :  { %v4066_v8 = vpop.f32.mrf.mxu1  ;;  %v4139_v44 = vpop.f32.mrf.mxu0  ;;  %v8583_v59 = vld [vmem:[#allocation11 + $0x1028] ss:$16 sps:$4 sm:$0xff]  }
 0x402   :  { %6651 = vmatpush1.bf16.msra.mxu1 %v8562_v35  ;;  %6724 = vmatpush1.bf16.msra.mxu0 %v8565_v6  ;;  %v9999_v52 = vadd.f32 %v4066_v8, %v9850_v38  ;;  %v10002_v61 = vadd.f32 %v4139_v44, %v9853_v12  ;;  %v7536_v6 = vcombine.low %v5563_v36, %v5577_v55 }
 0x403   :  { %6652 = vmatprep.subr.bf16.mxu1 %v8570_v63  ;;  %6725 = vmatprep.subr.bf16.mxu0 %v8573_v45  ;;  %v4068_v14 = vpop.f32.mrf.mxu1  ;;  %v4141_v13 = vpop.f32.mrf.mxu0  ;;  %v8588_v63 = vld [vmem:[#allocation11 + $0x1004] ss:$16 sps:$4 sm:$0xff]  }
 0x404   :  { %6047 = vmatmul.mubr.bf16.gmra.mxu1 %v7534_v21  ;;  %6120 = vmatmul.mubr.bf16.gmra.mxu0 %v7534_v21  ;;  %v10005_v53 = vadd.f32 %v4068_v14, %v9864_v25  ;;  %v10008_v38 = vadd.f32 %v4141_v13, %v9867_v26  ;;  %v8582_v26 = vld [vmem:[#allocation11 + $0x1024] ss:$16 sps:$4 sm:$0xff]   ;;  %v8586_v21 = vld [vmem:[#allocation11 + $0x1000] ss:$16 sps:$4 sm:$0xff]  }
 0x405   :  { %6056 = vmatprep.mubr.bf16.mxu1 %v7537_v15  ;;  %6129 = vmatprep.mubr.bf16.mxu0 %v7537_v15  ;;  %v4070_v12 = vpop.f32.mrf.mxu1  ;;  %v4143_v54 = vpop.f32.mrf.mxu0  ;;  %v8597_v15 = vld [vmem:[#allocation11 + $0x11ec] ss:$16 sps:$4 sm:$0xff]  }
 0x406   :  { %6653 = vmatpush1.bf16.msra.mxu1 %v8568_v2  ;;  %6726 = vmatpush1.bf16.msra.mxu0 %v8571_v51  ;;  %v10011_v11 = vadd.f32 %v4070_v12, %v9872_v40  ;;  %v10014_v27 = vadd.f32 %v4143_v54, %v9875_v39  ;;  %v8594_v51 = vld [vmem:[#allocation11 + $0x11e4] ss:$16 sps:$4 sm:$0xff]   ;;  %v8598_v12 = vld [vmem:[#allocation11 + $0x11c0] ss:$16 sps:$4 sm:$0xff]   ;;  %v8601_v54 = vld [vmem:[#allocation11 + $0x11c8] ss:$16 sps:$4 sm:$0xff]  }
 0x407   :  { %6654 = vmatprep.subr.bf16.mxu1 %v8576_v62  ;;  %6727 = vmatprep.subr.bf16.mxu0 %v8579_v60  ;;  %v4072_v25 = vpop.f32.mrf.mxu1  ;;  %v4145_v3 = vpop.f32.mrf.mxu0  ;;  %v8595_v62 = vld [vmem:[#allocation11 + $0x11e8] ss:$16 sps:$4 sm:$0xff]   ;;  %v8603_v60 = vld [vmem:[#allocation11 + $0x11cc] ss:$16 sps:$4 sm:$0xff]  }
 0x408   :  { %v10017_v28 = vadd.f32 %v4072_v25, %v9877_v31  ;;  %v10020_v10 = vadd.f32 %v4145_v3, %v9879_v24  ;;  %v8591_v24 = vld [vmem:[#allocation11 + $0x100c] ss:$16 sps:$4 sm:$0xff]   ;;  %v8612_v25 = vld [vmem:[#allocation11 + $0x1184] ss:$16 sps:$4 sm:$0xff]  }
 0x409   :  { %v4076_v35 = vpop.f32.mrf.mxu1  ;;  %v4149_v40 = vpop.f32.mrf.mxu0  ;;  %v8615_v3 = vld [vmem:[#allocation11 + $0x118c] ss:$16 sps:$4 sm:$0xff]  }
 0x40a   :  { %6655 = vmatpush1.bf16.msra.mxu1 %v8574_v49  ;;  %6728 = vmatpush1.bf16.msra.mxu0 %v8577_v19  ;;  %v10023_v39 = vadd.f32 %v4076_v35, %v9892_v30  ;;  %v10026_v37 = vadd.f32 %v4149_v40, %v9895_v7  ;;  %v10429_v30 = vld [vmem:[#allocation20_spill] sm:$0xff]  ;;  %v8606_v49 = vld [vmem:[#allocation11 + $0x11a4] ss:$16 sps:$4 sm:$0xff]  }
 0x40b   :  { %6656 = vmatprep.subr.bf16.mxu1 %v8582_v26  ;;  %6729 = vmatprep.subr.bf16.mxu0 %v8585_v48  ;;  %v4078_v31 = vpop.f32.mrf.mxu1  ;;  %v4151_v50 = vpop.f32.mrf.mxu0  ;;  %v8607_v19 = vld [vmem:[#allocation11 + $0x11a8] ss:$16 sps:$4 sm:$0xff]   ;;  %v8610_v26 = vld [vmem:[#allocation11 + $0x1180] ss:$16 sps:$4 sm:$0xff]   ;;  %v8618_v35 = vld [vmem:[#allocation11 + $0x1164] ss:$16 sps:$4 sm:$0xff]  }
 0x40c   :  { %6057 = vmatmul.mubr.bf16.gmra.mxu1 %v7536_v6  ;;  %6130 = vmatmul.mubr.bf16.gmra.mxu0 %v7536_v6  ;;  %v10029_v45 = vadd.f32 %v4078_v31, %v9904_v20  ;;  %v10032_v36 = vadd.f32 %v4151_v50, %v9907_v4  ;;  %v8589_v20 = vld [vmem:[#allocation11 + $0x1008] ss:$16 sps:$4 sm:$0xff]   ;;  %v8621_v40 = vld [vmem:[#allocation11 + $0x116c] ss:$16 sps:$4 sm:$0xff]   ;;  %v8616_v6 = vld [vmem:[#allocation11 + $0x1160] ss:$16 sps:$4 sm:$0xff]  }
 0x40d   :  { %6676 = vmatprep.mubr.bf16.mxu1 %v10429_v30  ;;  %6749 = vmatprep.mubr.bf16.mxu0 %v10429_v30  ;;  %v4080_v7 = vpop.f32.mrf.mxu1  ;;  %v4153_v55 = vpop.f32.mrf.mxu0  ;;  %v8613_v48 = vld [vmem:[#allocation11 + $0x1188] ss:$16 sps:$4 sm:$0xff]   ;;  %v8627_v31 = vld [vmem:[#allocation11 + $0x114c] ss:$16 sps:$4 sm:$0xff]   ;;  %v8622_v50 = vld [vmem:[#allocation11 + $0x1140] ss:$16 sps:$4 sm:$0xff]  }
 0x40e   :  { %6657 = vmatpush1.bf16.msra.mxu1 %v8580_v34  ;;  %6730 = vmatpush1.bf16.msra.mxu0 %v8583_v59  ;;  %v10037_v8 = vadd.f32 %v4080_v7, %v9912_v23  ;;  %v10040_v44 = vadd.f32 %v4153_v55, %v9915_v58  ;;  %v8592_v23 = vld [vmem:[#allocation11 + $0x11e0] ss:$16 sps:$4 sm:$0xff]   ;;  %v8600_v58 = vld [vmem:[#allocation11 + $0x11c4] ss:$16 sps:$4 sm:$0xff]   ;;  %v8619_v34 = vld [vmem:[#allocation11 + $0x1168] ss:$16 sps:$4 sm:$0xff]  }
 0x40f   :  { %6658 = vmatprep.subr.bf16.mxu1 %v8588_v63  ;;  %6731 = vmatprep.subr.bf16.mxu0 %v8591_v24  ;;  %v4082_v4 = vpop.f32.mrf.mxu1  ;;  %v4155_v2 = vpop.f32.mrf.mxu0  ;;  %v8624_v59 = vld [vmem:[#allocation11 + $0x1144] ss:$16 sps:$4 sm:$0xff]   ;;  %v8625_v63 = vld [vmem:[#allocation11 + $0x1148] ss:$16 sps:$4 sm:$0xff]   ;;  %v8633_v30 = vld [vmem:[#allocation11 + $0x112c] ss:$16 sps:$4 sm:$0xff]  }
 0x410   :  { %v10043_v14 = vadd.f32 %v4082_v4, %v9917_v43  ;;  %v10046_v13 = vadd.f32 %v4155_v2, %v9919_v9  ;;  %v8609_v43 = vld [vmem:[#allocation11 + $0x11ac] ss:$16 sps:$4 sm:$0xff]   ;;  %v8604_v9 = vld [vmem:[#allocation11 + $0x11a0] ss:$16 sps:$4 sm:$0xff]   ;;  %v8630_v24 = vld [vmem:[#allocation11 + $0x1124] ss:$16 sps:$4 sm:$0xff]  }
 0x411   :  { %v8628_v7 = vld [vmem:[#allocation11 + $0x1120] ss:$16 sps:$4 sm:$0xff]   ;;  %v8631_v55 = vld [vmem:[#allocation11 + $0x1128] ss:$16 sps:$4 sm:$0xff]  }
 0x412   :  { %6659 = vmatpush1.bf16.msra.mxu1 %v8586_v21  ;;  %6732 = vmatpush1.bf16.msra.mxu0 %v8589_v20  ;;  %v8636_v21 = vld [vmem:[#allocation11 + $0x1104] ss:$16 sps:$4 sm:$0xff]   ;;  %v8639_v20 = vld [vmem:[#allocation11 + $0x110c] ss:$16 sps:$4 sm:$0xff]   ;;  %v8634_v4 = vld [vmem:[#allocation11 + $0x1100] ss:$16 sps:$4 sm:$0xff]  }
 0x413   :  { %6660 = vmatprep.subr.bf16.mxu1 %v8594_v51  ;;  %6733 = vmatprep.subr.bf16.mxu0 %v8597_v15  ;;  %v8637_v2 = vld [vmem:[#allocation11 + $0x1108] ss:$16 sps:$4 sm:$0xff]  }
 0x416   :  { %6661 = vmatpush2.bf16.msra.mxu1 %v8592_v23  ;;  %6734 = vmatpush2.bf16.msra.mxu0 %v8595_v62 }
 0x417   :  { %6662 = vmatprep.subr.bf16.mxu1 %v8600_v58  ;;  %6735 = vmatprep.subr.bf16.mxu0 %v8603_v60 }
 0x41a   :  { %6663 = vmatpush2.bf16.msra.mxu1 %v8598_v12  ;;  %6736 = vmatpush2.bf16.msra.mxu0 %v8601_v54  ;;  %v10430_v12 = vld [vmem:[#allocation19_spill] sm:$0xff] }
 0x41b   :  { %6664 = vmatprep.subr.bf16.mxu1 %v8606_v49  ;;  %6737 = vmatprep.subr.bf16.mxu0 %v8609_v43  ;;  %v10431_v43 = vld [vmem:[#allocation22_spill] sm:$0xff] }
 0x41e   :  { %6665 = vmatpush2.bf16.msra.mxu1 %v8604_v9  ;;  %6738 = vmatpush2.bf16.msra.mxu0 %v8607_v19 }
 0x41f   :  { %6666 = vmatprep.subr.bf16.mxu1 %v8612_v25  ;;  %6739 = vmatprep.subr.bf16.mxu0 %v8615_v3 }
 0x422   :  { %6667 = vmatpush2.bf16.msra.mxu1 %v8610_v26  ;;  %6740 = vmatpush2.bf16.msra.mxu0 %v8613_v48 }
 0x423   :  { %6668 = vmatprep.subr.bf16.mxu1 %v8618_v35  ;;  %6741 = vmatprep.subr.bf16.mxu0 %v8621_v40 }
 0x426   :  { %6669 = vmatpush2.bf16.msra.mxu1 %v8616_v6  ;;  %6742 = vmatpush2.bf16.msra.mxu0 %v8619_v34  ;;  %v10433_v34 = vld [vmem:[#allocation24_spill] sm:$0xff] }
 0x427   :  { %6670 = vmatprep.subr.bf16.mxu1 %v8624_v59  ;;  %6743 = vmatprep.subr.bf16.mxu0 %v8627_v31 }
 0x42a   :  { %6671 = vmatpush2.bf16.msra.mxu1 %v8622_v50  ;;  %6744 = vmatpush2.bf16.msra.mxu0 %v8625_v63 }
 0x42b   :  { %6672 = vmatprep.subr.bf16.mxu1 %v8630_v24  ;;  %6745 = vmatprep.subr.bf16.mxu0 %v8633_v30 }
 0x42e   :  { %6673 = vmatpush2.bf16.msra.mxu1 %v8628_v7  ;;  %6746 = vmatpush2.bf16.msra.mxu0 %v8631_v55 }
 0x42f   :  { %6674 = vmatprep.subr.bf16.mxu1 %v8636_v21  ;;  %6747 = vmatprep.subr.bf16.mxu0 %v8639_v20  ;;  %v10436_v20 = vld [vmem:[#allocation26_spill] sm:$0xff] }
 0x432   :  { %6675 = vmatpush2.bf16.msra.mxu1 %v8634_v4  ;;  %6748 = vmatpush2.bf16.msra.mxu0 %v8637_v2  ;;  %v4696_v51 = vpop.f32.mrf.mxu1  ;;  %v4769_v15 = vpop.f32.mrf.mxu0 }
 0x433   :  { %v10049_v23 = vadd.f32 %v4696_v51, %v9940_v32  ;;  %v10052_v62 = vadd.f32 %v4769_v15, %v9943_v56 }
 0x434   :  { %v4698_v58 = vpop.f32.mrf.mxu1  ;;  %v4771_v60 = vpop.f32.mrf.mxu0 }
 0x435   :  { %6677 = vmatmul.mubr.bf16.vlgmr.msra.gmra.mxu1 %v10430_v12  ;;  %6750 = vmatmul.mubr.bf16.vlgmr.msra.gmra.mxu0 %v10430_v12  ;;  %v10057_v54 = vadd.f32 %v4698_v58, %v9948_v17  ;;  %v10060_v49 = vadd.f32 %v4771_v60, %v9951_v16 }
 0x436   :  { %6686 = vmatprep.mubr.bf16.mxu1 %v10431_v43  ;;  %6759 = vmatprep.mubr.bf16.mxu0 %v10431_v43  ;;  %v4700_v32 = vpop.f32.mrf.mxu1  ;;  %v4773_v9 = vpop.f32.mrf.mxu0 }
 0x437   :  { %v10065_v56 = vadd.f32 %v4700_v32, %v9954_v46  ;;  %v10068_v19 = vadd.f32 %v4773_v9, %v9957_v18  ;;  %v10432_v18 = vld [vmem:[#allocation21_spill] sm:$0xff] }
 0x438   :  { %v4702_v25 = vpop.f32.mrf.mxu1  ;;  %v4775_v3 = vpop.f32.mrf.mxu0 }
 0x439   :  { %v10071_v17 = vadd.f32 %v4702_v25, %v9963_v22  ;;  %v10074_v16 = vadd.f32 %v4775_v3, %v9966_v33 }
 0x43a   :  { %v4706_v26 = vpop.f32.mrf.mxu1  ;;  %v4779_v48 = vpop.f32.mrf.mxu0 }
 0x43b   :  { %v10077_v35 = vadd.f32 %v4706_v26, %v9971_v29  ;;  %v10080_v40 = vadd.f32 %v4779_v48, %v9974_v5 }
 0x43c   :  { %v4708_v46 = vpop.f32.mrf.mxu1  ;;  %v4781_v6 = vpop.f32.mrf.mxu0 }
 0x43d   :  { %6687 = vmatmul.mubr.bf16.gmra.mxu1 %v10432_v18  ;;  %6760 = vmatmul.mubr.bf16.gmra.mxu0 %v10432_v18  ;;  %v10085_v22 = vadd.f32 %v4708_v46, %v9977_v1  ;;  %v10088_v33 = vadd.f32 %v4781_v6, %v9980_v41 }
 0x43e   :  { %6696 = vmatprep.mubr.bf16.mxu1 %v10433_v34  ;;  %6769 = vmatprep.mubr.bf16.mxu0 %v10433_v34  ;;  %v4710_v29 = vpop.f32.mrf.mxu1  ;;  %v4783_v59 = vpop.f32.mrf.mxu0 }
 0x43f   :  { %v10093_v5 = vadd.f32 %v4710_v29, %v9983_v0  ;;  %v10096_v31 = vadd.f32 %v4783_v59, %v9986_v42  ;;  %v10434_v42 = vld [vmem:[#allocation23_spill] sm:$0xff] }
 0x440   :  { %v4712_v50 = vpop.f32.mrf.mxu1  ;;  %v4785_v63 = vpop.f32.mrf.mxu0 }
 0x441   :  { %v10099_v1 = vadd.f32 %v4712_v50, %v9989_v57  ;;  %v10102_v41 = vadd.f32 %v4785_v63, %v9992_v47 }
 0x442   :  { %v4716_v24 = vpop.f32.mrf.mxu1  ;;  %v4789_v30 = vpop.f32.mrf.mxu0 }
 0x443   :  { %v10105_v7 = vadd.f32 %v4716_v24, %v9999_v52  ;;  %v10108_v55 = vadd.f32 %v4789_v30, %v10002_v61 }
 0x444   :  { %v4718_v0 = vpop.f32.mrf.mxu1  ;;  %v4791_v21 = vpop.f32.mrf.mxu0 }
 0x445   :  { %6697 = vmatmul.mubr.bf16.gmra.mxu1 %v10434_v42  ;;  %6770 = vmatmul.mubr.bf16.gmra.mxu0 %v10434_v42  ;;  %v10113_v57 = vadd.f32 %v4718_v0, %v10005_v53  ;;  %v10116_v47 = vadd.f32 %v4791_v21, %v10008_v38 }
 0x446   :  { %6706 = vmatprep.mubr.bf16.mxu1 %v10436_v20  ;;  %6779 = vmatprep.mubr.bf16.mxu0 %v10436_v20  ;;  %v4720_v52 = vpop.f32.mrf.mxu1  ;;  %v4793_v4 = vpop.f32.mrf.mxu0 }
 0x447   :  { %10435 = vst [vmem:[#allocation18_spill] sm:$0xff] %v10116_v47  ;;  %v10121_v61 = vadd.f32 %v4720_v52, %v10011_v11  ;;  %v10124_v2 = vadd.f32 %v4793_v4, %v10014_v27  ;;  %v10443_v27 = vld [vmem:[#allocation25_spill] sm:$0xff] }
 0x448   :  { %v4722_v51 = vpop.f32.mrf.mxu1  ;;  %v4795_v15 = vpop.f32.mrf.mxu0 }
 0x449   :  { %10437 = vst [vmem:[#allocation27_spill] sm:$0xff] %v10121_v61  ;;  %10438 = vst [vmem:[#allocation35_spill] sm:$0xff] %v10124_v2  ;;  %v10127_v53 = vadd.f32 %v4722_v51, %v10017_v28  ;;  %v10130_v38 = vadd.f32 %v4795_v15, %v10020_v10 }
 0x44a   :  { %v4726_v58 = vpop.f32.mrf.mxu1  ;;  %v4799_v60 = vpop.f32.mrf.mxu0 }
 0x44b   :  { %10439 = vst [vmem:[#allocation28_spill] sm:$0xff] %v10127_v53  ;;  %10440 = vst [vmem:[#allocation36_spill] sm:$0xff] %v10130_v38  ;;  %v10133_v12 = vadd.f32 %v4726_v58, %v10023_v39  ;;  %v10136_v43 = vadd.f32 %v4799_v60, %v10026_v37 }
 0x44c   :  { %v4728_v11 = vpop.f32.mrf.mxu1  ;;  %v4801_v32 = vpop.f32.mrf.mxu0 }
 0x44d   :  { %10441 = vst [vmem:[#allocation29_spill] sm:$0xff] %v10133_v12  ;;  %10442 = vst [vmem:[#allocation30_spill] sm:$0xff] %v10136_v43  ;;  %6707 = vmatmul.mubr.bf16.gmra.mxu1 %v10443_v27  ;;  %6780 = vmatmul.mubr.bf16.gmra.mxu0 %v10443_v27  ;;  %v10141_v28 = vadd.f32 %v4728_v11, %v10029_v45  ;;  %v10144_v10 = vadd.f32 %v4801_v32, %v10032_v36 }
 0x44e   :  { %v4730_v9 = vpop.f32.mrf.mxu1  ;;  %v4803_v25 = vpop.f32.mrf.mxu0 }
 0x44f   :  { %10444 = vst [vmem:[#allocation31_spill] sm:$0xff] %v10141_v28  ;;  %10445 = vst [vmem:[#allocation32_spill] sm:$0xff] %v10144_v10  ;;  %v10147_v39 = vadd.f32 %v4730_v9, %v10037_v8  ;;  %v10150_v37 = vadd.f32 %v4803_v25, %v10040_v44 }
 0x450   :  { %v4732_v3 = vpop.f32.mrf.mxu1  ;;  %v4805_v26 = vpop.f32.mrf.mxu0 }
 0x451   :  { %10446 = vst [vmem:[#allocation33_spill] sm:$0xff] %v10147_v39  ;;  %10447 = vst [vmem:[#allocation34_spill] sm:$0xff] %v10150_v37  ;;  %v10153_v48 = vadd.f32 %v4732_v3, %v10043_v14  ;;  %v10156_v46 = vadd.f32 %v4805_v26, %v10046_v13 }
 0x453   :  { %10448 = vst [vmem:[#allocation17_spill] sm:$0xff] %v10153_v48  ;;  %10449 = vst [vmem:[#allocation20_spill] sm:$0xff] %v10156_v46 }
 0x473   :  { %v10158_v45 = vpop.f32.mrf.mxu1  ;;  %v10160_v36 = vpop.f32.mrf.mxu0 }
 0x475   :  { %v10162_v6 = vpop.f32.mrf.mxu1  ;;  %v10164_v18 = vpop.f32.mrf.mxu0 }
 0x477   :  { %v10166_v8 = vpop.f32.mrf.mxu1  ;;  %v10168_v44 = vpop.f32.mrf.mxu0 }
 0x479   :  { %v10170_v34 = vpop.f32.mrf.mxu1  ;;  %v10172_v29 = vpop.f32.mrf.mxu0 }
 0x47b   :  { %v10174_v14 = vpop.f32.mrf.mxu1  ;;  %v10176_v13 = vpop.f32.mrf.mxu0 }
 0x47d   :  { %v10178_v59 = vpop.f32.mrf.mxu1  ;;  %v10180_v50 = vpop.f32.mrf.mxu0 }
 0x47f   :  { %v10182_v63 = vpop.f32.mrf.mxu1  ;;  %v10184_v24 = vpop.f32.mrf.mxu0 }
 0x481   :  { %v10186_v30 = vpop.f32.mrf.mxu1  ;;  %v10188_v0 = vpop.f32.mrf.mxu0 }
 0x483   :  { %v10190_v21 = vpop.f32.mrf.mxu1  ;;  %v10192_v42 = vpop.f32.mrf.mxu0 }
 0x485   :  { %v10194_v20 = vpop.f32.mrf.mxu1  ;;  %v10196_v52 = vpop.f32.mrf.mxu0 }
 0x486   :  { %10450 = vst [vmem:[#allocation19_spill] sm:$0xff] %v10194_v20  ;;  %10451 = vst [vmem:[#allocation22_spill] sm:$0xff] %v10196_v52 }
 0x487   :  { %v10198_v4 = vpop.f32.mrf.mxu1  ;;  %v10200_v51 = vpop.f32.mrf.mxu0 }
 0x488   :  { %10452 = vst [vmem:[#allocation21_spill] sm:$0xff] %v10198_v4  ;;  %10453 = vst [vmem:[#allocation24_spill] sm:$0xff] %v10200_v51 }
 0x489   :  { %v10202_v15 = vpop.f32.mrf.mxu1  ;;  %v10204_v58 = vpop.f32.mrf.mxu0 }
 0x48a   :  { %10454 = vst [vmem:[#allocation23_spill] sm:$0xff] %v10202_v15  ;;  %10455 = vst [vmem:[#allocation26_spill] sm:$0xff] %v10204_v58 }
 0x48b   :  { %v10206_v60 = vpop.f32.mrf.mxu1  ;;  %v10208_v11 = vpop.f32.mrf.mxu0 }
 0x48c   :  { %10456 = vst [vmem:[#allocation25_spill] sm:$0xff] %v10206_v60  ;;  %10457 = vst [vmem:[#allocation37_spill] sm:$0xff] %v10208_v11 }
 0x48d   :  { %v10210_v32 = vpop.f32.mrf.mxu1  ;;  %v10212_v27 = vpop.f32.mrf.mxu0 }
 0x48e   :  { %10458 = vst [vmem:[#allocation38_spill] sm:$0xff] %v10210_v32  ;;  %10459 = vst [vmem:[#allocation39_spill] sm:$0xff] %v10212_v27 }
 0x48f   :  { %v10214_v9 = vpop.f32.mrf.mxu1  ;;  %v10216_v25 = vpop.f32.mrf.mxu0 }
 0x490   :  { %10460 = vst [vmem:[#allocation40_spill] sm:$0xff] %v10214_v9  ;;  %10461 = vst [vmem:[#allocation41_spill] sm:$0xff] %v10216_v25 }
 0x491   :  { %v10218_v3 = vpop.f32.mrf.mxu1  ;;  %v10220_v26 = vpop.f32.mrf.mxu0 }
 0x492   :  { %10462 = vst [vmem:[#allocation42_spill] sm:$0xff] %v10218_v3  ;;  %10463 = vst [vmem:[#allocation43_spill] sm:$0xff] %v10220_v26 }
 0x4b4   :  { %v6028_v46 = vpop.f32.mrf.mxu1  ;;  %v6101_v48 = vpop.f32.mrf.mxu0 }
 0x4b6   :  { %v6030_v37 = vpop.f32.mrf.mxu1  ;;  %v6103_v39 = vpop.f32.mrf.mxu0 }
 0x4b8   :  { %v6032_v10 = vpop.f32.mrf.mxu1  ;;  %v6105_v28 = vpop.f32.mrf.mxu0 }
 0x4ba   :  { %v6034_v43 = vpop.f32.mrf.mxu1  ;;  %v6107_v11 = vpop.f32.mrf.mxu0 }
 0x4bc   :  { %v10222_v60 = vpop.f32.mrf.mxu1  ;;  %v10224_v32 = vpop.f32.mrf.mxu0 }
 0x4be   :  { %v10226_v27 = vpop.f32.mrf.mxu1  ;;  %v10228_v9 = vpop.f32.mrf.mxu0 }
 0x4c0   :  { %v10230_v25 = vpop.f32.mrf.mxu1  ;;  %v10232_v3 = vpop.f32.mrf.mxu0 }
 0x4c2   :  { %v10234_v26 = vpop.f32.mrf.mxu1  ;;  %v10236_v12 = vpop.f32.mrf.mxu0 }
 0x4c4   :  { %v10238_v58 = vpop.f32.mrf.mxu1  ;;  %v10240_v38 = vpop.f32.mrf.mxu0 }
 0x4c5   :  { %10464 = vst [vmem:[#allocation44_spill] sm:$0xff] %v10238_v58  ;;  %10465 = vst [vmem:[#allocation45_spill] sm:$0xff] %v10240_v38 }
 0x4c6   :  { %v10242_v15 = vpop.f32.mrf.mxu1  ;;  %v10244_v53 = vpop.f32.mrf.mxu0 }
 0x4c7   :  { %10466 = vst [vmem:[#allocation46_spill] sm:$0xff] %v10242_v15  ;;  %10467 = vst [vmem:[#allocation47_spill] sm:$0xff] %v10244_v53 }
 0x4c8   :  { %v10246_v51 = vpop.f32.mrf.mxu1  ;;  %v10248_v2 = vpop.f32.mrf.mxu0 }
 0x4c9   :  { %10468 = vst [vmem:[#allocation48_spill] sm:$0xff] %v10246_v51  ;;  %10469 = vst [vmem:[#allocation49_spill] sm:$0xff] %v10248_v2 }
 0x4ca   :  { %v10250_v4 = vpop.f32.mrf.mxu1  ;;  %v10252_v61 = vpop.f32.mrf.mxu0 }
 0x4cb   :  { %10470 = vst [vmem:[#allocation50_spill] sm:$0xff] %v10250_v4  ;;  %10471 = vst [vmem:[#allocation51_spill] sm:$0xff] %v10252_v61  ;;  %v5418_v4 = vadd.f32 %v10158_v45, %v10049_v23  ;;  %v5424_v23 = vadd.f32 %v10168_v44, %v10068_v19 }
 0x4cc   :  { %v10254_v52 = vpop.f32.mrf.mxu1  ;;  %v10256_v47 = vpop.f32.mrf.mxu0 }
 0x4cd   :  { %10472 = vst [vmem:[#allocation52_spill] sm:$0xff] %v10254_v52  ;;  %10473 = vst [vmem:[#allocation53_spill] sm:$0xff] %v10256_v47  ;;  %v5420_v52 = vadd.f32 %v10160_v36, %v10052_v62  ;;  %v5419_v47 = vadd.f32 %v10162_v6, %v10057_v54  ;;  %v6140_v61 = vadd.f32 %v6028_v46, %v5418_v4 }
 0x4ce   :  { %v10258_v20 = vpop.f32.mrf.mxu1  ;;  %v10260_v58 = vpop.f32.mrf.mxu0  ;;  %v5423_v62 = vadd.f32 %v10170_v34, %v10071_v17  ;;  %v5425_v54 = vadd.f32 %v10172_v29, %v10074_v16  ;;  %v5426_v17 = vadd.f32 %v10174_v14, %v10077_v35  ;;  %v5428_v16 = vadd.f32 %v10176_v13, %v10080_v40 }
 0x4cf   :  { %10474 = vst [vmem:[#allocation54_spill] sm:$0xff] %v10258_v20  ;;  %10475 = vst [vmem:[#allocation55_spill] sm:$0xff] %v10260_v58  ;;  %v5421_v58 = vadd.f32 %v10164_v18, %v10060_v49  ;;  %v6141_v2 = vadd.f32 %v6030_v37, %v5419_v47  ;;  %v5433_v4 = vadd.f32 %v10188_v0, %v10102_v41 }
 0x4d0   :  { %v10262_v38 = vpop.f32.mrf.mxu1  ;;  %v10264_v15 = vpop.f32.mrf.mxu0  ;;  %v6148_v34 = vadd.f32 %v10222_v60, %v5426_v17  ;;  %v6150_v35 = vadd.f32 %v10224_v32, %v5428_v16  ;;  %v5434_v0 = vadd.f32 %v10190_v21, %v10105_v7  ;;  %v10484_v7 = vld [vmem:[#allocation45_spill] sm:$0xff]  ;;  %v10489_v17 = vld [vmem:[#allocation35_spill] sm:$0xff]  ;;  %v10490_v16 = vld [vmem:[#allocation24_spill] sm:$0xff] }
 0x4d1   :  { %10476 = vst [vmem:[#allocation56_spill] sm:$0xff] %v10262_v38  ;;  %10477 = vst [vmem:[#allocation57_spill] sm:$0xff] %v10264_v15  ;;  %v6142_v15 = vadd.f32 %v6101_v48, %v5420_v52 }
 0x4d2   :  { %v10266_v53 = vpop.f32.mrf.mxu1  ;;  %v10268_v51 = vpop.f32.mrf.mxu0 }
 0x4d3   :  { %10478 = vst [vmem:[#allocation58_spill] sm:$0xff] %v10266_v53  ;;  %10479 = vst [vmem:[#allocation59_spill] sm:$0xff] %v10268_v51  ;;  %v6143_v53 = vadd.f32 %v6103_v39, %v5421_v58  ;;  %v5422_v51 = vadd.f32 %v10166_v8, %v10065_v56  ;;  %v6146_v39 = vadd.f32 %v6105_v28, %v5424_v23  ;;  %v10480_v23 = vld [vmem:[#allocation19_spill] sm:$0xff] }
 0x4d4   :  { %v6145_v56 = vadd.f32 %v6034_v43, %v5423_v62  ;;  %v6147_v8 = vadd.f32 %v6107_v11, %v5425_v54  ;;  %v5435_v62 = vadd.f32 %v10480_v23, %v10113_v57  ;;  %v10482_v54 = vld [vmem:[#allocation22_spill] sm:$0xff]  ;;  %v10486_v57 = vld [vmem:[#allocation47_spill] sm:$0xff] }
 0x4d5   :  { %v6144_v47 = vadd.f32 %v6032_v10, %v5422_v51 }
 0x4f5   :  { %v6678_v20 = vpop.f32.mrf.mxu1  ;;  %v6751_v38 = vpop.f32.mrf.mxu0 }
 0x4f6   :  { %v6790_v36 = vadd.f32 %v6678_v20, %v6140_v61  ;;  %v6792_v6 = vadd.f32 %v6751_v38, %v6142_v15  ;;  %v5427_v61 = vadd.f32 %v10178_v59, %v10085_v22  ;;  %v5430_v59 = vadd.f32 %v10182_v63, %v10093_v5 }
 0x4f7   :  { %v6680_v45 = vpop.f32.mrf.mxu1  ;;  %v6753_v49 = vpop.f32.mrf.mxu0  ;;  %v5431_v20 = vadd.f32 %v10186_v30, %v10099_v1  ;;  %v6155_v1 = vadd.f32 %v10236_v12, %v5433_v4  ;;  %v10497_v4 = vld [vmem:[#allocation50_spill] sm:$0xff] }
 0x4f8   :  { %v6791_v46 = vadd.f32 %v6680_v45, %v6141_v2  ;;  %v6793_v48 = vadd.f32 %v6753_v49, %v6143_v53  ;;  %v5429_v2 = vadd.f32 %v10180_v50, %v10088_v33  ;;  %v6149_v14 = vadd.f32 %v10226_v27, %v5427_v61 }
 0x4f9   :  { %v6682_v37 = vpop.f32.mrf.mxu1  ;;  %v6755_v18 = vpop.f32.mrf.mxu0  ;;  %v5432_v50 = vadd.f32 %v10184_v24, %v10096_v31  ;;  %v6152_v27 = vadd.f32 %v10230_v25, %v5430_v59  ;;  %v6153_v24 = vadd.f32 %v10234_v26, %v5431_v20  ;;  %v10481_v25 = vld [vmem:[#allocation18_spill] sm:$0xff]  ;;  %v5440_v61 = vadd.f32 %v10490_v16, %v10489_v17 }
 0x4fa   :  { %v7706_v52 = vpack.c.bf16 %v6791_v46, %v6790_v36  ;;  %v7707_v19 = vpack.c.bf16 %v6793_v48, %v6792_v6  ;;  %v6794_v43 = vadd.f32 %v6682_v37, %v6144_v47  ;;  %v6796_v28 = vadd.f32 %v6755_v18, %v6146_v39  ;;  %v10483_v46 = vld [vmem:[#allocation44_spill] sm:$0xff]  ;;  %v10516_v17 = vld [vmem:[#allocation42_spill] sm:$0xff] }
 0x4fb   :  { %v6684_v53 = vpop.f32.mrf.mxu1  ;;  %v6757_v38 = vpop.f32.mrf.mxu0  ;;  %v6151_v22 = vadd.f32 %v10228_v9, %v5429_v2  ;;  %v6154_v5 = vadd.f32 %v10232_v3, %v5432_v50  ;;  %v5436_v9 = vadd.f32 %v10192_v42, %v10108_v55  ;;  %v5437_v3 = vadd.f32 %v10482_v54, %v10481_v25  ;;  %v10485_v42 = vld [vmem:[#allocation46_spill] sm:$0xff]  ;;  %v10491_v2 = vld [vmem:[#allocation28_spill] sm:$0xff] }
 0x4fc   :  { %6950 = vst [vmem:[#allocation12] sm:$0xff] %v7706_v52  ;;  %6951 = vst [vmem:[#allocation12 + $0x8] sm:$0xff] %v7707_v19  ;;  %v6795_v10 = vadd.f32 %v6684_v53, %v6145_v56  ;;  %v6797_v44 = vadd.f32 %v6757_v38, %v6147_v8  ;;  %v6156_v48 = vadd.f32 %v10483_v46, %v5434_v0  ;;  %v10487_v8 = vld [vmem:[#allocation27_spill] sm:$0xff]  ;;  %v10488_v52 = vld [vmem:[#allocation21_spill] sm:$0xff] }
 0x4fd   :  { %v6688_v29 = vpop.f32.mrf.mxu1  ;;  %v6761_v40 = vpop.f32.mrf.mxu0  ;;  %v6158_v21 = vadd.f32 %v10484_v7, %v5436_v9  ;;  %v6157_v39 = vadd.f32 %v10485_v42, %v5435_v62  ;;  %v6159_v37 = vadd.f32 %v10486_v57, %v5437_v3  ;;  %v5438_v19 = vadd.f32 %v10488_v52, %v10487_v8  ;;  %v10492_v53 = vld [vmem:[#allocation23_spill] sm:$0xff]  ;;  %v10505_v0 = vld [vmem:[#allocation32_spill] sm:$0xff]  ;;  %v10509_v7 = vld [vmem:[#allocation54_spill] sm:$0xff] }
 0x4fe   :  { %v7708_v13 = vpack.c.bf16 %v6795_v10, %v6794_v43  ;;  %v7709_v33 = vpack.c.bf16 %v6797_v44, %v6796_v28  ;;  %v6798_v58 = vadd.f32 %v6688_v29, %v6148_v34  ;;  %v6800_v60 = vadd.f32 %v6761_v40, %v6150_v35  ;;  %v10493_v43 = vld [vmem:[#allocation36_spill] sm:$0xff]  ;;  %v10494_v28 = vld [vmem:[#allocation26_spill] sm:$0xff]  ;;  %v10506_v9 = vld [vmem:[#allocation39_spill] sm:$0xff] }
 0x4ff   :  { %v6690_v51 = vpop.f32.mrf.mxu1  ;;  %v6763_v15 = vpop.f32.mrf.mxu0  ;;  %v5439_v38 = vadd.f32 %v10492_v53, %v10491_v2  ;;  %v5441_v10 = vadd.f32 %v10494_v28, %v10493_v43  ;;  %v5445_v23 = vadd.f32 %v10506_v9, %v10505_v0  ;;  %v10511_v57 = vld [vmem:[#allocation33_spill] sm:$0xff]  ;;  %v10518_v2 = vld [vmem:[#allocation43_spill] sm:$0xff] }
 0x500   :  { %6952 = vst [vmem:[#allocation12 + $0x10] sm:$0xff] %v7708_v13  ;;  %6953 = vst [vmem:[#allocation12 + $0x18] sm:$0xff] %v7709_v33  ;;  %v6799_v11 = vadd.f32 %v6690_v51, %v6149_v14  ;;  %v6801_v32 = vadd.f32 %v6763_v15, %v6151_v22  ;;  %v10495_v22 = vld [vmem:[#allocation48_spill] sm:$0xff]  ;;  %v10496_v33 = vld [vmem:[#allocation49_spill] sm:$0xff] }
 0x501   :  { %v6692_v63 = vpop.f32.mrf.mxu1  ;;  %v6765_v31 = vpop.f32.mrf.mxu0  ;;  %v6160_v13 = vadd.f32 %v10495_v22, %v5438_v19  ;;  %v6162_v59 = vadd.f32 %v10496_v33, %v5440_v61  ;;  %v6161_v51 = vadd.f32 %v10497_v4, %v5439_v38  ;;  %v10498_v15 = vld [vmem:[#allocation51_spill] sm:$0xff]  ;;  %v10514_v8 = vld [vmem:[#allocation41_spill] sm:$0xff]  ;;  %v10517_v61 = vld [vmem:[#allocation20_spill] sm:$0xff] }
 0x502   :  { %v7710_v30 = vpack.c.bf16 %v6799_v11, %v6798_v58  ;;  %v7711_v41 = vpack.c.bf16 %v6801_v32, %v6800_v60  ;;  %v6802_v26 = vadd.f32 %v6692_v63, %v6152_v27  ;;  %v6804_v12 = vadd.f32 %v6765_v31, %v6154_v5  ;;  %v10499_v32 = vld [vmem:[#allocation29_spill] sm:$0xff]  ;;  %v10501_v63 = vld [vmem:[#allocation30_spill] sm:$0xff] }
 0x503   :  { %v6694_v45 = vpop.f32.mrf.mxu1  ;;  %v6767_v49 = vpop.f32.mrf.mxu0  ;;  %v6163_v58 = vadd.f32 %v10498_v15, %v5441_v10  ;;  %v10500_v27 = vld [vmem:[#allocation25_spill] sm:$0xff]  ;;  %v5449_v53 = vadd.f32 %v10518_v2, %v10517_v61  ;;  %v10521_v33 = vld [vmem:[#allocation58_spill] sm:$0xff] }
 0x504   :  { %6954 = vst [vmem:[#allocation12 + $0x20] sm:$0xff] %v7710_v30  ;;  %6955 = vst [vmem:[#allocation12 + $0x28] sm:$0xff] %v7711_v41  ;;  %v6803_v36 = vadd.f32 %v6694_v45, %v6153_v24  ;;  %v6805_v6 = vadd.f32 %v6767_v49, %v6155_v1  ;;  %v5442_v5 = vadd.f32 %v10500_v27, %v10499_v32  ;;  %v10502_v31 = vld [vmem:[#allocation37_spill] sm:$0xff]  ;;  %v10503_v1 = vld [vmem:[#allocation31_spill] sm:$0xff] }
 0x505   :  { %v6698_v47 = vpop.f32.mrf.mxu1  ;;  %v6771_v55 = vpop.f32.mrf.mxu0  ;;  %v5444_v24 = vadd.f32 %v10502_v31, %v10501_v63  ;;  %v10504_v30 = vld [vmem:[#allocation38_spill] sm:$0xff]  ;;  %v10515_v19 = vld [vmem:[#allocation17_spill] sm:$0xff] }
 0x506   :  { %v7712_v18 = vpack.c.bf16 %v6803_v36, %v6802_v26  ;;  %v7713_v56 = vpack.c.bf16 %v6805_v6, %v6804_v12  ;;  %v6806_v35 = vadd.f32 %v6698_v47, %v6156_v48  ;;  %v6808_v29 = vadd.f32 %v6771_v55, %v6158_v21  ;;  %v10507_v26 = vld [vmem:[#allocation52_spill] sm:$0xff]  ;;  %v10508_v36 = vld [vmem:[#allocation53_spill] sm:$0xff]  ;;  %v10510_v47 = vld [vmem:[#allocation55_spill] sm:$0xff] }
 0x507   :  { %v6700_v44 = vpop.f32.mrf.mxu1  ;;  %v6773_v34 = vpop.f32.mrf.mxu0  ;;  %v5443_v41 = vadd.f32 %v10504_v30, %v10503_v1  ;;  %v6164_v12 = vadd.f32 %v10507_v26, %v5442_v5  ;;  %v6166_v6 = vadd.f32 %v10508_v36, %v5444_v24  ;;  %v6167_v55 = vadd.f32 %v10510_v47, %v5445_v23 }
 0x508   :  { %6956 = vst [vmem:[#allocation12 + $0x30] sm:$0xff] %v7712_v18  ;;  %6957 = vst [vmem:[#allocation12 + $0x38] sm:$0xff] %v7713_v56  ;;  %v6807_v40 = vadd.f32 %v6700_v44, %v6157_v39  ;;  %v6809_v14 = vadd.f32 %v6773_v34, %v6159_v37  ;;  %v10512_v37 = vld [vmem:[#allocation40_spill] sm:$0xff]  ;;  %v10513_v56 = vld [vmem:[#allocation34_spill] sm:$0xff]  ;;  %v5447_v16 = vadd.f32 %v10516_v17, %v10515_v19 }
 0x509   :  { %v6702_v50 = vpop.f32.mrf.mxu1  ;;  %v6775_v20 = vpop.f32.mrf.mxu0  ;;  %v6165_v21 = vadd.f32 %v10509_v7, %v5443_v41  ;;  %v5446_v18 = vadd.f32 %v10512_v37, %v10511_v57  ;;  %v5448_v52 = vadd.f32 %v10514_v8, %v10513_v56 }
 0x50a   :  { %v7714_v60 = vpack.c.bf16 %v6807_v40, %v6806_v35  ;;  %v7715_v11 = vpack.c.bf16 %v6809_v14, %v6808_v29  ;;  %v6810_v54 = vadd.f32 %v6702_v50, %v6160_v13  ;;  %v6812_v3 = vadd.f32 %v6775_v20, %v6162_v59  ;;  %v10519_v35 = vld [vmem:[#allocation56_spill] sm:$0xff]  ;;  %v10520_v40 = vld [vmem:[#allocation57_spill] sm:$0xff]  ;;  %v10522_v50 = vld [vmem:[#allocation59_spill] sm:$0xff] }
 0x50b   :  { %v6704_v62 = vpop.f32.mrf.mxu1  ;;  %v6777_v25 = vpop.f32.mrf.mxu0  ;;  %v6168_v29 = vadd.f32 %v10519_v35, %v5446_v18  ;;  %v6170_v14 = vadd.f32 %v10520_v40, %v5448_v52  ;;  %v6169_v59 = vadd.f32 %v10521_v33, %v5447_v16  ;;  %v6171_v20 = vadd.f32 %v10522_v50, %v5449_v53 }
 0x50c   :  { %6958 = vst [vmem:[#allocation12 + $0x40] sm:$0xff] %v7714_v60  ;;  %6959 = vst [vmem:[#allocation12 + $0x48] sm:$0xff] %v7715_v11  ;;  %v6811_v45 = vadd.f32 %v6704_v62, %v6161_v51  ;;  %v6813_v49 = vadd.f32 %v6777_v25, %v6163_v58 }
 0x50d   :  { %v6708_v46 = vpop.f32.mrf.mxu1  ;;  %v6781_v48 = vpop.f32.mrf.mxu0 }
 0x50e   :  { %v7716_v42 = vpack.c.bf16 %v6811_v45, %v6810_v54  ;;  %v7717_v39 = vpack.c.bf16 %v6813_v49, %v6812_v3  ;;  %v6814_v28 = vadd.f32 %v6708_v46, %v6164_v12  ;;  %v6816_v10 = vadd.f32 %v6781_v48, %v6166_v6 }
 0x50f   :  { %v6710_v38 = vpop.f32.mrf.mxu1  ;;  %v6783_v43 = vpop.f32.mrf.mxu0 }
 0x510   :  { %6960 = vst [vmem:[#allocation12 + $0x50] sm:$0xff] %v7716_v42  ;;  %6961 = vst [vmem:[#allocation12 + $0x58] sm:$0xff] %v7717_v39  ;;  %v6815_v44 = vadd.f32 %v6710_v38, %v6165_v21  ;;  %v6817_v34 = vadd.f32 %v6783_v43, %v6167_v55 }
 0x511   :  { %v6712_v22 = vpop.f32.mrf.mxu1  ;;  %v6785_v13 = vpop.f32.mrf.mxu0 }
 0x512   :  { %v7718_v4 = vpack.c.bf16 %v6815_v44, %v6814_v28  ;;  %v7719_v51 = vpack.c.bf16 %v6817_v34, %v6816_v10  ;;  %v6818_v60 = vadd.f32 %v6712_v22, %v6168_v29  ;;  %v6820_v11 = vadd.f32 %v6785_v13, %v6170_v14 }
 0x513   :  { %v6714_v15 = vpop.f32.mrf.mxu1  ;;  %v6787_v58 = vpop.f32.mrf.mxu0 }
 0x514   :  { %6962 = vst [vmem:[#allocation12 + $0x60] sm:$0xff] %v7718_v4  ;;  %6963 = vst [vmem:[#allocation12 + $0x68] sm:$0xff] %v7719_v51  ;;  %v6819_v32 = vadd.f32 %v6714_v15, %v6169_v59  ;;  %v6821_v27 = vadd.f32 %v6787_v58, %v6171_v20 }
 0x516   :  { %v7720_v5 = vpack.c.bf16 %v6819_v32, %v6818_v60  ;;  %v7721_v63 = vpack.c.bf16 %v6821_v27, %v6820_v11 }
 0x518   :  { %6964 = vst [vmem:[#allocation12 + $0x70] sm:$0xff] %v7720_v5  ;;  %6965 = vst [vmem:[#allocation12 + $0x78] sm:$0xff] %v7721_v63 }
 0x519   :  { %8852 = shalt.err (!%p8849_p1)
}
 0x51a   :  { %6977 = dma.vmem_to_hbm [thread:$0]  %s6972_s29, 2048, %s10370_s6, [#allocation5], %s8872_s7, %s8872_s7, %s8873_s8  }
 0x51b   :  { %8867 = dma.done.wait [#allocation5], 2048  }
 0x51c   :  { %8868 = vsyncadd [#allocation5], 4294965248 }
 0x51d   :  { %6981 = vsyncpa [#allocation4], 1 }
 0x51e   :  { %6982 = vsyncpa [#allocation7], 1 }
 0x51f   :  { %6983 = vsyncpa [#allocation10], 1 }
 0x520   :  { %6984 = vsyncpa [#allocation5], 1 }

</bundles_post_ra>
